<compile_context>
chip_gen: v6e
topology: v6e:2x2x1
jax: 0.10.0
libtpu: 0.0.40
codegen_flags: <defaults>
</compile_context>

<pallas_src>
import jax
import jax.numpy as jnp
from jax.experimental import pallas as pl
from jax.experimental.pallas import tpu as pltpu  # noqa: F401  (imported per contract)

# ---------------------------------------------------------------------------
# Model hyper-parameters (small, consistent with the module's __init__).
# ---------------------------------------------------------------------------
B = 2            # batch
S = 8            # sequence length
HIDDEN = 32      # config.hidden_dim
NUM_HEADS = 8
HEAD_DIM = HIDDEN // NUM_HEADS
FF_DIM = HIDDEN * 4
NUM_TASKS = 3
NUM_LAYERS = 3

BS = B * S                    # 16 tokens total
HS = NUM_HEADS * S            # 64 columns per batch block
CW = B * HS                   # 128 columns of the blocked score matrix

# ---- static constant slab (432, 128) row offsets ---------------------------
C_RK = 0       # rows   0:16            Rk replication (pre-scaled by 1/sqrt(dh))
C_MK = 16      # rows  16:48            Mk head-match mask (32,128)
C_BS = 48      # rows  48:176           per-(batch,head) block-sum (128,128)
C_RV = 176     # rows 176:304, lanes 0:16   Rv replication (128,16)
C_MV = 304     # rows 304:432, lanes 0:32   Mv head-match mask (128,32)
CONST_ROWS = 432

# ---- per-call mask slab (64, 128) row offsets -------------------------------
M_BIG = 0      # rows  0:16   attn_big  (0/1 valid own-batch key)
M_BIAS = 16    # rows 16:32   attn_bias ((attn_big-1)*1e9, additive)
M_BM = 32      # rows 32:34, lanes 0:16   bmask (block-diag token mask)
M_BMB = 40     # rows 40:42, lanes 0:16   bmask_bias (additive)
M_MC = 48      # rows 48:64, lane 0       per-token padding mask column
MASK_ROWS = 64

# ---- per-layer weight slab (232, 128) row offsets ---------------------------
L_WQKV = 0     # rows   0:32,  lanes 0:96
L_WO = 32      # rows  32:64,  lanes 0:32
L_W1 = 64      # rows  64:96,  lanes 0:128
L_W2 = 96      # rows  96:224, lanes 0:32
L_VEC = 224    # rows 224:232  [bqkv, bo, bf1, bf2, g1, b1, g2, b2]
LAYER_ROWS = 232

# ---- head weight slab (128, 128) row offsets --------------------------------
H_WIN = 0      # rows   0:32, lanes 0:80  [wt1|ws1|wp1|wc1|we1|wg1]
H_W15 = 32     # rows  32:80, lanes 0:15  block-diag [wt2|ws2|wp2]
H_WCG = 80     # rows  80:96, lanes 0:2   block-diag [wc2|wg2]
H_WE2 = 96     # rows  96:112, lanes 0:7  we2
H_VEC = 112    # rows 112:128  bias / LN vectors
HEAD_ROWS = 128


# ---------------------------------------------------------------------------
# In-kernel math helpers.
# ---------------------------------------------------------------------------
def _dot(a, b):
    return jnp.dot(a, b, preferred_element_type=jnp.float32)


def _gelu(x):
    # Exact GELU (erf-based), matching torch.nn.GELU default.
    return 0.5 * x * (1.0 + jax.lax.erf(x * 0.7071067811865475))


def _layernorm(x, g, b, eps=1e-5):
    mu = jnp.mean(x, axis=-1, keepdims=True)
    var = jnp.mean((x - mu) ** 2, axis=-1, keepdims=True)
    return (x - mu) * jax.lax.rsqrt(var + eps) * g + b


def _softmax(x):
    # Exact softmax (final head outputs; division, not approx reciprocal).
    m = jnp.max(x, axis=-1, keepdims=True)
    e = jnp.exp(x - m)
    return e / jnp.sum(e, axis=-1, keepdims=True)


# ---------------------------------------------------------------------------
# Single fused kernel: 3 transformer layers + pooling + all heads + entities.
# ---------------------------------------------------------------------------
def fused_router_kernel(x_ref, mask_ref, const_ref, wlayer_ref, whead_ref,
                        tok_out_ref, bat_out_ref):
    f32 = jnp.float32
    x = x_ref[...]                                   # (16, 32) flattened (B*S, D)

    attn_big = mask_ref[M_BIG:M_BIG + BS, :]         # (16,128) 0/1 valid-key mask
    attn_bias = mask_ref[M_BIAS:M_BIAS + BS, :]      # (16,128) additive -1e9 mask

    # --------------------- 3 transformer layers ----------------------------
    for l in range(NUM_LAYERS):
        bqkv = wlayer_ref[l, L_VEC + 0:L_VEC + 1, 0:3 * HIDDEN]
        bo = wlayer_ref[l, L_VEC + 1:L_VEC + 2, 0:HIDDEN]
        bf1 = wlayer_ref[l, L_VEC + 2:L_VEC + 3, 0:FF_DIM]
        bf2 = wlayer_ref[l, L_VEC + 3:L_VEC + 4, 0:HIDDEN]
        g1 = wlayer_ref[l, L_VEC + 4:L_VEC + 5, 0:HIDDEN]
        b1 = wlayer_ref[l, L_VEC + 5:L_VEC + 6, 0:HIDDEN]
        g2 = wlayer_ref[l, L_VEC + 6:L_VEC + 7, 0:HIDDEN]
        b2 = wlayer_ref[l, L_VEC + 7:L_VEC + 8, 0:HIDDEN]

        qkv = _dot(x, wlayer_ref[l, L_WQKV:L_WQKV + HIDDEN, 0:3 * HIDDEN]) + bqkv
        q = qkv[:, 0:HIDDEN]
        k = qkv[:, HIDDEN:2 * HIDDEN]
        v = qkv[:, 2 * HIDDEN:3 * HIDDEN]

        # Head/batch block-diagonal K (32,128) / V (128,32) via replication
        # matmuls against precomputed constants (no slice/concat chains).
        # Rk is pre-scaled by 1/sqrt(head_dim), so scores need no extra mul.
        k_big = _dot(k.T, const_ref[C_RK:C_RK + BS, :]) \
            * const_ref[C_MK:C_MK + HIDDEN, :]
        v_big = _dot(const_ref[C_RV:C_RV + CW, 0:BS], v) \
            * const_ref[C_MV:C_MV + CW, 0:HIDDEN]

        scores = _dot(q, k_big) + attn_bias              # (16,128), masked additively
        m = jnp.max(scores, axis=-1, keepdims=True)      # per-row global max
        e = jnp.exp(scores - m) * attn_big               # exact zeros where invalid
        denom = _dot(e, const_ref[C_BS:C_BS + CW, :])    # per-(row,head) sums, broadcast
        a = e * pl.reciprocal(jnp.maximum(denom, 1e-20), approx=True)
        ctx = _dot(a, v_big)                             # (16, 32)

        attn_out = _dot(ctx, wlayer_ref[l, L_WO:L_WO + HIDDEN, 0:HIDDEN]) + bo
        h1 = _layernorm(x + attn_out, g1, b1)
        ff1 = _gelu(_dot(h1, wlayer_ref[l, L_W1:L_W1 + HIDDEN, 0:FF_DIM]) + bf1)
        ff = _dot(ff1, wlayer_ref[l, L_W2:L_W2 + FF_DIM, 0:HIDDEN]) + bf2
        x = _layernorm(h1 + ff, g2, b2)

    seq = x                                              # (16, 32) final repr

    bmask = mask_ref[M_BM:M_BM + B, 0:BS]                # (2,16)
    bmask_bias = mask_ref[M_BMB:M_BMB + B, 0:BS]         # (2,16)
    mcol = mask_ref[M_MC:M_MC + BS, 0:1]                 # (16,1)

    # ------------------ pooling (CLS + global attention) -------------------
    cls = jnp.concatenate([seq[0:1, :], seq[S:S + 1, :]], axis=0)       # (2, 32)
    pool_scores = jax.lax.dot_general(
        cls, seq, (((1,), (1,)), ((), ())),
        preferred_element_type=f32) * (1.0 / (HIDDEN ** 0.5)) + bmask_bias
    pm = jnp.max(pool_scores, axis=-1, keepdims=True)
    pe = jnp.exp(pool_scores - pm)
    w = pe / jnp.sum(pe, axis=-1, keepdims=True)
    w = w * bmask
    w = w / jnp.maximum(jnp.sum(w, axis=-1, keepdims=True), 1e-9)       # (2,16)
    att = _dot(w, seq)                                                  # (2,32)
    pooled = (cls + att) * 0.5

    # ------------------ packed head biases / LN vectors --------------------
    b56 = whead_ref[H_VEC + 0:H_VEC + 1, 0:56]
    gt = whead_ref[H_VEC + 1:H_VEC + 2, 0:16]
    btn = whead_ref[H_VEC + 2:H_VEC + 3, 0:16]
    gs = whead_ref[H_VEC + 3:H_VEC + 4, 0:16]
    bsn = whead_ref[H_VEC + 4:H_VEC + 5, 0:16]
    b15 = whead_ref[H_VEC + 5:H_VEC + 6, 0:15]
    bcg = whead_ref[H_VEC + 6:H_VEC + 7, 0:2]
    be1 = whead_ref[H_VEC + 7:H_VEC + 8, 0:16]
    be2 = whead_ref[H_VEC + 8:H_VEC + 9, 0:7]
    bg1 = whead_ref[H_VEC + 9:H_VEC + 10, 0:8]

    # ---------------- pooled classification heads (batched over B) ---------
    h56 = _dot(pooled, whead_ref[H_WIN:H_WIN + HIDDEN, 0:56]) + b56     # (2,56)
    th = _gelu(_layernorm(h56[:, 0:16], gt, btn))                       # task
    sh = _gelu(_layernorm(h56[:, 16:32], gs, bsn))                      # structure
    ph = _gelu(h56[:, 32:48])                                           # topic
    ch = jnp.maximum(h56[:, 48:56], 0.0)                                # confidence

    h48 = jnp.concatenate([th, sh, ph], axis=1)                         # (2,48)
    logits15 = _dot(h48, whead_ref[H_W15:H_W15 + 48, 0:15]) + b15       # fused 2nd stage
    task_logits = logits15[:, 0:3]
    task_probs = _softmax(task_logits)
    struct_probs = _softmax(logits15[:, 3:7])
    topic_probs = _softmax(logits15[:, 7:15])

    # ------------------------- entity detector -----------------------------
    eh = _gelu(_dot(seq, whead_ref[H_WIN:H_WIN + HIDDEN, 56:72]) + be1)  # (16,16)
    ent_logits = _dot(eh, whead_ref[H_WE2:H_WE2 + 16, 0:7]) + be2        # (16,7)
    ent_probs = _softmax(ent_logits)
    is_ent = (1.0 - ent_probs[:, 6:7]) * mcol                            # (16,1)

    sums = _dot(bmask, seq)                                              # (2,32)
    lens = jnp.maximum(jnp.sum(bmask, axis=-1, keepdims=True), 1.0)
    avg = sums / lens
    gh = jnp.maximum(_dot(avg, whead_ref[H_WIN:H_WIN + HIDDEN, 72:80]) + bg1, 0.0)

    cg = jnp.concatenate([ch, gh], axis=1)                               # (2,16)
    cg_logits = _dot(cg, whead_ref[H_WCG:H_WCG + 16, 0:2]) + bcg         # (2,2)
    conf = jax.nn.sigmoid(cg_logits[:, 0:1])
    has_ent = jax.nn.sigmoid(cg_logits[:, 1:2])

    # ------------------------ lane-dense output slabs ----------------------
    tok_out_ref[...] = jnp.concatenate(
        [ent_logits, is_ent, jnp.zeros((BS, 128 - 8), dtype=f32)], axis=1)

    bat_out_ref[...] = jnp.concatenate(
        [task_logits, task_probs, struct_probs, topic_probs,
         conf, has_ent, w, pooled,
         jnp.zeros((B, 128 - 68), dtype=f32)], axis=1)


# ---------------------------------------------------------------------------
# Static constants (replication / mask / block-sum matrices).
# ---------------------------------------------------------------------------
def _build_static_consts():
    scale = 1.0 / (HEAD_DIM ** 0.5)
    row = jnp.arange(BS)
    col = jnp.arange(CW)
    d = jnp.arange(HIDDEN)
    rb, rs = row // S, row % S
    cb, chh, cs = col // HS, (col % HS) // S, col % S
    # sel[b*S+s, b'*HS+h*S+s'] = 1 iff b==b' and s==s'   (any h)
    sel = ((rb[:, None] == cb[None, :]) & (rs[:, None] == cs[None, :])).astype(jnp.float32)
    # mk[d, col] = 1 iff d // HEAD_DIM == h(col)
    mk = ((d[:, None] // HEAD_DIM) == chh[None, :]).astype(jnp.float32)
    # bsum[c, c'] = 1 iff the columns belong to the same (batch, head) group
    bsum = ((col[:, None] // S) == (col[None, :] // S)).astype(jnp.float32)

    const = jnp.zeros((CONST_ROWS, 128), jnp.float32)
    const = const.at[C_RK:C_RK + BS, :].set(sel * scale)      # scale folded into Rk
    const = const.at[C_MK:C_MK + HIDDEN, :].set(mk)
    const = const.at[C_BS:C_BS + CW, :].set(bsum)
    const = const.at[C_RV:C_RV + CW, 0:BS].set(sel.T)         # unscaled
    const = const.at[C_MV:C_MV + CW, 0:HIDDEN].set(mk.T)
    return const


# ---------------------------------------------------------------------------
# Parameter initialization (deterministic, synthetic) + packing.
# ---------------------------------------------------------------------------
def init_params(key):
    D = HIDDEN
    keys = iter(jax.random.split(key, 64))

    def lin(fin, fout):
        w = jax.random.normal(next(keys), (fin, fout), jnp.float32) * (1.0 / float(fin) ** 0.5)
        b = jax.random.normal(next(keys), (1, fout), jnp.float32) * 0.02
        return w, b

    layers = []
    for _ in range(NUM_LAYERS):
        wqkv, bqkv = lin(D, 3 * D)
        wo, bo = lin(D, D)
        w1, bf1 = lin(D, FF_DIM)
        w2, bf2 = lin(FF_DIM, D)
        layers.append(dict(
            wqkv=wqkv, bqkv=bqkv, wo=wo, bo=bo,
            g1=jnp.ones((1, D)), b1=jnp.zeros((1, D)),
            w1=w1, bf1=bf1, w2=w2, bf2=bf2,
            g2=jnp.ones((1, D)), b2=jnp.zeros((1, D))))

    wt1, bt1 = lin(D, D // 2)
    wt2, bt2 = lin(D // 2, NUM_TASKS)
    ws1, bs1 = lin(D, D // 2)
    ws2, bs2 = lin(D // 2, 4)
    wc1, bc1 = lin(D, D // 4)
    wc2, bc2 = lin(D // 4, 1)
    wp1, bp1 = lin(D, D // 2)
    wp2, bp2 = lin(D // 2, 8)
    heads = dict(
        wt1=wt1, bt1=bt1, gt=jnp.ones((1, D // 2)), btn=jnp.zeros((1, D // 2)),
        wt2=wt2, bt2=bt2,
        ws1=ws1, bs1=bs1, gs=jnp.ones((1, D // 2)), bsn=jnp.zeros((1, D // 2)),
        ws2=ws2, bs2=bs2,
        wc1=wc1, bc1=bc1, wc2=wc2, bc2=bc2,
        wp1=wp1, bp1=bp1, wp2=wp2, bp2=bp2)

    we1, be1 = lin(D, D // 2)
    we2, be2 = lin(D // 2, 7)
    wg1, bg1 = lin(D, D // 4)
    wg2, bg2 = lin(D // 4, 1)
    entity = dict(we1=we1, be1=be1, we2=we2, be2=be2,
                  wg1=wg1, bg1=bg1, wg2=wg2, bg2=bg2)

    compat = jnp.ones((NUM_TASKS, NUM_TASKS), jnp.float32)   # torch.ones init
    return dict(layers=layers, heads=heads, entity=entity, compat=compat)


def pack_params(params):
    """Coalesce parameters into a few lane-dense VMEM slabs."""
    # ---- per-layer weight slabs (3, 232, 128) ----
    wlayer = []
    vec_order = [("bqkv", 3 * HIDDEN), ("bo", HIDDEN), ("bf1", FF_DIM), ("bf2", HIDDEN),
                 ("g1", HIDDEN), ("b1", HIDDEN), ("g2", HIDDEN), ("b2", HIDDEN)]
    for lp in params["layers"]:
        slab = jnp.zeros((LAYER_ROWS, 128), jnp.float32)
        slab = slab.at[L_WQKV:L_WQKV + HIDDEN, 0:3 * HIDDEN].set(lp["wqkv"])
        slab = slab.at[L_WO:L_WO + HIDDEN, 0:HIDDEN].set(lp["wo"])
        slab = slab.at[L_W1:L_W1 + HIDDEN, 0:FF_DIM].set(lp["w1"])
        slab = slab.at[L_W2:L_W2 + FF_DIM, 0:HIDDEN].set(lp["w2"])
        for r, (name, width) in enumerate(vec_order):
            slab = slab.at[L_VEC + r, 0:width].set(jnp.ravel(lp[name]))
        wlayer.append(slab)
    wlayer = jnp.stack(wlayer)

    # ---- head weight slab (128, 128) ----
    hp, ep = params["heads"], params["entity"]
    head = jnp.zeros((HEAD_ROWS, 128), jnp.float32)
    whin = jnp.concatenate([hp["wt1"], hp["ws1"], hp["wp1"], hp["wc1"],
                            ep["we1"], ep["wg1"]], axis=1)               # (32, 80)
    head = head.at[H_WIN:H_WIN + HIDDEN, 0:80].set(whin)
    # fused block-diagonal second stages
    head = head.at[H_W15 + 0:H_W15 + 16, 0:3].set(hp["wt2"])
    head = head.at[H_W15 + 16:H_W15 + 32, 3:7].set(hp["ws2"])
    head = head.at[H_W15 + 32:H_W15 + 48, 7:15].set(hp["wp2"])
    head = head.at[H_WCG + 0:H_WCG + 8, 0:1].set(hp["wc2"])
    head = head.at[H_WCG + 8:H_WCG + 16, 1:2].set(ep["wg2"])
    head = head.at[H_WE2:H_WE2 + 16, 0:7].set(ep["we2"])
    # bias / LN vectors
    head = head.at[H_VEC + 0, 0:16].set(jnp.ravel(hp["bt1"]))
    head = head.at[H_VEC + 0, 16:32].set(jnp.ravel(hp["bs1"]))
    head = head.at[H_VEC + 0, 32:48].set(jnp.ravel(hp["bp1"]))
    head = head.at[H_VEC + 0, 48:56].set(jnp.ravel(hp["bc1"]))
    head = head.at[H_VEC + 1, 0:16].set(jnp.ravel(hp["gt"]))
    head = head.at[H_VEC + 2, 0:16].set(jnp.ravel(hp["btn"]))
    head = head.at[H_VEC + 3, 0:16].set(jnp.ravel(hp["gs"]))
    head = head.at[H_VEC + 4, 0:16].set(jnp.ravel(hp["bsn"]))
    head = head.at[H_VEC + 5, 0:3].set(jnp.ravel(hp["bt2"]))
    head = head.at[H_VEC + 5, 3:7].set(jnp.ravel(hp["bs2"]))
    head = head.at[H_VEC + 5, 7:15].set(jnp.ravel(hp["bp2"]))
    head = head.at[H_VEC + 6, 0:1].set(jnp.ravel(hp["bc2"]))
    head = head.at[H_VEC + 6, 1:2].set(jnp.ravel(ep["bg2"]))
    head = head.at[H_VEC + 7, 0:16].set(jnp.ravel(ep["be1"]))
    head = head.at[H_VEC + 8, 0:7].set(jnp.ravel(ep["be2"]))
    head = head.at[H_VEC + 9, 0:8].set(jnp.ravel(ep["bg1"]))

    return dict(wlayer=wlayer, whead=head, const=_build_static_consts(),
                compat=params["compat"])


# ---------------------------------------------------------------------------
# Full LanguageRouter forward pass (single fused pallas_call + JAX glue).
# ---------------------------------------------------------------------------
@jax.jit
def language_router_forward(packed, hidden_states, attention_mask):
    am = attention_mask.astype(jnp.float32)                    # (B, S)
    x_flat = hidden_states.reshape(BS, HIDDEN)
    amf = am.reshape(BS)

    # Per-call mask slab (attention-mask dependent), packed into one operand.
    col = jnp.arange(CW)
    col_b, col_s = col // HS, col % S
    row_b = jnp.arange(BS) // S
    key_valid = am[col_b, col_s]                               # (128,)
    attn_big = (row_b[None, :] == col_b[:, None]).T.astype(jnp.float32)  # placeholder
    attn_big = (row_b[:, None] == col_b[None, :]).astype(jnp.float32) * key_valid[None, :]
    bmask = (jnp.arange(B)[:, None] == row_b[None, :]).astype(jnp.float32) * amf[None, :]

    mask_slab = jnp.zeros((MASK_ROWS, 128), jnp.float32)
    mask_slab = mask_slab.at[M_BIG:M_BIG + BS, :].set(attn_big)
    mask_slab = mask_slab.at[M_BIAS:M_BIAS + BS, :].set((attn_big - 1.0) * 1e9)
    mask_slab = mask_slab.at[M_BM:M_BM + B, 0:BS].set(bmask)
    mask_slab = mask_slab.at[M_BMB:M_BMB + B, 0:BS].set((bmask - 1.0) * 1e9)
    mask_slab = mask_slab.at[M_MC:M_MC + BS, 0:1].set(amf.reshape(BS, 1))

    tok_out, bat_out = pl.pallas_call(
        fused_router_kernel,
        out_shape=(jax.ShapeDtypeStruct((BS, 128), jnp.float32),   # per-token slab
                   jax.ShapeDtypeStruct((B, 128), jnp.float32)),   # per-batch slab
        cost_estimate=pl.CostEstimate(flops=4_500_000,
                                      transcendentals=16_000,
                                      bytes_accessed=700_000),
    )(x_flat, mask_slab, packed["const"], packed["wlayer"], packed["whead"])

    # unpack lane-dense slabs
    ent_logits = tok_out[:, 0:7].reshape(B, S, 7)
    is_ent = tok_out[:, 7].reshape(B, S)
    task_logits = bat_out[:, 0:3]
    task_probs = bat_out[:, 3:6]
    struct_probs = bat_out[:, 6:10]
    topic_probs = bat_out[:, 10:18]
    confidence = bat_out[:, 18:19]
    has_ent_prob = bat_out[:, 19:20]
    w_full = bat_out[:, 20:36].reshape(B, B, S)                 # per-batch pooled attn
    attw = w_full[jnp.arange(B), jnp.arange(B)].reshape(B, 1, S)
    pooled = bat_out[:, 36:68]

    # Glue: argmax / thresholds / tiny 3x3 compatibility product.
    compat_sm = jax.nn.softmax(packed["compat"], axis=-1)
    expert_weights = task_probs @ compat_sm

    return {
        "task": jnp.argmax(task_probs, axis=-1),
        "task_logits": task_logits,
        "task_probs": task_probs,
        "structure_type": jnp.argmax(struct_probs, axis=-1),
        "structure_probs": struct_probs,
        "has_entities": has_ent_prob > 0.5,
        "entity_positions": is_ent > 0.5,
        "entity_types": jnp.argmax(ent_logits[:, :, :6], axis=-1),
        "topic": jnp.argmax(topic_probs, axis=-1),
        "topic_probs": topic_probs,
        "confidence": confidence,
        "attention_weights": attw,            # (B, 1, S)
        "expert_weights": expert_weights,     # (B, num_tasks)
        "sequence_representation": pooled,    # (B, D)
    }


# ---------------------------------------------------------------------------
if __name__ == "__main__":
    key = jax.random.PRNGKey(0)
    kp, kx = jax.random.split(key)
    params = init_params(kp)
    packed = pack_params(params)

    hidden_states = jax.random.normal(kx, (B, S, HIDDEN), jnp.float32)
    attention_mask = jnp.ones((B, S), jnp.float32).at[1, 6:].set(0.0)  # pad last 2 of batch 1

    out = language_router_forward(packed, hidden_states, attention_mask)
    jax.block_until_ready(out)

    # Light sanity checks.
    assert out["task_probs"].shape == (B, NUM_TASKS)
    assert out["attention_weights"].shape == (B, 1, S)
    assert out["entity_types"].shape == (B, S)
    assert out["sequence_representation"].shape == (B, HIDDEN)
    assert bool(jnp.all(jnp.isfinite(out["task_probs"])))
    assert bool(jnp.all(jnp.abs(jnp.sum(out["task_probs"], axis=-1) - 1.0) < 1e-2))
    assert bool(jnp.all(jnp.abs(jnp.sum(out["attention_weights"], axis=-1) - 1.0) < 1e-2))
    print("KERNEL_OK")
</pallas_src>

<mosaic_0001>
module attributes {stable_mosaic.version = 11 : i64} {
  func.func @fused_router_kernel(%arg0: memref<16x32xf32, #tpu.memory_space<vmem>>, %arg1: memref<64x128xf32, #tpu.memory_space<vmem>>, %arg2: memref<432x128xf32, #tpu.memory_space<vmem>>, %arg3: memref<3x232x128xf32, #tpu.memory_space<vmem>>, %arg4: memref<128x128xf32, #tpu.memory_space<vmem>>, %arg5: memref<16x128xf32, #tpu.memory_space<vmem>>, %arg6: memref<2x128xf32, #tpu.memory_space<vmem>>) attributes {dimension_semantics = [], scalar_prefetch = 0 : i64, scratch_operands = 0 : i64, tpu.core_type = #tpu.core_type<tc>} {
    %c0 = arith.constant 0 : index
    %c0_0 = arith.constant 0 : index
    %0 = vector.load %arg0[%c0, %c0_0] : memref<16x32xf32, #tpu.memory_space<vmem>>, vector<16x32xf32>
    %c0_1 = arith.constant 0 : index
    %c0_2 = arith.constant 0 : index
    %1 = vector.load %arg1[%c0_1, %c0_2] : memref<64x128xf32, #tpu.memory_space<vmem>>, vector<16x128xf32>
    %c16 = arith.constant 16 : index
    %c0_3 = arith.constant 0 : index
    %2 = vector.load %arg1[%c16, %c0_3] : memref<64x128xf32, #tpu.memory_space<vmem>>, vector<16x128xf32>
    %c0_4 = arith.constant 0 : index
    %c224 = arith.constant 224 : index
    %c0_5 = arith.constant 0 : index
    %3 = vector.load %arg3[%c0_4, %c224, %c0_5] : memref<3x232x128xf32, #tpu.memory_space<vmem>>, vector<1x1x96xf32>
    %4 = vector.shape_cast %3 : vector<1x1x96xf32> to vector<1x96xf32>
    %c0_6 = arith.constant 0 : index
    %c225 = arith.constant 225 : index
    %c0_7 = arith.constant 0 : index
    %5 = vector.load %arg3[%c0_6, %c225, %c0_7] : memref<3x232x128xf32, #tpu.memory_space<vmem>>, vector<1x1x32xf32>
    %6 = vector.shape_cast %5 : vector<1x1x32xf32> to vector<1x32xf32>
    %c0_8 = arith.constant 0 : index
    %c226 = arith.constant 226 : index
    %c0_9 = arith.constant 0 : index
    %7 = vector.load %arg3[%c0_8, %c226, %c0_9] : memref<3x232x128xf32, #tpu.memory_space<vmem>>, vector<1x1x128xf32>
    %8 = vector.shape_cast %7 : vector<1x1x128xf32> to vector<1x128xf32>
    %c0_10 = arith.constant 0 : index
    %c227 = arith.constant 227 : index
    %c0_11 = arith.constant 0 : index
    %9 = vector.load %arg3[%c0_10, %c227, %c0_11] : memref<3x232x128xf32, #tpu.memory_space<vmem>>, vector<1x1x32xf32>
    %10 = vector.shape_cast %9 : vector<1x1x32xf32> to vector<1x32xf32>
    %c0_12 = arith.constant 0 : index
    %c228 = arith.constant 228 : index
    %c0_13 = arith.constant 0 : index
    %11 = vector.load %arg3[%c0_12, %c228, %c0_13] : memref<3x232x128xf32, #tpu.memory_space<vmem>>, vector<1x1x32xf32>
    %12 = vector.shape_cast %11 : vector<1x1x32xf32> to vector<1x32xf32>
    %c0_14 = arith.constant 0 : index
    %c229 = arith.constant 229 : index
    %c0_15 = arith.constant 0 : index
    %13 = vector.load %arg3[%c0_14, %c229, %c0_15] : memref<3x232x128xf32, #tpu.memory_space<vmem>>, vector<1x1x32xf32>
    %14 = vector.shape_cast %13 : vector<1x1x32xf32> to vector<1x32xf32>
    %c0_16 = arith.constant 0 : index
    %c230 = arith.constant 230 : index
    %c0_17 = arith.constant 0 : index
    %15 = vector.load %arg3[%c0_16, %c230, %c0_17] : memref<3x232x128xf32, #tpu.memory_space<vmem>>, vector<1x1x32xf32>
    %16 = vector.shape_cast %15 : vector<1x1x32xf32> to vector<1x32xf32>
    %c0_18 = arith.constant 0 : index
    %c231 = arith.constant 231 : index
    %c0_19 = arith.constant 0 : index
    %17 = vector.load %arg3[%c0_18, %c231, %c0_19] : memref<3x232x128xf32, #tpu.memory_space<vmem>>, vector<1x1x32xf32>
    %18 = vector.shape_cast %17 : vector<1x1x32xf32> to vector<1x32xf32>
    %c0_20 = arith.constant 0 : index
    %c0_21 = arith.constant 0 : index
    %c0_22 = arith.constant 0 : index
    %19 = vector.load %arg3[%c0_20, %c0_21, %c0_22] : memref<3x232x128xf32, #tpu.memory_space<vmem>>, vector<1x32x96xf32>
    %20 = vector.shape_cast %19 : vector<1x32x96xf32> to vector<32x96xf32>
    %cst = arith.constant dense<0.000000e+00> : vector<16x96xf32>
    %21 = tpu.matmul %0, %20, %cst {dimension_numbers = #tpu.dot_dimension_numbers<[1], [0], [0], [1], [0, 0, 1, 1], [], []>} : vector<16x32xf32>, vector<32x96xf32>, vector<16x96xf32> -> vector<16x96xf32>
    %22 = vector.broadcast %4 : vector<1x96xf32> to vector<16x96xf32>
    %23 = arith.addf %21, %22 : vector<16x96xf32>
    %24 = vector.extract_strided_slice %23 {offsets = [0, 0], sizes = [16, 32], strides = [1, 1]} : vector<16x96xf32> to vector<16x32xf32>
    %25 = vector.extract_strided_slice %23 {offsets = [0, 32], sizes = [16, 32], strides = [1, 1]} : vector<16x96xf32> to vector<16x32xf32>
    %26 = vector.extract_strided_slice %23 {offsets = [0, 64], sizes = [16, 32], strides = [1, 1]} : vector<16x96xf32> to vector<16x32xf32>
    %27 = tpu.transpose %25, [1, 0] : vector<16x32xf32> -> vector<32x16xf32>
    %c0_23 = arith.constant 0 : index
    %c0_24 = arith.constant 0 : index
    %28 = vector.load %arg2[%c0_23, %c0_24] : memref<432x128xf32, #tpu.memory_space<vmem>>, vector<16x128xf32>
    %cst_25 = arith.constant dense<0.000000e+00> : vector<32x128xf32>
    %29 = tpu.matmul %27, %28, %cst_25 {dimension_numbers = #tpu.dot_dimension_numbers<[1], [0], [0], [1], [0, 0, 1, 1], [], []>} : vector<32x16xf32>, vector<16x128xf32>, vector<32x128xf32> -> vector<32x128xf32>
    %c16_26 = arith.constant 16 : index
    %c0_27 = arith.constant 0 : index
    %30 = vector.load %arg2[%c16_26, %c0_27] : memref<432x128xf32, #tpu.memory_space<vmem>>, vector<32x128xf32>
    %31 = arith.mulf %29, %30 : vector<32x128xf32>
    %c176 = arith.constant 176 : index
    %c0_28 = arith.constant 0 : index
    %32 = vector.load %arg2[%c176, %c0_28] : memref<432x128xf32, #tpu.memory_space<vmem>>, vector<128x16xf32>
    %cst_29 = arith.constant dense<0.000000e+00> : vector<128x32xf32>
    %33 = tpu.matmul %32, %26, %cst_29 {dimension_numbers = #tpu.dot_dimension_numbers<[1], [0], [0], [1], [0, 0, 1, 1], [], []>} : vector<128x16xf32>, vector<16x32xf32>, vector<128x32xf32> -> vector<128x32xf32>
    %c304 = arith.constant 304 : index
    %c0_30 = arith.constant 0 : index
    %34 = vector.load %arg2[%c304, %c0_30] : memref<432x128xf32, #tpu.memory_space<vmem>>, vector<128x32xf32>
    %35 = arith.mulf %33, %34 : vector<128x32xf32>
    %cst_31 = arith.constant dense<0.000000e+00> : vector<16x128xf32>
    %36 = tpu.matmul %24, %31, %cst_31 {dimension_numbers = #tpu.dot_dimension_numbers<[1], [0], [0], [1], [0, 0, 1, 1], [], []>} : vector<16x32xf32>, vector<32x128xf32>, vector<16x128xf32> -> vector<16x128xf32>
    %37 = arith.addf %36, %2 : vector<16x128xf32>
    %cst_32 = arith.constant dense<0xFF800000> : vector<16xf32>
    %38 = vector.multi_reduction <maximumf>, %37, %cst_32 [1] : vector<16x128xf32> to vector<16xf32>
    %39 = vector.shape_cast %38 : vector<16xf32> to vector<16x1xf32>
    %40 = vector.broadcast %39 : vector<16x1xf32> to vector<16x128xf32>
    %41 = arith.subf %37, %40 : vector<16x128xf32>
    %42 = math.exp %41 : vector<16x128xf32>
    %43 = arith.mulf %42, %1 : vector<16x128xf32>
    %c48 = arith.constant 48 : index
    %c0_33 = arith.constant 0 : index
    %44 = vector.load %arg2[%c48, %c0_33] : memref<432x128xf32, #tpu.memory_space<vmem>>, vector<128x128xf32>
    %cst_34 = arith.constant dense<0.000000e+00> : vector<16x128xf32>
    %45 = tpu.matmul %43, %44, %cst_34 {dimension_numbers = #tpu.dot_dimension_numbers<[1], [0], [0], [1], [0, 0, 1, 1], [], []>} : vector<16x128xf32>, vector<128x128xf32>, vector<16x128xf32> -> vector<16x128xf32>
    %cst_35 = arith.constant 9.99999968E-21 : f32
    %46 = vector.broadcast %cst_35 : f32 to vector<16x128xf32>
    %47 = arith.maximumf %45, %46 : vector<16x128xf32>
    %48 = tpu.reciprocal %47 {approx = true} : vector<16x128xf32> -> vector<16x128xf32>
    %49 = arith.mulf %43, %48 : vector<16x128xf32>
    %cst_36 = arith.constant dense<0.000000e+00> : vector<16x32xf32>
    %50 = tpu.matmul %49, %35, %cst_36 {dimension_numbers = #tpu.dot_dimension_numbers<[1], [0], [0], [1], [0, 0, 1, 1], [], []>} : vector<16x128xf32>, vector<128x32xf32>, vector<16x32xf32> -> vector<16x32xf32>
    %c0_37 = arith.constant 0 : index
    %c32 = arith.constant 32 : index
    %c0_38 = arith.constant 0 : index
    %51 = vector.load %arg3[%c0_37, %c32, %c0_38] : memref<3x232x128xf32, #tpu.memory_space<vmem>>, vector<1x32x32xf32>
    %52 = vector.shape_cast %51 : vector<1x32x32xf32> to vector<32x32xf32>
    %cst_39 = arith.constant dense<0.000000e+00> : vector<16x32xf32>
    %53 = tpu.matmul %50, %52, %cst_39 {dimension_numbers = #tpu.dot_dimension_numbers<[1], [0], [0], [1], [0, 0, 1, 1], [], []>} : vector<16x32xf32>, vector<32x32xf32>, vector<16x32xf32> -> vector<16x32xf32>
    %54 = vector.broadcast %6 : vector<1x32xf32> to vector<16x32xf32>
    %55 = arith.addf %53, %54 : vector<16x32xf32>
    %56 = arith.addf %0, %55 : vector<16x32xf32>
    %cst_40 = arith.constant dense<0.000000e+00> : vector<16xf32>
    %57 = vector.multi_reduction <add>, %56, %cst_40 [1] : vector<16x32xf32> to vector<16xf32>
    %58 = vector.shape_cast %57 : vector<16xf32> to vector<16x1xf32>
    %cst_41 = arith.constant 3.200000e+01 : f32
    %59 = vector.broadcast %cst_41 : f32 to vector<16x1xf32>
    %60 = arith.divf %58, %59 : vector<16x1xf32>
    %61 = vector.broadcast %60 : vector<16x1xf32> to vector<16x32xf32>
    %62 = arith.subf %56, %61 : vector<16x32xf32>
    %63 = arith.mulf %62, %62 : vector<16x32xf32>
    %cst_42 = arith.constant dense<0.000000e+00> : vector<16xf32>
    %64 = vector.multi_reduction <add>, %63, %cst_42 [1] : vector<16x32xf32> to vector<16xf32>
    %65 = vector.shape_cast %64 : vector<16xf32> to vector<16x1xf32>
    %cst_43 = arith.constant 3.200000e+01 : f32
    %66 = vector.broadcast %cst_43 : f32 to vector<16x1xf32>
    %67 = arith.divf %65, %66 : vector<16x1xf32>
    %68 = vector.broadcast %60 : vector<16x1xf32> to vector<16x32xf32>
    %69 = arith.subf %56, %68 : vector<16x32xf32>
    %cst_44 = arith.constant 9.99999974E-6 : f32
    %70 = vector.broadcast %cst_44 : f32 to vector<16x1xf32>
    %71 = arith.addf %67, %70 : vector<16x1xf32>
    %72 = math.rsqrt %71 : vector<16x1xf32>
    %73 = vector.broadcast %72 : vector<16x1xf32> to vector<16x32xf32>
    %74 = arith.mulf %69, %73 : vector<16x32xf32>
    %75 = vector.broadcast %12 : vector<1x32xf32> to vector<16x32xf32>
    %76 = arith.mulf %74, %75 : vector<16x32xf32>
    %77 = vector.broadcast %14 : vector<1x32xf32> to vector<16x32xf32>
    %78 = arith.addf %76, %77 : vector<16x32xf32>
    %c0_45 = arith.constant 0 : index
    %c64 = arith.constant 64 : index
    %c0_46 = arith.constant 0 : index
    %79 = vector.load %arg3[%c0_45, %c64, %c0_46] : memref<3x232x128xf32, #tpu.memory_space<vmem>>, vector<1x32x128xf32>
    %80 = vector.shape_cast %79 : vector<1x32x128xf32> to vector<32x128xf32>
    %cst_47 = arith.constant dense<0.000000e+00> : vector<16x128xf32>
    %81 = tpu.matmul %78, %80, %cst_47 {dimension_numbers = #tpu.dot_dimension_numbers<[1], [0], [0], [1], [0, 0, 1, 1], [], []>} : vector<16x32xf32>, vector<32x128xf32>, vector<16x128xf32> -> vector<16x128xf32>
    %82 = vector.broadcast %8 : vector<1x128xf32> to vector<16x128xf32>
    %83 = arith.addf %81, %82 : vector<16x128xf32>
    %cst_48 = arith.constant 5.000000e-01 : f32
    %84 = vector.broadcast %cst_48 : f32 to vector<16x128xf32>
    %85 = arith.mulf %84, %83 : vector<16x128xf32>
    %cst_49 = arith.constant 0.707106769 : f32
    %86 = vector.broadcast %cst_49 : f32 to vector<16x128xf32>
    %87 = arith.mulf %83, %86 : vector<16x128xf32>
    %88 = math.erf %87 : vector<16x128xf32>
    %cst_50 = arith.constant 1.000000e+00 : f32
    %89 = vector.broadcast %cst_50 : f32 to vector<16x128xf32>
    %90 = arith.addf %89, %88 : vector<16x128xf32>
    %91 = arith.mulf %85, %90 : vector<16x128xf32>
    %c0_51 = arith.constant 0 : index
    %c96 = arith.constant 96 : index
    %c0_52 = arith.constant 0 : index
    %92 = vector.load %arg3[%c0_51, %c96, %c0_52] : memref<3x232x128xf32, #tpu.memory_space<vmem>>, vector<1x128x32xf32>
    %93 = vector.shape_cast %92 : vector<1x128x32xf32> to vector<128x32xf32>
    %cst_53 = arith.constant dense<0.000000e+00> : vector<16x32xf32>
    %94 = tpu.matmul %91, %93, %cst_53 {dimension_numbers = #tpu.dot_dimension_numbers<[1], [0], [0], [1], [0, 0, 1, 1], [], []>} : vector<16x128xf32>, vector<128x32xf32>, vector<16x32xf32> -> vector<16x32xf32>
    %95 = vector.broadcast %10 : vector<1x32xf32> to vector<16x32xf32>
    %96 = arith.addf %94, %95 : vector<16x32xf32>
    %97 = arith.addf %78, %96 : vector<16x32xf32>
    %cst_54 = arith.constant dense<0.000000e+00> : vector<16xf32>
    %98 = vector.multi_reduction <add>, %97, %cst_54 [1] : vector<16x32xf32> to vector<16xf32>
    %99 = vector.shape_cast %98 : vector<16xf32> to vector<16x1xf32>
    %cst_55 = arith.constant 3.200000e+01 : f32
    %100 = vector.broadcast %cst_55 : f32 to vector<16x1xf32>
    %101 = arith.divf %99, %100 : vector<16x1xf32>
    %102 = vector.broadcast %101 : vector<16x1xf32> to vector<16x32xf32>
    %103 = arith.subf %97, %102 : vector<16x32xf32>
    %104 = arith.mulf %103, %103 : vector<16x32xf32>
    %cst_56 = arith.constant dense<0.000000e+00> : vector<16xf32>
    %105 = vector.multi_reduction <add>, %104, %cst_56 [1] : vector<16x32xf32> to vector<16xf32>
    %106 = vector.shape_cast %105 : vector<16xf32> to vector<16x1xf32>
    %cst_57 = arith.constant 3.200000e+01 : f32
    %107 = vector.broadcast %cst_57 : f32 to vector<16x1xf32>
    %108 = arith.divf %106, %107 : vector<16x1xf32>
    %109 = vector.broadcast %101 : vector<16x1xf32> to vector<16x32xf32>
    %110 = arith.subf %97, %109 : vector<16x32xf32>
    %cst_58 = arith.constant 9.99999974E-6 : f32
    %111 = vector.broadcast %cst_58 : f32 to vector<16x1xf32>
    %112 = arith.addf %108, %111 : vector<16x1xf32>
    %113 = math.rsqrt %112 : vector<16x1xf32>
    %114 = vector.broadcast %113 : vector<16x1xf32> to vector<16x32xf32>
    %115 = arith.mulf %110, %114 : vector<16x32xf32>
    %116 = vector.broadcast %16 : vector<1x32xf32> to vector<16x32xf32>
    %117 = arith.mulf %115, %116 : vector<16x32xf32>
    %118 = vector.broadcast %18 : vector<1x32xf32> to vector<16x32xf32>
    %119 = arith.addf %117, %118 : vector<16x32xf32>
    %c1 = arith.constant 1 : index
    %c224_59 = arith.constant 224 : index
    %c0_60 = arith.constant 0 : index
    %120 = vector.load %arg3[%c1, %c224_59, %c0_60] : memref<3x232x128xf32, #tpu.memory_space<vmem>>, vector<1x1x96xf32>
    %121 = vector.shape_cast %120 : vector<1x1x96xf32> to vector<1x96xf32>
    %c1_61 = arith.constant 1 : index
    %c225_62 = arith.constant 225 : index
    %c0_63 = arith.constant 0 : index
    %122 = vector.load %arg3[%c1_61, %c225_62, %c0_63] : memref<3x232x128xf32, #tpu.memory_space<vmem>>, vector<1x1x32xf32>
    %123 = vector.shape_cast %122 : vector<1x1x32xf32> to vector<1x32xf32>
    %c1_64 = arith.constant 1 : index
    %c226_65 = arith.constant 226 : index
    %c0_66 = arith.constant 0 : index
    %124 = vector.load %arg3[%c1_64, %c226_65, %c0_66] : memref<3x232x128xf32, #tpu.memory_space<vmem>>, vector<1x1x128xf32>
    %125 = vector.shape_cast %124 : vector<1x1x128xf32> to vector<1x128xf32>
    %c1_67 = arith.constant 1 : index
    %c227_68 = arith.constant 227 : index
    %c0_69 = arith.constant 0 : index
    %126 = vector.load %arg3[%c1_67, %c227_68, %c0_69] : memref<3x232x128xf32, #tpu.memory_space<vmem>>, vector<1x1x32xf32>
    %127 = vector.shape_cast %126 : vector<1x1x32xf32> to vector<1x32xf32>
    %c1_70 = arith.constant 1 : index
    %c228_71 = arith.constant 228 : index
    %c0_72 = arith.constant 0 : index
    %128 = vector.load %arg3[%c1_70, %c228_71, %c0_72] : memref<3x232x128xf32, #tpu.memory_space<vmem>>, vector<1x1x32xf32>
    %129 = vector.shape_cast %128 : vector<1x1x32xf32> to vector<1x32xf32>
    %c1_73 = arith.constant 1 : index
    %c229_74 = arith.constant 229 : index
    %c0_75 = arith.constant 0 : index
    %130 = vector.load %arg3[%c1_73, %c229_74, %c0_75] : memref<3x232x128xf32, #tpu.memory_space<vmem>>, vector<1x1x32xf32>
    %131 = vector.shape_cast %130 : vector<1x1x32xf32> to vector<1x32xf32>
    %c1_76 = arith.constant 1 : index
    %c230_77 = arith.constant 230 : index
    %c0_78 = arith.constant 0 : index
    %132 = vector.load %arg3[%c1_76, %c230_77, %c0_78] : memref<3x232x128xf32, #tpu.memory_space<vmem>>, vector<1x1x32xf32>
    %133 = vector.shape_cast %132 : vector<1x1x32xf32> to vector<1x32xf32>
    %c1_79 = arith.constant 1 : index
    %c231_80 = arith.constant 231 : index
    %c0_81 = arith.constant 0 : index
    %134 = vector.load %arg3[%c1_79, %c231_80, %c0_81] : memref<3x232x128xf32, #tpu.memory_space<vmem>>, vector<1x1x32xf32>
    %135 = vector.shape_cast %134 : vector<1x1x32xf32> to vector<1x32xf32>
    %c1_82 = arith.constant 1 : index
    %c0_83 = arith.constant 0 : index
    %c0_84 = arith.constant 0 : index
    %136 = vector.load %arg3[%c1_82, %c0_83, %c0_84] : memref<3x232x128xf32, #tpu.memory_space<vmem>>, vector<1x32x96xf32>
    %137 = vector.shape_cast %136 : vector<1x32x96xf32> to vector<32x96xf32>
    %cst_85 = arith.constant dense<0.000000e+00> : vector<16x96xf32>
    %138 = tpu.matmul %119, %137, %cst_85 {dimension_numbers = #tpu.dot_dimension_numbers<[1], [0], [0], [1], [0, 0, 1, 1], [], []>} : vector<16x32xf32>, vector<32x96xf32>, vector<16x96xf32> -> vector<16x96xf32>
    %139 = vector.broadcast %121 : vector<1x96xf32> to vector<16x96xf32>
    %140 = arith.addf %138, %139 : vector<16x96xf32>
    %141 = vector.extract_strided_slice %140 {offsets = [0, 0], sizes = [16, 32], strides = [1, 1]} : vector<16x96xf32> to vector<16x32xf32>
    %142 = vector.extract_strided_slice %140 {offsets = [0, 32], sizes = [16, 32], strides = [1, 1]} : vector<16x96xf32> to vector<16x32xf32>
    %143 = vector.extract_strided_slice %140 {offsets = [0, 64], sizes = [16, 32], strides = [1, 1]} : vector<16x96xf32> to vector<16x32xf32>
    %144 = tpu.transpose %142, [1, 0] : vector<16x32xf32> -> vector<32x16xf32>
    %c0_86 = arith.constant 0 : index
    %c0_87 = arith.constant 0 : index
    %145 = vector.load %arg2[%c0_86, %c0_87] : memref<432x128xf32, #tpu.memory_space<vmem>>, vector<16x128xf32>
    %cst_88 = arith.constant dense<0.000000e+00> : vector<32x128xf32>
    %146 = tpu.matmul %144, %145, %cst_88 {dimension_numbers = #tpu.dot_dimension_numbers<[1], [0], [0], [1], [0, 0, 1, 1], [], []>} : vector<32x16xf32>, vector<16x128xf32>, vector<32x128xf32> -> vector<32x128xf32>
    %c16_89 = arith.constant 16 : index
    %c0_90 = arith.constant 0 : index
    %147 = vector.load %arg2[%c16_89, %c0_90] : memref<432x128xf32, #tpu.memory_space<vmem>>, vector<32x128xf32>
    %148 = arith.mulf %146, %147 : vector<32x128xf32>
    %c176_91 = arith.constant 176 : index
    %c0_92 = arith.constant 0 : index
    %149 = vector.load %arg2[%c176_91, %c0_92] : memref<432x128xf32, #tpu.memory_space<vmem>>, vector<128x16xf32>
    %cst_93 = arith.constant dense<0.000000e+00> : vector<128x32xf32>
    %150 = tpu.matmul %149, %143, %cst_93 {dimension_numbers = #tpu.dot_dimension_numbers<[1], [0], [0], [1], [0, 0, 1, 1], [], []>} : vector<128x16xf32>, vector<16x32xf32>, vector<128x32xf32> -> vector<128x32xf32>
    %c304_94 = arith.constant 304 : index
    %c0_95 = arith.constant 0 : index
    %151 = vector.load %arg2[%c304_94, %c0_95] : memref<432x128xf32, #tpu.memory_space<vmem>>, vector<128x32xf32>
    %152 = arith.mulf %150, %151 : vector<128x32xf32>
    %cst_96 = arith.constant dense<0.000000e+00> : vector<16x128xf32>
    %153 = tpu.matmul %141, %148, %cst_96 {dimension_numbers = #tpu.dot_dimension_numbers<[1], [0], [0], [1], [0, 0, 1, 1], [], []>} : vector<16x32xf32>, vector<32x128xf32>, vector<16x128xf32> -> vector<16x128xf32>
    %154 = arith.addf %153, %2 : vector<16x128xf32>
    %cst_97 = arith.constant dense<0xFF800000> : vector<16xf32>
    %155 = vector.multi_reduction <maximumf>, %154, %cst_97 [1] : vector<16x128xf32> to vector<16xf32>
    %156 = vector.shape_cast %155 : vector<16xf32> to vector<16x1xf32>
    %157 = vector.broadcast %156 : vector<16x1xf32> to vector<16x128xf32>
    %158 = arith.subf %154, %157 : vector<16x128xf32>
    %159 = math.exp %158 : vector<16x128xf32>
    %160 = arith.mulf %159, %1 : vector<16x128xf32>
    %c48_98 = arith.constant 48 : index
    %c0_99 = arith.constant 0 : index
    %161 = vector.load %arg2[%c48_98, %c0_99] : memref<432x128xf32, #tpu.memory_space<vmem>>, vector<128x128xf32>
    %cst_100 = arith.constant dense<0.000000e+00> : vector<16x128xf32>
    %162 = tpu.matmul %160, %161, %cst_100 {dimension_numbers = #tpu.dot_dimension_numbers<[1], [0], [0], [1], [0, 0, 1, 1], [], []>} : vector<16x128xf32>, vector<128x128xf32>, vector<16x128xf32> -> vector<16x128xf32>
    %cst_101 = arith.constant 9.99999968E-21 : f32
    %163 = vector.broadcast %cst_101 : f32 to vector<16x128xf32>
    %164 = arith.maximumf %162, %163 : vector<16x128xf32>
    %165 = tpu.reciprocal %164 {approx = true} : vector<16x128xf32> -> vector<16x128xf32>
    %166 = arith.mulf %160, %165 : vector<16x128xf32>
    %cst_102 = arith.constant dense<0.000000e+00> : vector<16x32xf32>
    %167 = tpu.matmul %166, %152, %cst_102 {dimension_numbers = #tpu.dot_dimension_numbers<[1], [0], [0], [1], [0, 0, 1, 1], [], []>} : vector<16x128xf32>, vector<128x32xf32>, vector<16x32xf32> -> vector<16x32xf32>
    %c1_103 = arith.constant 1 : index
    %c32_104 = arith.constant 32 : index
    %c0_105 = arith.constant 0 : index
    %168 = vector.load %arg3[%c1_103, %c32_104, %c0_105] : memref<3x232x128xf32, #tpu.memory_space<vmem>>, vector<1x32x32xf32>
    %169 = vector.shape_cast %168 : vector<1x32x32xf32> to vector<32x32xf32>
    %cst_106 = arith.constant dense<0.000000e+00> : vector<16x32xf32>
    %170 = tpu.matmul %167, %169, %cst_106 {dimension_numbers = #tpu.dot_dimension_numbers<[1], [0], [0], [1], [0, 0, 1, 1], [], []>} : vector<16x32xf32>, vector<32x32xf32>, vector<16x32xf32> -> vector<16x32xf32>
    %171 = vector.broadcast %123 : vector<1x32xf32> to vector<16x32xf32>
    %172 = arith.addf %170, %171 : vector<16x32xf32>
    %173 = arith.addf %119, %172 : vector<16x32xf32>
    %cst_107 = arith.constant dense<0.000000e+00> : vector<16xf32>
    %174 = vector.multi_reduction <add>, %173, %cst_107 [1] : vector<16x32xf32> to vector<16xf32>
    %175 = vector.shape_cast %174 : vector<16xf32> to vector<16x1xf32>
    %cst_108 = arith.constant 3.200000e+01 : f32
    %176 = vector.broadcast %cst_108 : f32 to vector<16x1xf32>
    %177 = arith.divf %175, %176 : vector<16x1xf32>
    %178 = vector.broadcast %177 : vector<16x1xf32> to vector<16x32xf32>
    %179 = arith.subf %173, %178 : vector<16x32xf32>
    %180 = arith.mulf %179, %179 : vector<16x32xf32>
    %cst_109 = arith.constant dense<0.000000e+00> : vector<16xf32>
    %181 = vector.multi_reduction <add>, %180, %cst_109 [1] : vector<16x32xf32> to vector<16xf32>
    %182 = vector.shape_cast %181 : vector<16xf32> to vector<16x1xf32>
    %cst_110 = arith.constant 3.200000e+01 : f32
    %183 = vector.broadcast %cst_110 : f32 to vector<16x1xf32>
    %184 = arith.divf %182, %183 : vector<16x1xf32>
    %185 = vector.broadcast %177 : vector<16x1xf32> to vector<16x32xf32>
    %186 = arith.subf %173, %185 : vector<16x32xf32>
    %cst_111 = arith.constant 9.99999974E-6 : f32
    %187 = vector.broadcast %cst_111 : f32 to vector<16x1xf32>
    %188 = arith.addf %184, %187 : vector<16x1xf32>
    %189 = math.rsqrt %188 : vector<16x1xf32>
    %190 = vector.broadcast %189 : vector<16x1xf32> to vector<16x32xf32>
    %191 = arith.mulf %186, %190 : vector<16x32xf32>
    %192 = vector.broadcast %129 : vector<1x32xf32> to vector<16x32xf32>
    %193 = arith.mulf %191, %192 : vector<16x32xf32>
    %194 = vector.broadcast %131 : vector<1x32xf32> to vector<16x32xf32>
    %195 = arith.addf %193, %194 : vector<16x32xf32>
    %c1_112 = arith.constant 1 : index
    %c64_113 = arith.constant 64 : index
    %c0_114 = arith.constant 0 : index
    %196 = vector.load %arg3[%c1_112, %c64_113, %c0_114] : memref<3x232x128xf32, #tpu.memory_space<vmem>>, vector<1x32x128xf32>
    %197 = vector.shape_cast %196 : vector<1x32x128xf32> to vector<32x128xf32>
    %cst_115 = arith.constant dense<0.000000e+00> : vector<16x128xf32>
    %198 = tpu.matmul %195, %197, %cst_115 {dimension_numbers = #tpu.dot_dimension_numbers<[1], [0], [0], [1], [0, 0, 1, 1], [], []>} : vector<16x32xf32>, vector<32x128xf32>, vector<16x128xf32> -> vector<16x128xf32>
    %199 = vector.broadcast %125 : vector<1x128xf32> to vector<16x128xf32>
    %200 = arith.addf %198, %199 : vector<16x128xf32>
    %cst_116 = arith.constant 5.000000e-01 : f32
    %201 = vector.broadcast %cst_116 : f32 to vector<16x128xf32>
    %202 = arith.mulf %201, %200 : vector<16x128xf32>
    %cst_117 = arith.constant 0.707106769 : f32
    %203 = vector.broadcast %cst_117 : f32 to vector<16x128xf32>
    %204 = arith.mulf %200, %203 : vector<16x128xf32>
    %205 = math.erf %204 : vector<16x128xf32>
    %cst_118 = arith.constant 1.000000e+00 : f32
    %206 = vector.broadcast %cst_118 : f32 to vector<16x128xf32>
    %207 = arith.addf %206, %205 : vector<16x128xf32>
    %208 = arith.mulf %202, %207 : vector<16x128xf32>
    %c1_119 = arith.constant 1 : index
    %c96_120 = arith.constant 96 : index
    %c0_121 = arith.constant 0 : index
    %209 = vector.load %arg3[%c1_119, %c96_120, %c0_121] : memref<3x232x128xf32, #tpu.memory_space<vmem>>, vector<1x128x32xf32>
    %210 = vector.shape_cast %209 : vector<1x128x32xf32> to vector<128x32xf32>
    %cst_122 = arith.constant dense<0.000000e+00> : vector<16x32xf32>
    %211 = tpu.matmul %208, %210, %cst_122 {dimension_numbers = #tpu.dot_dimension_numbers<[1], [0], [0], [1], [0, 0, 1, 1], [], []>} : vector<16x128xf32>, vector<128x32xf32>, vector<16x32xf32> -> vector<16x32xf32>
    %212 = vector.broadcast %127 : vector<1x32xf32> to vector<16x32xf32>
    %213 = arith.addf %211, %212 : vector<16x32xf32>
    %214 = arith.addf %195, %213 : vector<16x32xf32>
    %cst_123 = arith.constant dense<0.000000e+00> : vector<16xf32>
    %215 = vector.multi_reduction <add>, %214, %cst_123 [1] : vector<16x32xf32> to vector<16xf32>
    %216 = vector.shape_cast %215 : vector<16xf32> to vector<16x1xf32>
    %cst_124 = arith.constant 3.200000e+01 : f32
    %217 = vector.broadcast %cst_124 : f32 to vector<16x1xf32>
    %218 = arith.divf %216, %217 : vector<16x1xf32>
    %219 = vector.broadcast %218 : vector<16x1xf32> to vector<16x32xf32>
    %220 = arith.subf %214, %219 : vector<16x32xf32>
    %221 = arith.mulf %220, %220 : vector<16x32xf32>
    %cst_125 = arith.constant dense<0.000000e+00> : vector<16xf32>
    %222 = vector.multi_reduction <add>, %221, %cst_125 [1] : vector<16x32xf32> to vector<16xf32>
    %223 = vector.shape_cast %222 : vector<16xf32> to vector<16x1xf32>
    %cst_126 = arith.constant 3.200000e+01 : f32
    %224 = vector.broadcast %cst_126 : f32 to vector<16x1xf32>
    %225 = arith.divf %223, %224 : vector<16x1xf32>
    %226 = vector.broadcast %218 : vector<16x1xf32> to vector<16x32xf32>
    %227 = arith.subf %214, %226 : vector<16x32xf32>
    %cst_127 = arith.constant 9.99999974E-6 : f32
    %228 = vector.broadcast %cst_127 : f32 to vector<16x1xf32>
    %229 = arith.addf %225, %228 : vector<16x1xf32>
    %230 = math.rsqrt %229 : vector<16x1xf32>
    %231 = vector.broadcast %230 : vector<16x1xf32> to vector<16x32xf32>
    %232 = arith.mulf %227, %231 : vector<16x32xf32>
    %233 = vector.broadcast %133 : vector<1x32xf32> to vector<16x32xf32>
    %234 = arith.mulf %232, %233 : vector<16x32xf32>
    %235 = vector.broadcast %135 : vector<1x32xf32> to vector<16x32xf32>
    %236 = arith.addf %234, %235 : vector<16x32xf32>
    %c2 = arith.constant 2 : index
    %c224_128 = arith.constant 224 : index
    %c0_129 = arith.constant 0 : index
    %237 = vector.load %arg3[%c2, %c224_128, %c0_129] : memref<3x232x128xf32, #tpu.memory_space<vmem>>, vector<1x1x96xf32>
    %238 = vector.shape_cast %237 : vector<1x1x96xf32> to vector<1x96xf32>
    %c2_130 = arith.constant 2 : index
    %c225_131 = arith.constant 225 : index
    %c0_132 = arith.constant 0 : index
    %239 = vector.load %arg3[%c2_130, %c225_131, %c0_132] : memref<3x232x128xf32, #tpu.memory_space<vmem>>, vector<1x1x32xf32>
    %240 = vector.shape_cast %239 : vector<1x1x32xf32> to vector<1x32xf32>
    %c2_133 = arith.constant 2 : index
    %c226_134 = arith.constant 226 : index
    %c0_135 = arith.constant 0 : index
    %241 = vector.load %arg3[%c2_133, %c226_134, %c0_135] : memref<3x232x128xf32, #tpu.memory_space<vmem>>, vector<1x1x128xf32>
    %242 = vector.shape_cast %241 : vector<1x1x128xf32> to vector<1x128xf32>
    %c2_136 = arith.constant 2 : index
    %c227_137 = arith.constant 227 : index
    %c0_138 = arith.constant 0 : index
    %243 = vector.load %arg3[%c2_136, %c227_137, %c0_138] : memref<3x232x128xf32, #tpu.memory_space<vmem>>, vector<1x1x32xf32>
    %244 = vector.shape_cast %243 : vector<1x1x32xf32> to vector<1x32xf32>
    %c2_139 = arith.constant 2 : index
    %c228_140 = arith.constant 228 : index
    %c0_141 = arith.constant 0 : index
    %245 = vector.load %arg3[%c2_139, %c228_140, %c0_141] : memref<3x232x128xf32, #tpu.memory_space<vmem>>, vector<1x1x32xf32>
    %246 = vector.shape_cast %245 : vector<1x1x32xf32> to vector<1x32xf32>
    %c2_142 = arith.constant 2 : index
    %c229_143 = arith.constant 229 : index
    %c0_144 = arith.constant 0 : index
    %247 = vector.load %arg3[%c2_142, %c229_143, %c0_144] : memref<3x232x128xf32, #tpu.memory_space<vmem>>, vector<1x1x32xf32>
    %248 = vector.shape_cast %247 : vector<1x1x32xf32> to vector<1x32xf32>
    %c2_145 = arith.constant 2 : index
    %c230_146 = arith.constant 230 : index
    %c0_147 = arith.constant 0 : index
    %249 = vector.load %arg3[%c2_145, %c230_146, %c0_147] : memref<3x232x128xf32, #tpu.memory_space<vmem>>, vector<1x1x32xf32>
    %250 = vector.shape_cast %249 : vector<1x1x32xf32> to vector<1x32xf32>
    %c2_148 = arith.constant 2 : index
    %c231_149 = arith.constant 231 : index
    %c0_150 = arith.constant 0 : index
    %251 = vector.load %arg3[%c2_148, %c231_149, %c0_150] : memref<3x232x128xf32, #tpu.memory_space<vmem>>, vector<1x1x32xf32>
    %252 = vector.shape_cast %251 : vector<1x1x32xf32> to vector<1x32xf32>
    %c2_151 = arith.constant 2 : index
    %c0_152 = arith.constant 0 : index
    %c0_153 = arith.constant 0 : index
    %253 = vector.load %arg3[%c2_151, %c0_152, %c0_153] : memref<3x232x128xf32, #tpu.memory_space<vmem>>, vector<1x32x96xf32>
    %254 = vector.shape_cast %253 : vector<1x32x96xf32> to vector<32x96xf32>
    %cst_154 = arith.constant dense<0.000000e+00> : vector<16x96xf32>
    %255 = tpu.matmul %236, %254, %cst_154 {dimension_numbers = #tpu.dot_dimension_numbers<[1], [0], [0], [1], [0, 0, 1, 1], [], []>} : vector<16x32xf32>, vector<32x96xf32>, vector<16x96xf32> -> vector<16x96xf32>
    %256 = vector.broadcast %238 : vector<1x96xf32> to vector<16x96xf32>
    %257 = arith.addf %255, %256 : vector<16x96xf32>
    %258 = vector.extract_strided_slice %257 {offsets = [0, 0], sizes = [16, 32], strides = [1, 1]} : vector<16x96xf32> to vector<16x32xf32>
    %259 = vector.extract_strided_slice %257 {offsets = [0, 32], sizes = [16, 32], strides = [1, 1]} : vector<16x96xf32> to vector<16x32xf32>
    %260 = vector.extract_strided_slice %257 {offsets = [0, 64], sizes = [16, 32], strides = [1, 1]} : vector<16x96xf32> to vector<16x32xf32>
    %261 = tpu.transpose %259, [1, 0] : vector<16x32xf32> -> vector<32x16xf32>
    %c0_155 = arith.constant 0 : index
    %c0_156 = arith.constant 0 : index
    %262 = vector.load %arg2[%c0_155, %c0_156] : memref<432x128xf32, #tpu.memory_space<vmem>>, vector<16x128xf32>
    %cst_157 = arith.constant dense<0.000000e+00> : vector<32x128xf32>
    %263 = tpu.matmul %261, %262, %cst_157 {dimension_numbers = #tpu.dot_dimension_numbers<[1], [0], [0], [1], [0, 0, 1, 1], [], []>} : vector<32x16xf32>, vector<16x128xf32>, vector<32x128xf32> -> vector<32x128xf32>
    %c16_158 = arith.constant 16 : index
    %c0_159 = arith.constant 0 : index
    %264 = vector.load %arg2[%c16_158, %c0_159] : memref<432x128xf32, #tpu.memory_space<vmem>>, vector<32x128xf32>
    %265 = arith.mulf %263, %264 : vector<32x128xf32>
    %c176_160 = arith.constant 176 : index
    %c0_161 = arith.constant 0 : index
    %266 = vector.load %arg2[%c176_160, %c0_161] : memref<432x128xf32, #tpu.memory_space<vmem>>, vector<128x16xf32>
    %cst_162 = arith.constant dense<0.000000e+00> : vector<128x32xf32>
    %267 = tpu.matmul %266, %260, %cst_162 {dimension_numbers = #tpu.dot_dimension_numbers<[1], [0], [0], [1], [0, 0, 1, 1], [], []>} : vector<128x16xf32>, vector<16x32xf32>, vector<128x32xf32> -> vector<128x32xf32>
    %c304_163 = arith.constant 304 : index
    %c0_164 = arith.constant 0 : index
    %268 = vector.load %arg2[%c304_163, %c0_164] : memref<432x128xf32, #tpu.memory_space<vmem>>, vector<128x32xf32>
    %269 = arith.mulf %267, %268 : vector<128x32xf32>
    %cst_165 = arith.constant dense<0.000000e+00> : vector<16x128xf32>
    %270 = tpu.matmul %258, %265, %cst_165 {dimension_numbers = #tpu.dot_dimension_numbers<[1], [0], [0], [1], [0, 0, 1, 1], [], []>} : vector<16x32xf32>, vector<32x128xf32>, vector<16x128xf32> -> vector<16x128xf32>
    %271 = arith.addf %270, %2 : vector<16x128xf32>
    %cst_166 = arith.constant dense<0xFF800000> : vector<16xf32>
    %272 = vector.multi_reduction <maximumf>, %271, %cst_166 [1] : vector<16x128xf32> to vector<16xf32>
    %273 = vector.shape_cast %272 : vector<16xf32> to vector<16x1xf32>
    %274 = vector.broadcast %273 : vector<16x1xf32> to vector<16x128xf32>
    %275 = arith.subf %271, %274 : vector<16x128xf32>
    %276 = math.exp %275 : vector<16x128xf32>
    %277 = arith.mulf %276, %1 : vector<16x128xf32>
    %c48_167 = arith.constant 48 : index
    %c0_168 = arith.constant 0 : index
    %278 = vector.load %arg2[%c48_167, %c0_168] : memref<432x128xf32, #tpu.memory_space<vmem>>, vector<128x128xf32>
    %cst_169 = arith.constant dense<0.000000e+00> : vector<16x128xf32>
    %279 = tpu.matmul %277, %278, %cst_169 {dimension_numbers = #tpu.dot_dimension_numbers<[1], [0], [0], [1], [0, 0, 1, 1], [], []>} : vector<16x128xf32>, vector<128x128xf32>, vector<16x128xf32> -> vector<16x128xf32>
    %cst_170 = arith.constant 9.99999968E-21 : f32
    %280 = vector.broadcast %cst_170 : f32 to vector<16x128xf32>
    %281 = arith.maximumf %279, %280 : vector<16x128xf32>
    %282 = tpu.reciprocal %281 {approx = true} : vector<16x128xf32> -> vector<16x128xf32>
    %283 = arith.mulf %277, %282 : vector<16x128xf32>
    %cst_171 = arith.constant dense<0.000000e+00> : vector<16x32xf32>
    %284 = tpu.matmul %283, %269, %cst_171 {dimension_numbers = #tpu.dot_dimension_numbers<[1], [0], [0], [1], [0, 0, 1, 1], [], []>} : vector<16x128xf32>, vector<128x32xf32>, vector<16x32xf32> -> vector<16x32xf32>
    %c2_172 = arith.constant 2 : index
    %c32_173 = arith.constant 32 : index
    %c0_174 = arith.constant 0 : index
    %285 = vector.load %arg3[%c2_172, %c32_173, %c0_174] : memref<3x232x128xf32, #tpu.memory_space<vmem>>, vector<1x32x32xf32>
    %286 = vector.shape_cast %285 : vector<1x32x32xf32> to vector<32x32xf32>
    %cst_175 = arith.constant dense<0.000000e+00> : vector<16x32xf32>
    %287 = tpu.matmul %284, %286, %cst_175 {dimension_numbers = #tpu.dot_dimension_numbers<[1], [0], [0], [1], [0, 0, 1, 1], [], []>} : vector<16x32xf32>, vector<32x32xf32>, vector<16x32xf32> -> vector<16x32xf32>
    %288 = vector.broadcast %240 : vector<1x32xf32> to vector<16x32xf32>
    %289 = arith.addf %287, %288 : vector<16x32xf32>
    %290 = arith.addf %236, %289 : vector<16x32xf32>
    %cst_176 = arith.constant dense<0.000000e+00> : vector<16xf32>
    %291 = vector.multi_reduction <add>, %290, %cst_176 [1] : vector<16x32xf32> to vector<16xf32>
    %292 = vector.shape_cast %291 : vector<16xf32> to vector<16x1xf32>
    %cst_177 = arith.constant 3.200000e+01 : f32
    %293 = vector.broadcast %cst_177 : f32 to vector<16x1xf32>
    %294 = arith.divf %292, %293 : vector<16x1xf32>
    %295 = vector.broadcast %294 : vector<16x1xf32> to vector<16x32xf32>
    %296 = arith.subf %290, %295 : vector<16x32xf32>
    %297 = arith.mulf %296, %296 : vector<16x32xf32>
    %cst_178 = arith.constant dense<0.000000e+00> : vector<16xf32>
    %298 = vector.multi_reduction <add>, %297, %cst_178 [1] : vector<16x32xf32> to vector<16xf32>
    %299 = vector.shape_cast %298 : vector<16xf32> to vector<16x1xf32>
    %cst_179 = arith.constant 3.200000e+01 : f32
    %300 = vector.broadcast %cst_179 : f32 to vector<16x1xf32>
    %301 = arith.divf %299, %300 : vector<16x1xf32>
    %302 = vector.broadcast %294 : vector<16x1xf32> to vector<16x32xf32>
    %303 = arith.subf %290, %302 : vector<16x32xf32>
    %cst_180 = arith.constant 9.99999974E-6 : f32
    %304 = vector.broadcast %cst_180 : f32 to vector<16x1xf32>
    %305 = arith.addf %301, %304 : vector<16x1xf32>
    %306 = math.rsqrt %305 : vector<16x1xf32>
    %307 = vector.broadcast %306 : vector<16x1xf32> to vector<16x32xf32>
    %308 = arith.mulf %303, %307 : vector<16x32xf32>
    %309 = vector.broadcast %246 : vector<1x32xf32> to vector<16x32xf32>
    %310 = arith.mulf %308, %309 : vector<16x32xf32>
    %311 = vector.broadcast %248 : vector<1x32xf32> to vector<16x32xf32>
    %312 = arith.addf %310, %311 : vector<16x32xf32>
    %c2_181 = arith.constant 2 : index
    %c64_182 = arith.constant 64 : index
    %c0_183 = arith.constant 0 : index
    %313 = vector.load %arg3[%c2_181, %c64_182, %c0_183] : memref<3x232x128xf32, #tpu.memory_space<vmem>>, vector<1x32x128xf32>
    %314 = vector.shape_cast %313 : vector<1x32x128xf32> to vector<32x128xf32>
    %cst_184 = arith.constant dense<0.000000e+00> : vector<16x128xf32>
    %315 = tpu.matmul %312, %314, %cst_184 {dimension_numbers = #tpu.dot_dimension_numbers<[1], [0], [0], [1], [0, 0, 1, 1], [], []>} : vector<16x32xf32>, vector<32x128xf32>, vector<16x128xf32> -> vector<16x128xf32>
    %316 = vector.broadcast %242 : vector<1x128xf32> to vector<16x128xf32>
    %317 = arith.addf %315, %316 : vector<16x128xf32>
    %cst_185 = arith.constant 5.000000e-01 : f32
    %318 = vector.broadcast %cst_185 : f32 to vector<16x128xf32>
    %319 = arith.mulf %318, %317 : vector<16x128xf32>
    %cst_186 = arith.constant 0.707106769 : f32
    %320 = vector.broadcast %cst_186 : f32 to vector<16x128xf32>
    %321 = arith.mulf %317, %320 : vector<16x128xf32>
    %322 = math.erf %321 : vector<16x128xf32>
    %cst_187 = arith.constant 1.000000e+00 : f32
    %323 = vector.broadcast %cst_187 : f32 to vector<16x128xf32>
    %324 = arith.addf %323, %322 : vector<16x128xf32>
    %325 = arith.mulf %319, %324 : vector<16x128xf32>
    %c2_188 = arith.constant 2 : index
    %c96_189 = arith.constant 96 : index
    %c0_190 = arith.constant 0 : index
    %326 = vector.load %arg3[%c2_188, %c96_189, %c0_190] : memref<3x232x128xf32, #tpu.memory_space<vmem>>, vector<1x128x32xf32>
    %327 = vector.shape_cast %326 : vector<1x128x32xf32> to vector<128x32xf32>
    %cst_191 = arith.constant dense<0.000000e+00> : vector<16x32xf32>
    %328 = tpu.matmul %325, %327, %cst_191 {dimension_numbers = #tpu.dot_dimension_numbers<[1], [0], [0], [1], [0, 0, 1, 1], [], []>} : vector<16x128xf32>, vector<128x32xf32>, vector<16x32xf32> -> vector<16x32xf32>
    %329 = vector.broadcast %244 : vector<1x32xf32> to vector<16x32xf32>
    %330 = arith.addf %328, %329 : vector<16x32xf32>
    %331 = arith.addf %312, %330 : vector<16x32xf32>
    %cst_192 = arith.constant dense<0.000000e+00> : vector<16xf32>
    %332 = vector.multi_reduction <add>, %331, %cst_192 [1] : vector<16x32xf32> to vector<16xf32>
    %333 = vector.shape_cast %332 : vector<16xf32> to vector<16x1xf32>
    %cst_193 = arith.constant 3.200000e+01 : f32
    %334 = vector.broadcast %cst_193 : f32 to vector<16x1xf32>
    %335 = arith.divf %333, %334 : vector<16x1xf32>
    %336 = vector.broadcast %335 : vector<16x1xf32> to vector<16x32xf32>
    %337 = arith.subf %331, %336 : vector<16x32xf32>
    %338 = arith.mulf %337, %337 : vector<16x32xf32>
    %cst_194 = arith.constant dense<0.000000e+00> : vector<16xf32>
    %339 = vector.multi_reduction <add>, %338, %cst_194 [1] : vector<16x32xf32> to vector<16xf32>
    %340 = vector.shape_cast %339 : vector<16xf32> to vector<16x1xf32>
    %cst_195 = arith.constant 3.200000e+01 : f32
    %341 = vector.broadcast %cst_195 : f32 to vector<16x1xf32>
    %342 = arith.divf %340, %341 : vector<16x1xf32>
    %343 = vector.broadcast %335 : vector<16x1xf32> to vector<16x32xf32>
    %344 = arith.subf %331, %343 : vector<16x32xf32>
    %cst_196 = arith.constant 9.99999974E-6 : f32
    %345 = vector.broadcast %cst_196 : f32 to vector<16x1xf32>
    %346 = arith.addf %342, %345 : vector<16x1xf32>
    %347 = math.rsqrt %346 : vector<16x1xf32>
    %348 = vector.broadcast %347 : vector<16x1xf32> to vector<16x32xf32>
    %349 = arith.mulf %344, %348 : vector<16x32xf32>
    %350 = vector.broadcast %250 : vector<1x32xf32> to vector<16x32xf32>
    %351 = arith.mulf %349, %350 : vector<16x32xf32>
    %352 = vector.broadcast %252 : vector<1x32xf32> to vector<16x32xf32>
    %353 = arith.addf %351, %352 : vector<16x32xf32>
    %c32_197 = arith.constant 32 : index
    %c0_198 = arith.constant 0 : index
    %354 = vector.load %arg1[%c32_197, %c0_198] : memref<64x128xf32, #tpu.memory_space<vmem>>, vector<2x16xf32>
    %c40 = arith.constant 40 : index
    %c0_199 = arith.constant 0 : index
    %355 = vector.load %arg1[%c40, %c0_199] : memref<64x128xf32, #tpu.memory_space<vmem>>, vector<2x16xf32>
    %c48_200 = arith.constant 48 : index
    %c0_201 = arith.constant 0 : index
    %356 = vector.load %arg1[%c48_200, %c0_201] : memref<64x128xf32, #tpu.memory_space<vmem>>, vector<16x1xf32>
    %357 = vector.extract_strided_slice %353 {offsets = [0, 0], sizes = [1, 32], strides = [1, 1]} : vector<16x32xf32> to vector<1x32xf32>
    %358 = vector.extract_strided_slice %353 {offsets = [8, 0], sizes = [1, 32], strides = [1, 1]} : vector<16x32xf32> to vector<1x32xf32>
    %359 = tpu.concatenate %357, %358 in 0 : vector<1x32xf32>, vector<1x32xf32> -> vector<2x32xf32>
    %cst_202 = arith.constant dense<0.000000e+00> : vector<2x16xf32>
    %360 = tpu.matmul %359, %353, %cst_202 {dimension_numbers = #tpu.dot_dimension_numbers<[1], [1], [0], [0], [0, 0, 1, 0], [], []>} : vector<2x32xf32>, vector<16x32xf32>, vector<2x16xf32> -> vector<2x16xf32>
    %cst_203 = arith.constant 0.176776692 : f32
    %361 = vector.broadcast %cst_203 : f32 to vector<2x16xf32>
    %362 = arith.mulf %360, %361 : vector<2x16xf32>
    %363 = arith.addf %362, %355 : vector<2x16xf32>
    %cst_204 = arith.constant dense<0xFF800000> : vector<2xf32>
    %364 = vector.multi_reduction <maximumf>, %363, %cst_204 [1] : vector<2x16xf32> to vector<2xf32>
    %365 = vector.shape_cast %364 : vector<2xf32> to vector<2x1xf32>
    %366 = vector.broadcast %365 : vector<2x1xf32> to vector<2x16xf32>
    %367 = arith.subf %363, %366 : vector<2x16xf32>
    %368 = math.exp %367 : vector<2x16xf32>
    %cst_205 = arith.constant dense<0.000000e+00> : vector<2xf32>
    %369 = vector.multi_reduction <add>, %368, %cst_205 [1] : vector<2x16xf32> to vector<2xf32>
    %370 = vector.shape_cast %369 : vector<2xf32> to vector<2x1xf32>
    %371 = vector.broadcast %370 : vector<2x1xf32> to vector<2x16xf32>
    %372 = arith.divf %368, %371 : vector<2x16xf32>
    %373 = arith.mulf %372, %354 : vector<2x16xf32>
    %cst_206 = arith.constant dense<0.000000e+00> : vector<2xf32>
    %374 = vector.multi_reduction <add>, %373, %cst_206 [1] : vector<2x16xf32> to vector<2xf32>
    %375 = vector.shape_cast %374 : vector<2xf32> to vector<2x1xf32>
    %cst_207 = arith.constant 9.99999971E-10 : f32
    %376 = vector.broadcast %cst_207 : f32 to vector<2x1xf32>
    %377 = arith.maximumf %375, %376 : vector<2x1xf32>
    %378 = vector.broadcast %377 : vector<2x1xf32> to vector<2x16xf32>
    %379 = arith.divf %373, %378 : vector<2x16xf32>
    %cst_208 = arith.constant dense<0.000000e+00> : vector<2x32xf32>
    %380 = tpu.matmul %379, %353, %cst_208 {dimension_numbers = #tpu.dot_dimension_numbers<[1], [0], [0], [1], [0, 0, 1, 1], [], []>} : vector<2x16xf32>, vector<16x32xf32>, vector<2x32xf32> -> vector<2x32xf32>
    %381 = arith.addf %359, %380 : vector<2x32xf32>
    %cst_209 = arith.constant 5.000000e-01 : f32
    %382 = vector.broadcast %cst_209 : f32 to vector<2x32xf32>
    %383 = arith.mulf %381, %382 : vector<2x32xf32>
    %c112 = arith.constant 112 : index
    %c0_210 = arith.constant 0 : index
    %384 = vector.load %arg4[%c112, %c0_210] : memref<128x128xf32, #tpu.memory_space<vmem>>, vector<1x56xf32>
    %c113 = arith.constant 113 : index
    %c0_211 = arith.constant 0 : index
    %385 = vector.load %arg4[%c113, %c0_211] : memref<128x128xf32, #tpu.memory_space<vmem>>, vector<1x16xf32>
    %c114 = arith.constant 114 : index
    %c0_212 = arith.constant 0 : index
    %386 = vector.load %arg4[%c114, %c0_212] : memref<128x128xf32, #tpu.memory_space<vmem>>, vector<1x16xf32>
    %c115 = arith.constant 115 : index
    %c0_213 = arith.constant 0 : index
    %387 = vector.load %arg4[%c115, %c0_213] : memref<128x128xf32, #tpu.memory_space<vmem>>, vector<1x16xf32>
    %c116 = arith.constant 116 : index
    %c0_214 = arith.constant 0 : index
    %388 = vector.load %arg4[%c116, %c0_214] : memref<128x128xf32, #tpu.memory_space<vmem>>, vector<1x16xf32>
    %c117 = arith.constant 117 : index
    %c0_215 = arith.constant 0 : index
    %389 = vector.load %arg4[%c117, %c0_215] : memref<128x128xf32, #tpu.memory_space<vmem>>, vector<1x15xf32>
    %c118 = arith.constant 118 : index
    %c0_216 = arith.constant 0 : index
    %390 = vector.load %arg4[%c118, %c0_216] : memref<128x128xf32, #tpu.memory_space<vmem>>, vector<1x2xf32>
    %c119 = arith.constant 119 : index
    %c0_217 = arith.constant 0 : index
    %391 = vector.load %arg4[%c119, %c0_217] : memref<128x128xf32, #tpu.memory_space<vmem>>, vector<1x16xf32>
    %c120 = arith.constant 120 : index
    %c0_218 = arith.constant 0 : index
    %392 = vector.load %arg4[%c120, %c0_218] : memref<128x128xf32, #tpu.memory_space<vmem>>, vector<1x7xf32>
    %c121 = arith.constant 121 : index
    %c0_219 = arith.constant 0 : index
    %393 = vector.load %arg4[%c121, %c0_219] : memref<128x128xf32, #tpu.memory_space<vmem>>, vector<1x8xf32>
    %c0_220 = arith.constant 0 : index
    %c0_221 = arith.constant 0 : index
    %394 = vector.load %arg4[%c0_220, %c0_221] : memref<128x128xf32, #tpu.memory_space<vmem>>, vector<32x56xf32>
    %cst_222 = arith.constant dense<0.000000e+00> : vector<2x56xf32>
    %395 = tpu.matmul %383, %394, %cst_222 {dimension_numbers = #tpu.dot_dimension_numbers<[1], [0], [0], [1], [0, 0, 1, 1], [], []>} : vector<2x32xf32>, vector<32x56xf32>, vector<2x56xf32> -> vector<2x56xf32>
    %396 = vector.broadcast %384 : vector<1x56xf32> to vector<2x56xf32>
    %397 = arith.addf %395, %396 : vector<2x56xf32>
    %398 = vector.extract_strided_slice %397 {offsets = [0, 0], sizes = [2, 16], strides = [1, 1]} : vector<2x56xf32> to vector<2x16xf32>
    %cst_223 = arith.constant dense<0.000000e+00> : vector<2xf32>
    %399 = vector.multi_reduction <add>, %398, %cst_223 [1] : vector<2x16xf32> to vector<2xf32>
    %400 = vector.shape_cast %399 : vector<2xf32> to vector<2x1xf32>
    %cst_224 = arith.constant 1.600000e+01 : f32
    %401 = vector.broadcast %cst_224 : f32 to vector<2x1xf32>
    %402 = arith.divf %400, %401 : vector<2x1xf32>
    %403 = vector.broadcast %402 : vector<2x1xf32> to vector<2x16xf32>
    %404 = arith.subf %398, %403 : vector<2x16xf32>
    %405 = arith.mulf %404, %404 : vector<2x16xf32>
    %cst_225 = arith.constant dense<0.000000e+00> : vector<2xf32>
    %406 = vector.multi_reduction <add>, %405, %cst_225 [1] : vector<2x16xf32> to vector<2xf32>
    %407 = vector.shape_cast %406 : vector<2xf32> to vector<2x1xf32>
    %cst_226 = arith.constant 1.600000e+01 : f32
    %408 = vector.broadcast %cst_226 : f32 to vector<2x1xf32>
    %409 = arith.divf %407, %408 : vector<2x1xf32>
    %410 = vector.broadcast %402 : vector<2x1xf32> to vector<2x16xf32>
    %411 = arith.subf %398, %410 : vector<2x16xf32>
    %cst_227 = arith.constant 9.99999974E-6 : f32
    %412 = vector.broadcast %cst_227 : f32 to vector<2x1xf32>
    %413 = arith.addf %409, %412 : vector<2x1xf32>
    %414 = math.rsqrt %413 : vector<2x1xf32>
    %415 = vector.broadcast %414 : vector<2x1xf32> to vector<2x16xf32>
    %416 = arith.mulf %411, %415 : vector<2x16xf32>
    %417 = vector.broadcast %385 : vector<1x16xf32> to vector<2x16xf32>
    %418 = arith.mulf %416, %417 : vector<2x16xf32>
    %419 = vector.broadcast %386 : vector<1x16xf32> to vector<2x16xf32>
    %420 = arith.addf %418, %419 : vector<2x16xf32>
    %cst_228 = arith.constant 5.000000e-01 : f32
    %421 = vector.broadcast %cst_228 : f32 to vector<2x16xf32>
    %422 = arith.mulf %421, %420 : vector<2x16xf32>
    %cst_229 = arith.constant 0.707106769 : f32
    %423 = vector.broadcast %cst_229 : f32 to vector<2x16xf32>
    %424 = arith.mulf %420, %423 : vector<2x16xf32>
    %425 = math.erf %424 : vector<2x16xf32>
    %cst_230 = arith.constant 1.000000e+00 : f32
    %426 = vector.broadcast %cst_230 : f32 to vector<2x16xf32>
    %427 = arith.addf %426, %425 : vector<2x16xf32>
    %428 = arith.mulf %422, %427 : vector<2x16xf32>
    %429 = vector.extract_strided_slice %397 {offsets = [0, 16], sizes = [2, 16], strides = [1, 1]} : vector<2x56xf32> to vector<2x16xf32>
    %cst_231 = arith.constant dense<0.000000e+00> : vector<2xf32>
    %430 = vector.multi_reduction <add>, %429, %cst_231 [1] : vector<2x16xf32> to vector<2xf32>
    %431 = vector.shape_cast %430 : vector<2xf32> to vector<2x1xf32>
    %cst_232 = arith.constant 1.600000e+01 : f32
    %432 = vector.broadcast %cst_232 : f32 to vector<2x1xf32>
    %433 = arith.divf %431, %432 : vector<2x1xf32>
    %434 = vector.broadcast %433 : vector<2x1xf32> to vector<2x16xf32>
    %435 = arith.subf %429, %434 : vector<2x16xf32>
    %436 = arith.mulf %435, %435 : vector<2x16xf32>
    %cst_233 = arith.constant dense<0.000000e+00> : vector<2xf32>
    %437 = vector.multi_reduction <add>, %436, %cst_233 [1] : vector<2x16xf32> to vector<2xf32>
    %438 = vector.shape_cast %437 : vector<2xf32> to vector<2x1xf32>
    %cst_234 = arith.constant 1.600000e+01 : f32
    %439 = vector.broadcast %cst_234 : f32 to vector<2x1xf32>
    %440 = arith.divf %438, %439 : vector<2x1xf32>
    %441 = vector.broadcast %433 : vector<2x1xf32> to vector<2x16xf32>
    %442 = arith.subf %429, %441 : vector<2x16xf32>
    %cst_235 = arith.constant 9.99999974E-6 : f32
    %443 = vector.broadcast %cst_235 : f32 to vector<2x1xf32>
    %444 = arith.addf %440, %443 : vector<2x1xf32>
    %445 = math.rsqrt %444 : vector<2x1xf32>
    %446 = vector.broadcast %445 : vector<2x1xf32> to vector<2x16xf32>
    %447 = arith.mulf %442, %446 : vector<2x16xf32>
    %448 = vector.broadcast %387 : vector<1x16xf32> to vector<2x16xf32>
    %449 = arith.mulf %447, %448 : vector<2x16xf32>
    %450 = vector.broadcast %388 : vector<1x16xf32> to vector<2x16xf32>
    %451 = arith.addf %449, %450 : vector<2x16xf32>
    %cst_236 = arith.constant 5.000000e-01 : f32
    %452 = vector.broadcast %cst_236 : f32 to vector<2x16xf32>
    %453 = arith.mulf %452, %451 : vector<2x16xf32>
    %cst_237 = arith.constant 0.707106769 : f32
    %454 = vector.broadcast %cst_237 : f32 to vector<2x16xf32>
    %455 = arith.mulf %451, %454 : vector<2x16xf32>
    %456 = math.erf %455 : vector<2x16xf32>
    %cst_238 = arith.constant 1.000000e+00 : f32
    %457 = vector.broadcast %cst_238 : f32 to vector<2x16xf32>
    %458 = arith.addf %457, %456 : vector<2x16xf32>
    %459 = arith.mulf %453, %458 : vector<2x16xf32>
    %460 = vector.extract_strided_slice %397 {offsets = [0, 32], sizes = [2, 16], strides = [1, 1]} : vector<2x56xf32> to vector<2x16xf32>
    %cst_239 = arith.constant 5.000000e-01 : f32
    %461 = vector.broadcast %cst_239 : f32 to vector<2x16xf32>
    %462 = arith.mulf %461, %460 : vector<2x16xf32>
    %cst_240 = arith.constant 0.707106769 : f32
    %463 = vector.broadcast %cst_240 : f32 to vector<2x16xf32>
    %464 = arith.mulf %460, %463 : vector<2x16xf32>
    %465 = math.erf %464 : vector<2x16xf32>
    %cst_241 = arith.constant 1.000000e+00 : f32
    %466 = vector.broadcast %cst_241 : f32 to vector<2x16xf32>
    %467 = arith.addf %466, %465 : vector<2x16xf32>
    %468 = arith.mulf %462, %467 : vector<2x16xf32>
    %469 = vector.extract_strided_slice %397 {offsets = [0, 48], sizes = [2, 8], strides = [1, 1]} : vector<2x56xf32> to vector<2x8xf32>
    %cst_242 = arith.constant 0.000000e+00 : f32
    %470 = vector.broadcast %cst_242 : f32 to vector<2x8xf32>
    %471 = arith.maximumf %469, %470 : vector<2x8xf32>
    %472 = tpu.concatenate %428, %459, %468 in 1 : vector<2x16xf32>, vector<2x16xf32>, vector<2x16xf32> -> vector<2x48xf32>
    %c32_243 = arith.constant 32 : index
    %c0_244 = arith.constant 0 : index
    %473 = vector.load %arg4[%c32_243, %c0_244] : memref<128x128xf32, #tpu.memory_space<vmem>>, vector<48x15xf32>
    %cst_245 = arith.constant dense<0.000000e+00> : vector<2x15xf32>
    %474 = tpu.matmul %472, %473, %cst_245 {dimension_numbers = #tpu.dot_dimension_numbers<[1], [0], [0], [1], [0, 0, 1, 1], [], []>} : vector<2x48xf32>, vector<48x15xf32>, vector<2x15xf32> -> vector<2x15xf32>
    %475 = vector.broadcast %389 : vector<1x15xf32> to vector<2x15xf32>
    %476 = arith.addf %474, %475 : vector<2x15xf32>
    %477 = vector.extract_strided_slice %476 {offsets = [0, 0], sizes = [2, 3], strides = [1, 1]} : vector<2x15xf32> to vector<2x3xf32>
    %cst_246 = arith.constant dense<0xFF800000> : vector<2xf32>
    %478 = vector.multi_reduction <maximumf>, %477, %cst_246 [1] : vector<2x3xf32> to vector<2xf32>
    %479 = vector.shape_cast %478 : vector<2xf32> to vector<2x1xf32>
    %480 = vector.broadcast %479 : vector<2x1xf32> to vector<2x3xf32>
    %481 = arith.subf %477, %480 : vector<2x3xf32>
    %482 = math.exp %481 : vector<2x3xf32>
    %cst_247 = arith.constant dense<0.000000e+00> : vector<2xf32>
    %483 = vector.multi_reduction <add>, %482, %cst_247 [1] : vector<2x3xf32> to vector<2xf32>
    %484 = vector.shape_cast %483 : vector<2xf32> to vector<2x1xf32>
    %485 = vector.broadcast %484 : vector<2x1xf32> to vector<2x3xf32>
    %486 = arith.divf %482, %485 : vector<2x3xf32>
    %487 = vector.extract_strided_slice %476 {offsets = [0, 3], sizes = [2, 4], strides = [1, 1]} : vector<2x15xf32> to vector<2x4xf32>
    %cst_248 = arith.constant dense<0xFF800000> : vector<2xf32>
    %488 = vector.multi_reduction <maximumf>, %487, %cst_248 [1] : vector<2x4xf32> to vector<2xf32>
    %489 = vector.shape_cast %488 : vector<2xf32> to vector<2x1xf32>
    %490 = vector.broadcast %489 : vector<2x1xf32> to vector<2x4xf32>
    %491 = arith.subf %487, %490 : vector<2x4xf32>
    %492 = math.exp %491 : vector<2x4xf32>
    %cst_249 = arith.constant dense<0.000000e+00> : vector<2xf32>
    %493 = vector.multi_reduction <add>, %492, %cst_249 [1] : vector<2x4xf32> to vector<2xf32>
    %494 = vector.shape_cast %493 : vector<2xf32> to vector<2x1xf32>
    %495 = vector.broadcast %494 : vector<2x1xf32> to vector<2x4xf32>
    %496 = arith.divf %492, %495 : vector<2x4xf32>
    %497 = vector.extract_strided_slice %476 {offsets = [0, 7], sizes = [2, 8], strides = [1, 1]} : vector<2x15xf32> to vector<2x8xf32>
    %cst_250 = arith.constant dense<0xFF800000> : vector<2xf32>
    %498 = vector.multi_reduction <maximumf>, %497, %cst_250 [1] : vector<2x8xf32> to vector<2xf32>
    %499 = vector.shape_cast %498 : vector<2xf32> to vector<2x1xf32>
    %500 = vector.broadcast %499 : vector<2x1xf32> to vector<2x8xf32>
    %501 = arith.subf %497, %500 : vector<2x8xf32>
    %502 = math.exp %501 : vector<2x8xf32>
    %cst_251 = arith.constant dense<0.000000e+00> : vector<2xf32>
    %503 = vector.multi_reduction <add>, %502, %cst_251 [1] : vector<2x8xf32> to vector<2xf32>
    %504 = vector.shape_cast %503 : vector<2xf32> to vector<2x1xf32>
    %505 = vector.broadcast %504 : vector<2x1xf32> to vector<2x8xf32>
    %506 = arith.divf %502, %505 : vector<2x8xf32>
    %c0_252 = arith.constant 0 : index
    %c56 = arith.constant 56 : index
    %507 = vector.load %arg4[%c0_252, %c56] : memref<128x128xf32, #tpu.memory_space<vmem>>, vector<32x16xf32>
    %cst_253 = arith.constant dense<0.000000e+00> : vector<16x16xf32>
    %508 = tpu.matmul %353, %507, %cst_253 {dimension_numbers = #tpu.dot_dimension_numbers<[1], [0], [0], [1], [0, 0, 1, 1], [], []>} : vector<16x32xf32>, vector<32x16xf32>, vector<16x16xf32> -> vector<16x16xf32>
    %509 = vector.broadcast %391 : vector<1x16xf32> to vector<16x16xf32>
    %510 = arith.addf %508, %509 : vector<16x16xf32>
    %cst_254 = arith.constant 5.000000e-01 : f32
    %511 = vector.broadcast %cst_254 : f32 to vector<16x16xf32>
    %512 = arith.mulf %511, %510 : vector<16x16xf32>
    %cst_255 = arith.constant 0.707106769 : f32
    %513 = vector.broadcast %cst_255 : f32 to vector<16x16xf32>
    %514 = arith.mulf %510, %513 : vector<16x16xf32>
    %515 = math.erf %514 : vector<16x16xf32>
    %cst_256 = arith.constant 1.000000e+00 : f32
    %516 = vector.broadcast %cst_256 : f32 to vector<16x16xf32>
    %517 = arith.addf %516, %515 : vector<16x16xf32>
    %518 = arith.mulf %512, %517 : vector<16x16xf32>
    %c96_257 = arith.constant 96 : index
    %c0_258 = arith.constant 0 : index
    %519 = vector.load %arg4[%c96_257, %c0_258] : memref<128x128xf32, #tpu.memory_space<vmem>>, vector<16x7xf32>
    %cst_259 = arith.constant dense<0.000000e+00> : vector<16x7xf32>
    %520 = tpu.matmul %518, %519, %cst_259 {dimension_numbers = #tpu.dot_dimension_numbers<[1], [0], [0], [1], [0, 0, 1, 1], [], []>} : vector<16x16xf32>, vector<16x7xf32>, vector<16x7xf32> -> vector<16x7xf32>
    %521 = vector.broadcast %392 : vector<1x7xf32> to vector<16x7xf32>
    %522 = arith.addf %520, %521 : vector<16x7xf32>
    %cst_260 = arith.constant dense<0xFF800000> : vector<16xf32>
    %523 = vector.multi_reduction <maximumf>, %522, %cst_260 [1] : vector<16x7xf32> to vector<16xf32>
    %524 = vector.shape_cast %523 : vector<16xf32> to vector<16x1xf32>
    %525 = vector.broadcast %524 : vector<16x1xf32> to vector<16x7xf32>
    %526 = arith.subf %522, %525 : vector<16x7xf32>
    %527 = math.exp %526 : vector<16x7xf32>
    %cst_261 = arith.constant dense<0.000000e+00> : vector<16xf32>
    %528 = vector.multi_reduction <add>, %527, %cst_261 [1] : vector<16x7xf32> to vector<16xf32>
    %529 = vector.shape_cast %528 : vector<16xf32> to vector<16x1xf32>
    %530 = vector.broadcast %529 : vector<16x1xf32> to vector<16x7xf32>
    %531 = arith.divf %527, %530 : vector<16x7xf32>
    %532 = vector.extract_strided_slice %531 {offsets = [0, 6], sizes = [16, 1], strides = [1, 1]} : vector<16x7xf32> to vector<16x1xf32>
    %cst_262 = arith.constant 1.000000e+00 : f32
    %533 = vector.broadcast %cst_262 : f32 to vector<16x1xf32>
    %534 = arith.subf %533, %532 : vector<16x1xf32>
    %535 = arith.mulf %534, %356 : vector<16x1xf32>
    %cst_263 = arith.constant dense<0.000000e+00> : vector<2x32xf32>
    %536 = tpu.matmul %354, %353, %cst_263 {dimension_numbers = #tpu.dot_dimension_numbers<[1], [0], [0], [1], [0, 0, 1, 1], [], []>} : vector<2x16xf32>, vector<16x32xf32>, vector<2x32xf32> -> vector<2x32xf32>
    %cst_264 = arith.constant dense<0.000000e+00> : vector<2xf32>
    %537 = vector.multi_reduction <add>, %354, %cst_264 [1] : vector<2x16xf32> to vector<2xf32>
    %538 = vector.shape_cast %537 : vector<2xf32> to vector<2x1xf32>
    %cst_265 = arith.constant 1.000000e+00 : f32
    %539 = vector.broadcast %cst_265 : f32 to vector<2x1xf32>
    %540 = arith.maximumf %538, %539 : vector<2x1xf32>
    %541 = vector.broadcast %540 : vector<2x1xf32> to vector<2x32xf32>
    %542 = arith.divf %536, %541 : vector<2x32xf32>
    %c0_266 = arith.constant 0 : index
    %c72 = arith.constant 72 : index
    %543 = vector.load %arg4[%c0_266, %c72] : memref<128x128xf32, #tpu.memory_space<vmem>>, vector<32x8xf32>
    %cst_267 = arith.constant dense<0.000000e+00> : vector<2x8xf32>
    %544 = tpu.matmul %542, %543, %cst_267 {dimension_numbers = #tpu.dot_dimension_numbers<[1], [0], [0], [1], [0, 0, 1, 1], [], []>} : vector<2x32xf32>, vector<32x8xf32>, vector<2x8xf32> -> vector<2x8xf32>
    %545 = vector.broadcast %393 : vector<1x8xf32> to vector<2x8xf32>
    %546 = arith.addf %544, %545 : vector<2x8xf32>
    %cst_268 = arith.constant 0.000000e+00 : f32
    %547 = vector.broadcast %cst_268 : f32 to vector<2x8xf32>
    %548 = arith.maximumf %546, %547 : vector<2x8xf32>
    %549 = tpu.concatenate %471, %548 in 1 : vector<2x8xf32>, vector<2x8xf32> -> vector<2x16xf32>
    %c80 = arith.constant 80 : index
    %c0_269 = arith.constant 0 : index
    %550 = vector.load %arg4[%c80, %c0_269] : memref<128x128xf32, #tpu.memory_space<vmem>>, vector<16x2xf32>
    %cst_270 = arith.constant dense<0.000000e+00> : vector<2x2xf32>
    %551 = tpu.matmul %549, %550, %cst_270 {dimension_numbers = #tpu.dot_dimension_numbers<[1], [0], [0], [1], [0, 0, 1, 1], [], []>} : vector<2x16xf32>, vector<16x2xf32>, vector<2x2xf32> -> vector<2x2xf32>
    %552 = vector.broadcast %390 : vector<1x2xf32> to vector<2x2xf32>
    %553 = arith.addf %551, %552 : vector<2x2xf32>
    %554 = vector.extract_strided_slice %553 {offsets = [0, 0], sizes = [2, 1], strides = [1, 1]} : vector<2x2xf32> to vector<2x1xf32>
    %555 = arith.negf %554 : vector<2x1xf32>
    %556 = math.exp %555 : vector<2x1xf32>
    %cst_271 = arith.constant 1.000000e+00 : f32
    %557 = vector.broadcast %cst_271 : f32 to vector<2x1xf32>
    %558 = arith.addf %557, %556 : vector<2x1xf32>
    %559 = arith.divf %557, %558 : vector<2x1xf32>
    %560 = vector.extract_strided_slice %553 {offsets = [0, 1], sizes = [2, 1], strides = [1, 1]} : vector<2x2xf32> to vector<2x1xf32>
    %561 = arith.negf %560 : vector<2x1xf32>
    %562 = math.exp %561 : vector<2x1xf32>
    %cst_272 = arith.constant 1.000000e+00 : f32
    %563 = vector.broadcast %cst_272 : f32 to vector<2x1xf32>
    %564 = arith.addf %563, %562 : vector<2x1xf32>
    %565 = arith.divf %563, %564 : vector<2x1xf32>
    %cst_273 = arith.constant 0.000000e+00 : f32
    %566 = vector.broadcast %cst_273 : f32 to vector<16x120xf32>
    %567 = tpu.concatenate %522, %535, %566 in 1 : vector<16x7xf32>, vector<16x1xf32>, vector<16x120xf32> -> vector<16x128xf32>
    %c0_274 = arith.constant 0 : index
    %c0_275 = arith.constant 0 : index
    %568 = vector.load %arg5[%c0_274, %c0_275] : memref<16x128xf32, #tpu.memory_space<vmem>>, vector<16x128xf32>
    tpu.vector_store %arg5[%c0_274, %c0_275], %567 {strides = array<i32>} : memref<16x128xf32, #tpu.memory_space<vmem>>, vector<16x128xf32>,
    %cst_276 = arith.constant 0.000000e+00 : f32
    %569 = vector.broadcast %cst_276 : f32 to vector<2x60xf32>
    %570 = tpu.concatenate %477, %486, %496, %506, %559, %565, %379, %383, %569 in 1 : vector<2x3xf32>, vector<2x3xf32>, vector<2x4xf32>, vector<2x8xf32>, vector<2x1xf32>, vector<2x1xf32>, vector<2x16xf32>, vector<2x32xf32>, vector<2x60xf32> -> vector<2x128xf32>
    %c0_277 = arith.constant 0 : index
    %c0_278 = arith.constant 0 : index
    %571 = vector.load %arg6[%c0_277, %c0_278] : memref<2x128xf32, #tpu.memory_space<vmem>>, vector<2x128xf32>
    tpu.vector_store %arg6[%c0_277, %c0_278], %570 {strides = array<i32>} : memref<2x128xf32, #tpu.memory_space<vmem>>, vector<2x128xf32>,
    return
  }
}

</mosaic_0001>

<bundles_post_ra>
// kernel: mul.19
= control target key start
LH: loop header
LB: loop body
LE: loop exit
PB: predicated region body
PF: predicated region fallthrough
CT: control target
= control target key end

     0   :  { %vm8_vm0 = vcmask 64512   ;;  %vm14_vm1 = vcmask 130112   ;;  %s42_s0 = inlined_call_operand.vmem [shape: f32[2,8], index: 0, kind: input, shape index: {}]   ;;  %s43_s1 = inlined_call_operand.vmem [shape: f32[16], index: 1, kind: output, shape index: {}]  }
   0x1   :  { %v5_v0 = vld [vmem:[%s42_s0] sm:$0x3]  ;;  %s25_s0 = smov 8  }
   0x2   :  { %6 = vst [vmem:[#allocation1] sm:$0x3] %v5_v0 }
   0x9   :  { %v11_v1 = vld [vmem:[#allocation1 + $0x1] sm:$0x1]   ;;  %v7_v2 = vld [vmem:[#allocation1] sm:$0x1]  }
   0xa   :  { %12 = vrot.lane.b32.xlu0 %v11_v1, %s25_s0  ;;  %9 = vst.msk [vmem:[#allocation0] sm:$0x1] %vm8_vm0, %v7_v2  }
  0x7c   :  { %v13_v3 = vpop.permute.xlu0 %12  }
  0x7d   :  { %15 = vst.msk [vmem:[#allocation0] sm:$0x1] %vm14_vm1, %v13_v3  }
  0x84   :  { %v20_v4 = vld [vmem:[#allocation0] sm:$0x1] }
  0x85   :  { %23 = vst [vmem:[%s43_s1] sm:$0x1] %v20_v4 }

// kernel: language_router_forward.1
= control target key start
LH: loop header
LB: loop body
LE: loop exit
PB: predicated region body
PF: predicated region fallthrough
CT: control target
= control target key end

     0   :  { %vm44_vm0 = vcmask 261120   ;;  %s5592_s11 = smov 96   ;;  %vm168_vm1 = vcmask 130048   ;;  %vm5595_vm2 = vmmov 0   ;;  %vm3187_vm3 = vcmask 1040384   ;;  %s5596_s28 = smov 72   ;;  %s7062_s3 = inlined_call_operand.vmem [shape: f32[3,232,128], index: 3, kind: input, shape index: {}]   ;;  %s7063_s0 = inlined_call_operand.vmem [shape: f32[16,32], index: 0, kind: input, shape index: {}]   ;;  %s7064_s2 = inlined_call_operand.vmem [shape: f32[432,128], index: 2, kind: input, shape index: {}]   ;;  %s7065_s1 = inlined_call_operand.vmem [shape: f32[64,128], index: 1, kind: input, shape index: {}]   ;;  %s7066_s4 = inlined_call_operand.vmem [shape: f32[128,128], index: 4, kind: input, shape index: {}]   ;;  %s7067_s5 = inlined_call_operand.vmem [shape: f32[16,128], index: 5, kind: output, shape index: {0}]   ;;  %s7068_s6 = inlined_call_operand.vmem [shape: f32[2,128], index: 6, kind: output, shape index: {1}]  }
   0x1   :  { %v39_v0 = vld [vmem:[%s7062_s3 + $0x18] sm:$0xff]  ;;  %v38_v1 = vld [vmem:[%s7062_s3 + $0x10] sm:$0xff]  ;;  %v5654_v2 = vld [vmem:[%s7063_s0] sm:$0xff]  ;;  %vm3269_vm4 = vcmask 123904   ;;  %s5597_s30 = smov 112   ;;  %s5598_s9 = smov 16  }
   0x2   :  { %4766 = vmatprep.subr.mxu0 %v39_v0  ;;  %v37_v3 = vld [vmem:[%s7062_s3 + $0x8] sm:$0xff]  ;;  %4774 = vmatprep.mubr.msk.f32.mxu0 %vm44_vm0, %v5654_v2  ;;  %v36_v4 = vld [vmem:[%s7062_s3] sm:$0xff]  ;;  %v5711_v27 = vld [vmem:[%s7064_s2 + $0x18] sm:$0xff]  ;;  %s5599_s13 = smov 56   ;;  %s5600_s14 = smov 80   ;;  %vm3545_vm5 = vcmask 392192  }
   0x3   :  { %4767 = vmatpush3.msra.mxu0 %v39_v0  ;;  %v5667_v5 = vld [vmem:[%s7063_s0 + $0x8] sm:$0xff]  ;;  %v4217_v7 = vld [vmem:[%s7062_s3 + $0xe0] ss:$0 sm:$0xff]  ;;  %s5593_s0 = smov 64   ;;  %7083 = vst [vmem:[#allocation3_spill] sm:$0xff] %v5711_v27  ;;  %v5717_v30 = vld [vmem:[%s7064_s2 + $0x10] sm:$0xff] }
   0x4   :  { %4768 = vmatprep.subr.mxu0 %v38_v1  ;;  %v5680_v11 = vld [vmem:[%s7064_s2 + $0x8] sm:$0xff]  ;;  %v5686_v12 = vld [vmem:[%s7064_s2] sm:$0xff]  ;;  %7084 = vst [vmem:[#allocation4_spill] sm:$0xff] %v5717_v30  ;;  %v5725_v33 = vld [vmem:[%s7064_s2 + $0xb0] sm:$0xff]  ;;  %vm3648_vm6 = vcmask 115768   ;;  %vm3619_vm7 = vcmask 17408  }
   0x5   :  { %4769 = vmatpush3.msra.mxu0 %v38_v1  ;;  %4777 = vmatprep.subr.mxu1 %v5680_v11  ;;  %v5700_v23 = vld [vmem:[%s7064_s2 + $0x28] sm:$0xff]  ;;  %v5705_v25 = vld [vmem:[%s7064_s2 + $0x20] sm:$0xff]  ;;  %v5730_v34 = vld [vmem:[%s7064_s2 + $0xb8] sm:$0xff]  ;;  %vm3857_vm8 = vcmask 56320   ;;  %s5601_s19 = smov 8   ;;  %vm3631_vm9 = vcmask 50200  }
   0x6   :  { %4770 = vmatprep.subr.mxu0 %v37_v3  ;;  %4778 = vmatpush3.msra.mxu1 %v5680_v11  ;;  %7082 = vst [vmem:[#allocation2_spill] sm:$0xff] %v5705_v25  ;;  %v5735_v35 = vld [vmem:[%s7064_s2 + $0xc0] sm:$0xff]  ;;  %v5746_v36 = vld [vmem:[%s7064_s2 + $0xc8] sm:$0xff]  ;;  %v5751_v37 = vld [vmem:[%s7064_s2 + $0xd0] sm:$0xff]  ;;  %s5602_s20 = smov 121   ;;  %vm4069_vm10 = vcmask 64512  }
   0x7   :  { %4771 = vmatpush3.msra.mxu0 %v37_v3  ;;  %4779 = vmatprep.subr.mxu1 %v5686_v12  ;;  %v5756_v38 = vld [vmem:[%s7064_s2 + $0xa8] sm:$0xff]  ;;  %v5761_v39 = vld [vmem:[%s7064_s2 + $0xa0] sm:$0xff]  ;;  %v5771_v40 = vld [vmem:[%s7064_s2 + $0xd8] sm:$0xff]  ;;  %s5603_s21 = smov 125   ;;  %vm3659_vm11 = vcmask 58368   ;;  %s5605_s23 = smov 20  }
   0x8   :  { %4772 = vmatprep.subr.mxu0 %v36_v4  ;;  %4780 = vmatpush3.msra.mxu1 %v5686_v12  ;;  %v5777_v41 = vld [vmem:[%s7064_s2 + $0x98] sm:$0xff]  ;;  %v5782_v42 = vld [vmem:[%s7064_s2 + $0xe0] sm:$0xff]  ;;  %v5789_v43 = vld [vmem:[%s7064_s2 + $0x90] sm:$0xff]  ;;  %vm3642_vm12 = vcmask 25600   ;;  %s5606_s26 = smov 3   ;;  %s5607_s27 = smov 1  }
   0x9   :  { %4773 = vmatpush3.msra.mxu0 %v36_v4  ;;  %v5799_v44 = vld [vmem:[%s7064_s2 + $0xe8] sm:$0xff]  ;;  %v5805_v45 = vld [vmem:[%s7064_s2 + $0xf0] sm:$0xff]  ;;  %v5816_v46 = vld [vmem:[%s7064_s2 + $0xf8] sm:$0xff]  ;;  %vm4192_vm13 = vcmask 23552   ;;  %vm4194_vm14 = vcmask 48128   ;;  %vm4196_vm15 = vcmask 80896  }
   0xa   :  { %4775 = vmatmul.mubr.msk.f32.vlgmr.msra.gmra.mxu0 %vm44_vm0, %v5667_v5  ;;  %v5821_v47 = vld [vmem:[%s7064_s2 + $0x100] sm:$0xff]  ;;  %v5830_v48 = vld [vmem:[%s7064_s2 + $0x108] sm:$0xff]  ;;  %v5835_v49 = vld [vmem:[%s7064_s2 + $0x110] sm:$0xff] }
   0xb   :  { %4791 = vmatprep.mubr.msk.f32.mxu0 %vm168_vm1, %v5725_v33  ;;  %v5844_v50 = vld [vmem:[%s7064_s2 + $0x118] sm:$0xff]  ;;  %v5849_v51 = vld [vmem:[%s7064_s2 + $0x120] sm:$0xff]  ;;  %v5858_v52 = vld [vmem:[%s7064_s2 + $0x128] sm:$0xff] }
   0xc   :  { %v5865_v54 = vld [vmem:[%s7065_s1 + $0x10] sm:$0xff]  ;;  %v5873_v57 = vld [vmem:[%s7065_s1 + $0x18] sm:$0xff]  ;;  %v5883_v59 = vld [vmem:[%s7064_s2 + $0x88] sm:$0xff] }
   0xd   :  { %7085 = vst [vmem:[#allocation5_spill] sm:$0xff] %v5865_v54  ;;  %7086 = vst [vmem:[#allocation6_spill] sm:$0xff] %v5873_v57  ;;  %v5890_v60 = vld [vmem:[%s7064_s2 + $0x80] sm:$0xff]  ;;  %v5897_v61 = vld [vmem:[%s7064_s2 + $0x78] sm:$0xff] }
   0xe   :  { %v5904_v62 = vld [vmem:[%s7064_s2 + $0x70] sm:$0xff]  ;;  %v5911_v63 = vld [vmem:[%s7064_s2 + $0x68] sm:$0xff]  ;;  %v5917_v0 = vld [vmem:[%s7064_s2 + $0x60] sm:$0xff] }
   0xf   :  { %v5923_v1 = vld [vmem:[%s7064_s2 + $0x58] sm:$0xff]  ;;  %v5930_v3 = vld [vmem:[%s7064_s2 + $0x50] sm:$0xff]  ;;  %v5937_v4 = vld [vmem:[%s7064_s2 + $0x48] sm:$0xff] }
  0xca   :  { %v4776_v6 = vpop.f32.mrf.mxu0 }
  0xcb   :  { %v123_v10 = vadd.f32 %v4776_v6, %v4217_v7  ;;  %v5944_v6 = vld [vmem:[%s7064_s2 + $0x40] sm:$0xff] }
  0xcc   :  { %v117_v8 = vpop.f32.mrf.mxu0 }
  0xcd   :  { %v118_v9 = vadd.f32 %v4217_v7, %v117_v8  ;;  %v5951_v7 = vld [vmem:[%s7064_s2 + $0x38] sm:$0xff]  ;;  %v5959_v8 = vld [vmem:[%s7064_s2 + $0x30] sm:$0xff] }
  0xcf   :  { %128 = vrot.lane.b32.xlu0 %v118_v9, %s5592_s11 }
  0xd3   :  { %130 = vrot.lane.b32.xlu0 %v123_v10, %s5592_s11 }
  0xd7   :  { %292 = vrot.lane.b32.xlu0 %v123_v10, %s5593_s0 }
 0x141   :  { %v129_v13 = vpop.permute.xlu0 %128 }
 0x142   :  { %134 = vxpose.xlu1.b32.start [1/2] (short) (narrow) %v129_v13, 32 }
 0x145   :  { %v131_v14 = vpop.permute.xlu0 %130 }
 0x146   :  { %135 = vxpose.xlu1.b32.end [2/2] (short) (narrow) %v131_v14, 32 }
 0x149   :  { %v293_v15 = vpop.permute.xlu0 %292 }
 0x14a   :  { %4787 = vmatprep.subr.mxu0 %v293_v15 }
 0x14b   :  { %4788 = vmatpush3.msra.mxu0 %v293_v15 }
 0x16c   :  { %290 = vrot.lane.b32.xlu1 %v118_v9, %s5593_s0 }
 0x1be   :  { %v150_v16 = vpop.trf.xlu1 }
 0x1bf   :  { %4781 = vmatprep.mubr.msk.f32.mxu1 %vm168_vm1, %v150_v16 }
 0x1c2   :  { %v151_v17 = vpop.trf.xlu1 }
 0x1c3   :  { %4782 = vmatmul.mubr.msk.f32.vlgmr.msra.gmra.mxu1 %vm168_vm1, %v151_v17 }
 0x1c6   :  { %v152_v18 = vpop.trf.xlu1 }
 0x1c7   :  { %4784 = vmatprep.mubr.msk.f32.mxu1 %vm168_vm1, %v152_v18 }
 0x1ca   :  { %v153_v19 = vpop.trf.xlu1 }
 0x1cb   :  { %4785 = vmatmul.mubr.msk.f32.gmra.mxu1 %vm168_vm1, %v153_v19 }
 0x1cc   :  { %4823 = vmatprep.mubr.msk.f32.mxu1 %vm44_vm0, %v118_v9 }
 0x1de   :  { %v291_v20 = vpop.permute.xlu1 %290 }
 0x1df   :  { %4789 = vmatprep.subr.mxu0 %v291_v20 }
 0x1e0   :  { %4790 = vmatpush3.msra.mxu0 %v291_v20 }
 0x1e1   :  { %4792 = vmatmul.mubr.msk.f32.vlgmr.msra.gmra.mxu0 %vm168_vm1, %v5730_v34  ;;  %4826 = vmatprep.subr.mxu0 %v5756_v38 }
 0x1e2   :  { %4794 = vmatprep.mubr.msk.f32.mxu0 %vm168_vm1, %v5735_v35  ;;  %4827 = vmatpush3.msra.mxu0 %v5756_v38 }
 0x1e3   :  { %4828 = vmatprep.subr.mxu0 %v5761_v39 }
 0x1e4   :  { %4829 = vmatpush3.msra.mxu0 %v5761_v39 }
 0x1e5   :  { %4795 = vmatmul.mubr.msk.f32.gmra.mxu0 %vm168_vm1, %v5746_v36  ;;  %4830 = vmatprep.subr.mxu0 %v5777_v41 }
 0x1e6   :  { %4797 = vmatprep.mubr.msk.f32.mxu0 %vm168_vm1, %v5751_v37  ;;  %4831 = vmatpush3.msra.mxu0 %v5777_v41 }
 0x1e7   :  { %4832 = vmatprep.subr.mxu0 %v5789_v43 }
 0x1e8   :  { %4833 = vmatpush3.msra.mxu0 %v5789_v43 }
 0x1e9   :  { %4798 = vmatmul.mubr.msk.f32.gmra.mxu0 %vm168_vm1, %v5771_v40  ;;  %4834 = vmatprep.subr.mxu0 %v5883_v59 }
 0x1ea   :  { %4800 = vmatprep.mubr.msk.f32.mxu0 %vm168_vm1, %v5782_v42  ;;  %4835 = vmatpush3.msra.mxu0 %v5883_v59 }
 0x1eb   :  { %4836 = vmatprep.subr.mxu0 %v5890_v60 }
 0x1ec   :  { %4837 = vmatpush3.msra.mxu0 %v5890_v60 }
 0x1ed   :  { %4801 = vmatmul.mubr.msk.f32.gmra.mxu0 %vm168_vm1, %v5799_v44  ;;  %4838 = vmatprep.subr.mxu0 %v5897_v61 }
 0x1ee   :  { %4803 = vmatprep.mubr.msk.f32.mxu0 %vm168_vm1, %v5805_v45  ;;  %4839 = vmatpush3.msra.mxu0 %v5897_v61 }
 0x1ef   :  { %4840 = vmatprep.subr.mxu0 %v5904_v62 }
 0x1f0   :  { %4841 = vmatpush3.msra.mxu0 %v5904_v62 }
 0x1f1   :  { %4804 = vmatmul.mubr.msk.f32.gmra.mxu0 %vm168_vm1, %v5816_v46  ;;  %4842 = vmatprep.subr.mxu0 %v5911_v63 }
 0x1f2   :  { %4806 = vmatprep.mubr.msk.f32.mxu0 %vm168_vm1, %v5821_v47  ;;  %4843 = vmatpush3.msra.mxu0 %v5911_v63 }
 0x1f3   :  { %4844 = vmatprep.subr.mxu0 %v5917_v0 }
 0x1f4   :  { %4845 = vmatpush3.msra.mxu0 %v5917_v0 }
 0x1f5   :  { %4807 = vmatmul.mubr.msk.f32.gmra.mxu0 %vm168_vm1, %v5830_v48  ;;  %4846 = vmatprep.subr.mxu0 %v5923_v1 }
 0x1f6   :  { %4809 = vmatprep.mubr.msk.f32.mxu0 %vm168_vm1, %v5835_v49  ;;  %4847 = vmatpush3.msra.mxu0 %v5923_v1 }
 0x1f7   :  { %4848 = vmatprep.subr.mxu0 %v5930_v3 }
 0x1f8   :  { %4849 = vmatpush3.msra.mxu0 %v5930_v3 }
 0x1f9   :  { %4810 = vmatmul.mubr.msk.f32.gmra.mxu0 %vm168_vm1, %v5844_v50  ;;  %4850 = vmatprep.subr.mxu0 %v5937_v4 }
 0x1fa   :  { %4812 = vmatprep.mubr.msk.f32.mxu0 %vm168_vm1, %v5849_v51  ;;  %4851 = vmatpush3.msra.mxu0 %v5937_v4 }
 0x1fb   :  { %4852 = vmatprep.subr.mxu0 %v5944_v6 }
 0x1fc   :  { %4853 = vmatpush3.msra.mxu0 %v5944_v6 }
 0x1fd   :  { %4813 = vmatmul.mubr.msk.f32.gmra.mxu0 %vm168_vm1, %v5858_v52  ;;  %4854 = vmatprep.subr.mxu0 %v5951_v7 }
 0x1fe   :  { %4855 = vmatpush3.msra.mxu0 %v5951_v7 }
 0x1ff   :  { %4856 = vmatprep.subr.mxu0 %v5959_v8 }
 0x200   :  { %4857 = vmatpush3.msra.mxu0 %v5959_v8 }
 0x283   :  { %v4783_v21 = vpop.f32.mrf.mxu1 }
 0x284   :  { %v271_v31 = vmul.f32 %v4783_v21, %v5711_v27  ;;  %v5996_v27 = vld [vmem:[%s7064_s2 + $0x188] sm:$0xff] }
 0x285   :  { %v247_v22 = vpop.f32.mrf.mxu1 }
 0x286   :  { %v270_v32 = vmul.f32 %v5717_v30, %v247_v22 }
 0x28b   :  { %v4786_v24 = vpop.f32.mrf.mxu1 }
 0x28c   :  { %v273_v26 = vmul.f32 %v4786_v24, %v5700_v23 }
 0x28d   :  { %v257_v28 = vpop.f32.mrf.mxu1 }
 0x28e   :  { %v272_v29 = vmul.f32 %v5705_v25, %v257_v28  ;;  %4815 = vmatprep.subr.mxu1 %v273_v26  ;;  %v5973_v28 = vld [vmem:[%s7064_s2 + $0x1a8] sm:$0xff] }
 0x28f   :  { %4816 = vmatpush3.msra.mxu1 %v273_v26 }
 0x290   :  { %4817 = vmatprep.subr.mxu1 %v272_v29 }
 0x291   :  { %4818 = vmatpush3.msra.mxu1 %v272_v29  ;;  %v5978_v29 = vld [vmem:[%s7064_s2 + $0x198] sm:$0xff] }
 0x292   :  { %4819 = vmatprep.subr.mxu1 %v271_v31 }
 0x293   :  { %4820 = vmatpush3.msra.mxu1 %v271_v31 }
 0x294   :  { %4821 = vmatprep.subr.mxu1 %v270_v32 }
 0x295   :  { %4822 = vmatpush3.msra.mxu1 %v270_v32  ;;  %v5983_v32 = vld [vmem:[%s7064_s2 + $0x1a0] sm:$0xff] }
 0x296   :  { %4824 = vmatmul.mubr.msk.f32.vlgmr.msra.gmra.mxu1 %vm44_vm0, %v123_v10 }
 0x2a1   :  { %v5964_v9 = vpop.f32.mrf.mxu0 }
 0x2a3   :  { %v5966_v10 = vpop.f32.mrf.mxu0 }
 0x2a5   :  { %v4796_v13 = vpop.f32.mrf.mxu0 }
 0x2a7   :  { %v5968_v14 = vpop.f32.mrf.mxu0 }
 0x2a9   :  { %v4799_v15 = vpop.f32.mrf.mxu0 }
 0x2ab   :  { %v430_v16 = vpop.f32.mrf.mxu0 }
 0x2ad   :  { %v4802_v17 = vpop.f32.mrf.mxu0 }
 0x2af   :  { %v440_v18 = vpop.f32.mrf.mxu0 }
 0x2b1   :  { %v4805_v19 = vpop.f32.mrf.mxu0 }
 0x2b3   :  { %v450_v20 = vpop.f32.mrf.mxu0 }
 0x2b5   :  { %v4808_v21 = vpop.f32.mrf.mxu0 }
 0x2b7   :  { %v460_v22 = vpop.f32.mrf.mxu0 }
 0x2b9   :  { %v4811_v24 = vpop.f32.mrf.mxu0 }
 0x2bb   :  { %v470_v26 = vpop.f32.mrf.mxu0 }
 0x2bd   :  { %v4814_v31 = vpop.f32.mrf.mxu0 }
 0x356   :  { %v4825_v53 = vpop.f32.mrf.mxu1 }
 0x357   :  { %v5877_v58 = vadd.f32 %v4825_v53, %v5873_v57  ;;  %v520_v53 = vmul.f32 %v4814_v31, %v5973_v28  ;;  %v518_v57 = vmul.f32 %v4811_v24, %v5978_v29  ;;  %v6002_v31 = vld [vmem:[%s7064_s2 + $0x180] sm:$0xff]  ;;  %v516_v24 = vmul.f32 %v4808_v21, %v5996_v27  ;;  %v6020_v21 = vld [vmem:[%s7064_s2 + $0x168] sm:$0xff] }
 0x358   :  { %v591_v55 = vpop.f32.mrf.mxu1 }
 0x359   :  { %v5868_v56 = vadd.f32 %v591_v55, %v5865_v54  ;;  %v5989_v55 = vld [vmem:[%s7064_s2 + $0x190] sm:$0xff]  ;;  %v480_v54 = vpop.f32.mrf.mxu0  ;;  %4861 = vmatprep.subr.mxu1 %v520_v53 }
 0x35a   :  { %v519_v30 = vmul.f32 %v5983_v32, %v480_v54  ;;  %4862 = vmatpush3.msra.mxu1 %v520_v53  ;;  %v517_v25 = vmul.f32 %v5989_v55, %v470_v26  ;;  %v6008_v54 = vld [vmem:[%s7064_s2 + $0x178] sm:$0xff]  ;;  %v515_v53 = vmul.f32 %v6002_v31, %v460_v22  ;;  %v6014_v26 = vld [vmem:[%s7064_s2 + $0x170] sm:$0xff]  ;;  %v6026_v22 = vld [vmem:[%s7064_s2 + $0x160] sm:$0xff] }
 0x35b   :  { %600 = vmax.xlane.f32.xlu0 %v5868_v56 }
 0x35c   :  { %4863 = vmatprep.subr.mxu1 %v519_v30 }
 0x35d   :  { %4864 = vmatpush3.msra.mxu1 %v519_v30  ;;  %v514_v30 = vmul.f32 %v4805_v19, %v6008_v54  ;;  %v6032_v19 = vld [vmem:[%s7064_s2 + $0x158] sm:$0xff] }
 0x35e   :  { %4865 = vmatprep.subr.mxu1 %v518_v57  ;;  %7087 = vst [vmem:[#allocation7_spill] sm:$0xff] %v6032_v19 }
 0x35f   :  { %602 = vmax.xlane.f32.xlu0 %v5877_v58  ;;  %4866 = vmatpush3.msra.mxu1 %v518_v57  ;;  %v513_v57 = vmul.f32 %v6014_v26, %v450_v20  ;;  %v6038_v20 = vld [vmem:[%s7064_s2 + $0x150] sm:$0xff] }
 0x360   :  { %4867 = vmatprep.subr.mxu1 %v517_v25  ;;  %7088 = vst [vmem:[#allocation8_spill] sm:$0xff] %v6038_v20 }
 0x361   :  { %4868 = vmatpush3.msra.mxu1 %v517_v25  ;;  %v512_v25 = vmul.f32 %v4802_v17, %v6020_v21  ;;  %v6044_v17 = vld [vmem:[%s7064_s2 + $0x148] sm:$0xff] }
 0x362   :  { %4869 = vmatprep.subr.mxu1 %v516_v24  ;;  %7089 = vst [vmem:[#allocation9_spill] sm:$0xff] %v6044_v17 }
 0x363   :  { %4870 = vmatpush3.msra.mxu1 %v516_v24  ;;  %v511_v24 = vmul.f32 %v6026_v22, %v440_v18  ;;  %v6050_v18 = vld [vmem:[%s7064_s2 + $0x140] sm:$0xff] }
 0x364   :  { %4871 = vmatprep.subr.mxu1 %v515_v53  ;;  %7090 = vst [vmem:[#allocation10_spill] sm:$0xff] %v6050_v18 }
 0x365   :  { %4872 = vmatpush3.msra.mxu1 %v515_v53  ;;  %v510_v53 = vmul.f32 %v4799_v15, %v6032_v19  ;;  %v6056_v15 = vld [vmem:[%s7064_s2 + $0x138] sm:$0xff] }
 0x366   :  { %4873 = vmatprep.subr.mxu1 %v514_v30  ;;  %7091 = vst [vmem:[#allocation11_spill] sm:$0xff] %v6056_v15 }
 0x367   :  { %4874 = vmatpush3.msra.mxu1 %v514_v30  ;;  %v509_v30 = vmul.f32 %v6038_v20, %v430_v16  ;;  %v6063_v16 = vld [vmem:[%s7064_s2 + $0x130] sm:$0xff] }
 0x368   :  { %4875 = vmatprep.subr.mxu1 %v513_v57  ;;  %7092 = vst [vmem:[#allocation12_spill] sm:$0xff] %v6063_v16 }
 0x369   :  { %4876 = vmatpush3.msra.mxu1 %v513_v57  ;;  %v508_v57 = vmul.f32 %v4796_v13, %v6044_v17  ;;  %v506_v13 = vmul.f32 %v5964_v9, %v6056_v15 }
 0x36a   :  { %4877 = vmatprep.subr.mxu1 %v512_v25 }
 0x36b   :  { %4878 = vmatpush3.msra.mxu1 %v512_v25  ;;  %v507_v25 = vmul.f32 %v6050_v18, %v5968_v14 }
 0x36c   :  { %4879 = vmatprep.subr.mxu1 %v511_v24 }
 0x36d   :  { %4880 = vmatpush3.msra.mxu1 %v511_v24  ;;  %v505_v24 = vmul.f32 %v6063_v16, %v5966_v10  ;;  %v6074_v10 = vld [vmem:[%s7065_s1] sm:$0xff] }
 0x36e   :  { %4881 = vmatprep.subr.mxu1 %v510_v53  ;;  %7093 = vst [vmem:[#allocation13_spill] sm:$0xff] %v6074_v10 }
 0x36f   :  { %4882 = vmatpush3.msra.mxu1 %v510_v53 }
 0x370   :  { %4883 = vmatprep.subr.mxu1 %v509_v30 }
 0x371   :  { %4884 = vmatpush3.msra.mxu1 %v509_v30 }
 0x372   :  { %4885 = vmatprep.subr.mxu1 %v508_v57 }
 0x373   :  { %4886 = vmatpush3.msra.mxu1 %v508_v57 }
 0x374   :  { %4887 = vmatprep.subr.mxu1 %v507_v25 }
 0x375   :  { %4888 = vmatpush3.msra.mxu1 %v507_v25 }
 0x376   :  { %4889 = vmatprep.subr.mxu1 %v506_v13 }
 0x377   :  { %4890 = vmatpush3.msra.mxu1 %v506_v13  ;;  %v6080_v13 = vld [vmem:[%s7065_s1 + $0x8] sm:$0xff] }
 0x378   :  { %4891 = vmatprep.subr.mxu1 %v505_v24  ;;  %7094 = vst [vmem:[#allocation14_spill] sm:$0xff] %v6080_v13 }
 0x379   :  { %4892 = vmatpush3.msra.mxu1 %v505_v24 }
 0x3e4   :  { %v601_v14 = vpop.xlane.xlu0 %600 }
 0x3e5   :  { %v604_v53 = vsub.f32 %v5868_v56, %v601_v14 }
 0x3e7   :  { %v606_v18 = vmul.f32 1.442695, %v604_v53 }
 0x3e8   :  { %v603_v17 = vpop.xlane.xlu0 %602 }
 0x3e9   :  { %5428 = vpow2.f32 %v606_v18  ;;  %v605_v30 = vsub.f32 %v5877_v58, %v603_v17  ;;  %v787_v58 = vld [vmem:[%s7062_s3 + $0x38] sm:$0xff]  ;;  %v786_v17 = vld [vmem:[%s7062_s3 + $0x30] sm:$0xff] }
 0x3ea   :  { %4896 = vmatprep.subr.mxu0 %v787_v58 }
 0x3eb   :  { %v608_v9 = vmul.f32 1.442695, %v605_v30 }
 0x3ed   :  { %5430 = vpow2.f32 %v608_v9 }
 0x3f6   :  { %v5429_v57 = vpop.eup %5428 }
 0x3f7   :  { %v610_v25 = vmul.f32 %v5429_v57, %v6074_v10  ;;  %v785_v10 = vld [vmem:[%s7062_s3 + $0x28] sm:$0xff] }
 0x3f9   :  { %4858 = vmatprep.mubr.f32.mxu0 %v610_v25 }
 0x3fa   :  { %v5431_v56 = vpop.eup %5430 }
 0x3fb   :  { %v611_v18 = vmul.f32 %v5431_v56, %v6080_v13 }
 0x3fd   :  { %4859 = vmatmul.mubr.f32.vlgmr.msra.gmra.mxu0 %v611_v18 }
 0x3fe   :  { %4897 = vmatpush3.msra.mxu0 %v787_v58  ;;  %v784_v58 = vld [vmem:[%s7062_s3 + $0x20] sm:$0xff] }
 0x3ff   :  { %4898 = vmatprep.subr.mxu0 %v786_v17 }
 0x400   :  { %4899 = vmatpush3.msra.mxu0 %v786_v17 }
 0x401   :  { %4900 = vmatprep.subr.mxu0 %v785_v10 }
 0x402   :  { %4901 = vmatpush3.msra.mxu0 %v785_v10 }
 0x403   :  { %4902 = vmatprep.subr.mxu0 %v784_v58 }
 0x404   :  { %4903 = vmatpush3.msra.mxu0 %v784_v58 }
 0x4bd   :  { %v4860_v24 = vpop.f32.mrf.mxu0 }
 0x4be   :  { %v704_v14 = vmax.f32 %v4860_v24, 1e-20 }
 0x4bf   :  { %v694_v53 = vpop.f32.mrf.mxu0 }
 0x4c0   :  { %v703_v30 = vmax.f32 %v694_v53, 1e-20  ;;  %5432 = vrcp.f32 %v704_v14 }
 0x4c2   :  { %5434 = vrcp.f32 %v703_v30 }
 0x4cd   :  { %v5433_v9 = vpop.eup %5432 }
 0x4ce   :  { %v708_v13 = vmul.f32 %v5433_v9, %v611_v18 }
 0x4cf   :  { %v5435_v57 = vpop.eup %5434 }
 0x4d0   :  { %v707_v56 = vmul.f32 %v5435_v57, %v610_v25  ;;  %v4242_v25 = vld [vmem:[%s7062_s3 + $0xe1] ss:$0 sm:$0xff] }
 0x4d2   :  { %4893 = vmatprep.mubr.f32.mxu1 %v707_v56 }
 0x4d3   :  { %4894 = vmatmul.mubr.f32.vlgmr.msra.gmra.mxu1 %v708_v13 }
 0x593   :  { %v4895_v17 = vpop.f32.mrf.mxu1 }
 0x595   :  { %v775_v24 = vpop.f32.mrf.mxu1 }
 0x596   :  { %4904 = vmatprep.mubr.msk.f32.mxu0 %vm44_vm0, %v775_v24 }
 0x597   :  { %4905 = vmatmul.mubr.msk.f32.vlgmr.msra.gmra.mxu0 %vm44_vm0, %v4895_v17 }
 0x657   :  { %v4906_v13 = vpop.f32.mrf.mxu0 }
 0x658   :  { %v870_v18 = vadd.f32 %v4906_v13, %v4242_v25 }
 0x659   :  { %v864_v14 = vpop.f32.mrf.mxu0 }
 0x65a   :  { %v865_v10 = vadd.f32 %v4242_v25, %v864_v14  ;;  %v874_v53 = vadd.f32 %v870_v18, %v5667_v5  ;;  %v916_v18 = vld [vmem:[%s7062_s3 + $0x50] sm:$0xff]  ;;  %v915_v14 = vld [vmem:[%s7062_s3 + $0x48] sm:$0xff] }
 0x65c   :  { %v878_v30 = vsel %vm44_vm0, %v874_v53, 0.0  ;;  %v873_v9 = vadd.f32 %v865_v10, %v5654_v2  ;;  %v917_v2 = vld [vmem:[%s7062_s3 + $0x58] sm:$0xff] }
 0x65d   :  { %879 = vadd.xlane.f32.xlu0 %v878_v30  ;;  %4907 = vmatprep.subr.mxu1 %v917_v2  ;;  %v1028_v10 = vld [vmem:[%s7062_s3 + $0xd8] sm:$0xff]  ;;  %v1026_v30 = vld [vmem:[%s7062_s3 + $0xc8] sm:$0xff] }
 0x65e   :  { %v875_v57 = vsel %vm44_vm0, %v873_v9, 0.0  ;;  %4908 = vmatpush3.msra.mxu1 %v917_v2  ;;  %4918 = vmatprep.subr.mxu0 %v1028_v10  ;;  %v4246_v2 = vld [vmem:[%s7062_s3 + $0xe5] ss:$0 sm:$0xff] }
 0x65f   :  { %876 = vadd.xlane.f32.xlu1 %v875_v57  ;;  %4909 = vmatprep.subr.mxu1 %v916_v18 }
 0x660   :  { %4910 = vmatpush3.msra.mxu1 %v916_v18  ;;  %4919 = vmatpush3.msra.mxu0 %v1028_v10 }
 0x661   :  { %4911 = vmatprep.subr.mxu1 %v915_v14 }
 0x662   :  { %4912 = vmatpush3.msra.mxu1 %v915_v14 }
 0x6e6   :  { %v880_v56 = vpop.xlane.xlu0 %879 }
 0x6e7   :  { %v883_v58 = vmul.f32 0.03125, %v880_v56 }
 0x6e8   :  { %v877_v17 = vpop.xlane.xlu1 %876 }
 0x6e9   :  { %v882_v24 = vmul.f32 0.03125, %v877_v17  ;;  %v885_v16 = vsub.f32 %v874_v53, %v883_v58  ;;  %v1027_v53 = vld [vmem:[%s7062_s3 + $0xd0] sm:$0xff] }
 0x6ea   :  { %4920 = vmatprep.subr.mxu0 %v1027_v53 }
 0x6eb   :  { %v884_v15 = vsub.f32 %v873_v9, %v882_v24  ;;  %v887_v25 = vmul.f32 %v885_v16, %v885_v16  ;;  %4921 = vmatpush3.msra.mxu0 %v1027_v53 }
 0x6ec   :  { %4922 = vmatprep.subr.mxu0 %v1026_v30 }
 0x6ed   :  { %v886_v20 = vmul.f32 %v884_v15, %v884_v15  ;;  %v891_v5 = vsel %vm44_vm0, %v887_v25, 0.0  ;;  %4923 = vmatpush3.msra.mxu0 %v1026_v30  ;;  %v4245_v25 = vld [vmem:[%s7062_s3 + $0xe4] ss:$0 sm:$0xff] }
 0x6ef   :  { %v888_v13 = vsel %vm44_vm0, %v886_v20, 0.0  ;;  %v914_v20 = vld [vmem:[%s7062_s3 + $0x40] sm:$0xff] }
 0x6f0   :  { %889 = vadd.xlane.f32.xlu0 %v888_v13  ;;  %4913 = vmatprep.subr.mxu1 %v914_v20 }
 0x6f1   :  { %4914 = vmatpush3.msra.mxu1 %v914_v20 }
 0x6f4   :  { %892 = vadd.xlane.f32.xlu0 %v891_v5 }
 0x779   :  { %v890_v9 = vpop.xlane.xlu0 %889 }
 0x77a   :  { %v894_v57 = vmul.f32 0.03125, %v890_v9  ;;  %v1023_v9 = vld [vmem:[%s7062_s3 + $0xb0] sm:$0xff] }
 0x77c   :  { %v896_v56 = vadd.f32 1e-05, %v894_v57  ;;  %v1022_v57 = vld [vmem:[%s7062_s3 + $0xa8] sm:$0xff] }
 0x77d   :  { %v893_v58 = vpop.xlane.xlu0 %892 }
 0x77e   :  { %5436 = vrsqrt.f32 %v896_v56  ;;  %v895_v17 = vmul.f32 0.03125, %v893_v58  ;;  %v1021_v56 = vld [vmem:[%s7062_s3 + $0xa0] sm:$0xff]  ;;  %v1020_v58 = vld [vmem:[%s7062_s3 + $0x98] sm:$0xff] }
 0x780   :  { %v897_v24 = vadd.f32 1e-05, %v895_v17  ;;  %v1019_v17 = vld [vmem:[%s7062_s3 + $0x90] sm:$0xff] }
 0x782   :  { %5438 = vrsqrt.f32 %v897_v24  ;;  %v1018_v24 = vld [vmem:[%s7062_s3 + $0x88] sm:$0xff] }
 0x78b   :  { %v5437_v13 = vpop.eup %5436 }
 0x78c   :  { %v900_v5 = vmul.f32 %v5437_v13, %v884_v15  ;;  %v1025_v15 = vld [vmem:[%s7062_s3 + $0xc0] sm:$0xff] }
 0x78d   :  { %4924 = vmatprep.subr.mxu0 %v1025_v15  ;;  %v1017_v13 = vld [vmem:[%s7062_s3 + $0x80] sm:$0xff] }
 0x78e   :  { %v906_v18 = vmul.f32 %v4245_v25, %v900_v5  ;;  %4925 = vmatpush3.msra.mxu0 %v1025_v15  ;;  %v1015_v5 = vld [vmem:[%s7062_s3 + $0x70] sm:$0xff] }
 0x78f   :  { %v5439_v14 = vpop.eup %5438 }
 0x790   :  { %v901_v20 = vmul.f32 %v5439_v14, %v885_v16  ;;  %v6133_v10 = vadd.f32 %v4246_v2, %v906_v18  ;;  %v1024_v16 = vld [vmem:[%s7062_s3 + $0xb8] sm:$0xff]  ;;  %v1013_v18 = vld [vmem:[%s7062_s3 + $0x60] sm:$0xff] }
 0x791   :  { %4926 = vmatprep.subr.mxu0 %v1024_v16  ;;  %v4247_v14 = vld [vmem:[%s7062_s3 + $0xe2] ss:$0 sm:$0xff] }
 0x792   :  { %v907_v53 = vmul.f32 %v4245_v25, %v901_v20  ;;  %4915 = vmatprep.mubr.msk.f32.mxu1 %vm44_vm0, %v6133_v10  ;;  %4927 = vmatpush3.msra.mxu0 %v1024_v16  ;;  %v1016_v25 = vld [vmem:[%s7062_s3 + $0x78] sm:$0xff] }
 0x793   :  { %4928 = vmatprep.subr.mxu0 %v1023_v9 }
 0x794   :  { %v6137_v30 = vadd.f32 %v4246_v2, %v907_v53  ;;  %4929 = vmatpush3.msra.mxu0 %v1023_v9  ;;  %v1014_v2 = vld [vmem:[%s7062_s3 + $0x68] sm:$0xff] }
 0x795   :  { %4930 = vmatprep.subr.mxu0 %v1022_v57 }
 0x796   :  { %4916 = vmatmul.mubr.msk.f32.vlgmr.msra.gmra.mxu1 %vm44_vm0, %v6137_v30  ;;  %4931 = vmatpush3.msra.mxu0 %v1022_v57 }
 0x797   :  { %4932 = vmatprep.subr.mxu0 %v1021_v56 }
 0x798   :  { %4933 = vmatpush3.msra.mxu0 %v1021_v56 }
 0x799   :  { %4934 = vmatprep.subr.mxu0 %v1020_v58 }
 0x79a   :  { %4935 = vmatpush3.msra.mxu0 %v1020_v58 }
 0x79b   :  { %4936 = vmatprep.subr.mxu0 %v1019_v17 }
 0x79c   :  { %4937 = vmatpush3.msra.mxu0 %v1019_v17 }
 0x79d   :  { %4938 = vmatprep.subr.mxu0 %v1018_v24 }
 0x79e   :  { %4939 = vmatpush3.msra.mxu0 %v1018_v24 }
 0x79f   :  { %4940 = vmatprep.subr.mxu0 %v1017_v13 }
 0x7a0   :  { %4941 = vmatpush3.msra.mxu0 %v1017_v13 }
 0x7a1   :  { %4942 = vmatprep.subr.mxu0 %v1016_v25 }
 0x7a2   :  { %4943 = vmatpush3.msra.mxu0 %v1016_v25 }
 0x7a3   :  { %4944 = vmatprep.subr.mxu0 %v1015_v5 }
 0x7a4   :  { %4945 = vmatpush3.msra.mxu0 %v1015_v5 }
 0x7a5   :  { %4946 = vmatprep.subr.mxu0 %v1014_v2 }
 0x7a6   :  { %4947 = vmatpush3.msra.mxu0 %v1014_v2 }
 0x7a7   :  { %4948 = vmatprep.subr.mxu0 %v1013_v18 }
 0x7a8   :  { %4949 = vmatpush3.msra.mxu0 %v1013_v18 }
 0x856   :  { %v4917_v20 = vpop.f32.mrf.mxu1 }
 0x857   :  { %v1000_v53 = vadd.f32 %v4917_v20, %v4247_v14  ;;  %v4250_v20 = vld [vmem:[%s7062_s3 + $0xe3] ss:$0 sm:$0xff] }
 0x858   :  { %v994_v15 = vpop.f32.mrf.mxu1 }
 0x859   :  { %v1006_v16 = vmul.f32 0.70710677, %v1000_v53  ;;  %v995_v9 = vadd.f32 %v4247_v14, %v994_v15  ;;  %v1004_v25 = vmul.f32 0.5, %v1000_v53 }
 0x85b   :  { %5440 = verf.f32 %v1006_v16  ;;  %v1005_v57 = vmul.f32 0.70710677, %v995_v9  ;;  %v1003_v24 = vmul.f32 0.5, %v995_v9 }
 0x85d   :  { %5442 = verf.f32 %v1005_v57 }
 0x868   :  { %v5441_v56 = vpop.eup %5440 }
 0x869   :  { %v1010_v17 = vadd.f32 1.0, %v5441_v56 }
 0x86a   :  { %v5443_v58 = vpop.eup %5442 }
 0x86b   :  { %v1009_v13 = vadd.f32 1.0, %v5443_v58  ;;  %v1012_v2 = vmul.f32 %v1010_v17, %v1004_v25 }
 0x86d   :  { %v1011_v5 = vmul.f32 %v1009_v13, %v1003_v24 }
 0x86f   :  { %4950 = vmatprep.mubr.f32.mxu0 %v1011_v5 }
 0x870   :  { %4951 = vmatmul.mubr.f32.vlgmr.msra.gmra.mxu0 %v1012_v2 }
 0x930   :  { %v4952_v18 = vpop.f32.mrf.mxu0 }
 0x931   :  { %v1105_v14 = vadd.f32 %v4952_v18, %v4250_v20  ;;  %v4263_v18 = vld [vmem:[%s7062_s3 + $0xf8] sm:$0xff] }
 0x932   :  { %v1099_v19 = vpop.f32.mrf.mxu0 }
 0x933   :  { %v1100_v15 = vadd.f32 %v4250_v20, %v1099_v19  ;;  %v1109_v9 = vadd.f32 %v1105_v14, %v6137_v30  ;;  %v4264_v30 = vld [vmem:[%s7062_s3 + $0x100] sm:$0xff]  ;;  %v4262_v20 = vld [vmem:[%s7062_s3 + $0xf0] sm:$0xff]  ;;  %v4261_v14 = vld [vmem:[%s7062_s3 + $0xe8] sm:$0xff] }
 0x934   :  { %4953 = vmatprep.subr.mxu1 %v4264_v30 }
 0x935   :  { %v1108_v16 = vadd.f32 %v1100_v15, %v6133_v10  ;;  %v1113_v53 = vsel %vm44_vm0, %v1109_v9, 0.0  ;;  %4954 = vmatpush3.msra.mxu1 %v4264_v30 }
 0x936   :  { %4955 = vmatprep.subr.mxu1 %v4263_v18 }
 0x937   :  { %v1110_v57 = vsel %vm44_vm0, %v1108_v16, 0.0  ;;  %4956 = vmatpush3.msra.mxu1 %v4263_v18 }
 0x938   :  { %1111 = vadd.xlane.f32.xlu0 %v1110_v57  ;;  %4957 = vmatprep.subr.mxu1 %v4262_v20 }
 0x939   :  { %4958 = vmatpush3.msra.mxu1 %v4262_v20 }
 0x93a   :  { %4959 = vmatprep.subr.mxu1 %v4261_v14 }
 0x93b   :  { %4960 = vmatpush3.msra.mxu1 %v4261_v14 }
 0x93c   :  { %1114 = vadd.xlane.f32.xlu0 %v1113_v53  ;;  %4964 = vmatprep.subr.mxu1 %v5680_v11 }
 0x9c1   :  { %v1112_v56 = vpop.xlane.xlu0 %1111 }
 0x9c2   :  { %v1116_v58 = vmul.f32 0.03125, %v1112_v56 }
 0x9c4   :  { %v1118_v17 = vsub.f32 %v1108_v16, %v1116_v58 }
 0x9c5   :  { %v1115_v24 = vpop.xlane.xlu0 %1114 }
 0x9c6   :  { %v1117_v13 = vmul.f32 0.03125, %v1115_v24  ;;  %v1120_v25 = vmul.f32 %v1118_v17, %v1118_v17  ;;  %v4251_v24 = vld [vmem:[%s7062_s3 + $0xe6] ss:$0 sm:$0xff] }
 0x9c8   :  { %v1119_v5 = vsub.f32 %v1109_v9, %v1117_v13  ;;  %v1122_v2 = vsel %vm44_vm0, %v1120_v25, 0.0  ;;  %v4252_v25 = vld [vmem:[%s7062_s3 + $0xe7] ss:$0 sm:$0xff] }
 0x9c9   :  { %1123 = vadd.xlane.f32.xlu0 %v1122_v2 }
 0x9ca   :  { %v1121_v19 = vmul.f32 %v1119_v5, %v1119_v5 }
 0x9cc   :  { %v1125_v10 = vsel %vm44_vm0, %v1121_v19, 0.0 }
 0x9cd   :  { %1126 = vadd.xlane.f32.xlu0 %v1125_v10 }
 0xa52   :  { %v1124_v15 = vpop.xlane.xlu0 %1123 }
 0xa53   :  { %v1128_v16 = vmul.f32 0.03125, %v1124_v15 }
 0xa55   :  { %v1130_v57 = vadd.f32 1e-05, %v1128_v16 }
 0xa56   :  { %v1127_v9 = vpop.xlane.xlu0 %1126 }
 0xa57   :  { %5444 = vrsqrt.f32 %v1130_v57  ;;  %v1129_v53 = vmul.f32 0.03125, %v1127_v9 }
 0xa59   :  { %v1131_v56 = vadd.f32 1e-05, %v1129_v53 }
 0xa5b   :  { %5446 = vrsqrt.f32 %v1131_v56 }
 0xa64   :  { %v5445_v58 = vpop.eup %5444 }
 0xa65   :  { %v1134_v13 = vmul.f32 %v5445_v58, %v1118_v17  ;;  %v4265_v17 = vld [vmem:[%s7062_s3 + $0x1c8] ss:$0 sm:$0xff] }
 0xa67   :  { %v1140_v2 = vmul.f32 %v4251_v24, %v1134_v13 }
 0xa68   :  { %v5447_v19 = vpop.eup %5446 }
 0xa69   :  { %v1135_v10 = vmul.f32 %v5447_v19, %v1119_v5  ;;  %v6211_v30 = vadd.f32 %v4252_v25, %v1140_v2 }
 0xa6b   :  { %v1141_v18 = vmul.f32 %v4251_v24, %v1135_v10  ;;  %4961 = vmatprep.mubr.msk.f32.mxu1 %vm44_vm0, %v6211_v30 }
 0xa6d   :  { %v6215_v20 = vadd.f32 %v4252_v25, %v1141_v18 }
 0xa6f   :  { %4962 = vmatmul.mubr.msk.f32.vlgmr.msra.gmra.mxu1 %vm44_vm0, %v6215_v20 }
 0xa70   :  { %4965 = vmatpush3.msra.mxu1 %v5680_v11 }
 0xa71   :  { %4966 = vmatprep.subr.mxu1 %v5686_v12 }
 0xa72   :  { %4967 = vmatpush3.msra.mxu1 %v5686_v12 }
 0xb2f   :  { %v4963_v5 = vpop.f32.mrf.mxu1 }
 0xb30   :  { %v6225_v14 = vadd.f32 %v4963_v5, %v4265_v17  ;;  %v7102_v5 = vld [vmem:[#allocation9_spill] sm:$0xff] }
 0xb31   :  { %v1237_v15 = vpop.f32.mrf.mxu1 }
 0xb32   :  { %v1238_v16 = vadd.f32 %v4265_v17, %v1237_v15  ;;  %1250 = vrot.lane.b32.xlu1 %v6225_v14, %s5592_s11  ;;  %v7101_v17 = vld [vmem:[#allocation8_spill] sm:$0xff]  ;;  %v7104_v15 = vld [vmem:[#allocation11_spill] sm:$0xff] }
 0xb34   :  { %1248 = vrot.lane.b32.xlu0 %v1238_v16, %s5592_s11  ;;  %5010 = vmatprep.mubr.msk.f32.mxu0 %vm44_vm0, %v1238_v16 }
 0xb36   :  { %1389 = vrot.lane.b32.xlu1 %v6225_v14, %s5593_s0 }
 0xb3a   :  { %1387 = vrot.lane.b32.xlu1 %v1238_v16, %s5593_s0  ;;  %v7105_v16 = vld [vmem:[#allocation12_spill] sm:$0xff] }
 0xba4   :  { %v1251_v11 = vpop.permute.xlu1 %1250 }
 0xba6   :  { %v1249_v12 = vpop.permute.xlu0 %1248 }
 0xba7   :  { %1254 = vxpose.xlu0.b32.start [1/2] (short) (narrow) %v1249_v12, 32 }
 0xba8   :  { %v1390_v57 = vpop.permute.xlu1 %1389 }
 0xba9   :  { %4974 = vmatprep.subr.mxu1 %v1390_v57 }
 0xbab   :  { %1255 = vxpose.xlu0.b32.end [2/2] (short) (narrow) %v1251_v11, 32 }
 0xbac   :  { %v1388_v56 = vpop.permute.xlu1 %1387 }
 0xc23   :  { %v1270_v9 = vpop.trf.xlu0 }
 0xc24   :  { %4968 = vmatprep.mubr.msk.f32.mxu1 %vm168_vm1, %v1270_v9 }
 0xc27   :  { %v1271_v53 = vpop.trf.xlu0 }
 0xc28   :  { %4969 = vmatmul.mubr.msk.f32.vlgmr.msra.gmra.mxu1 %vm168_vm1, %v1271_v53 }
 0xc29   :  { %4975 = vmatpush3.msra.mxu1 %v1390_v57 }
 0xc2a   :  { %4976 = vmatprep.subr.mxu1 %v1388_v56 }
 0xc2b   :  { %4977 = vmatpush3.msra.mxu1 %v1388_v56  ;;  %v1272_v58 = vpop.trf.xlu0 }
 0xc2c   :  { %4971 = vmatprep.mubr.msk.f32.mxu1 %vm168_vm1, %v1272_v58  ;;  %5013 = vmatprep.subr.mxu1 %v5756_v38 }
 0xc2f   :  { %v1273_v24 = vpop.trf.xlu0 }
 0xc30   :  { %4972 = vmatmul.mubr.msk.f32.gmra.mxu1 %vm168_vm1, %v1273_v24 }
 0xc31   :  { %4978 = vmatprep.mubr.msk.f32.mxu1 %vm168_vm1, %v5725_v33 }
 0xc34   :  { %4979 = vmatmul.mubr.msk.f32.vlgmr.msra.gmra.mxu1 %vm168_vm1, %v5730_v34 }
 0xc35   :  { %4981 = vmatprep.mubr.msk.f32.mxu1 %vm168_vm1, %v5735_v35  ;;  %5014 = vmatpush3.msra.mxu1 %v5756_v38  ;;  %v7095_v38 = vld [vmem:[#allocation2_spill] sm:$0xff] }
 0xc36   :  { %5015 = vmatprep.subr.mxu1 %v5761_v39 }
 0xc37   :  { %5016 = vmatpush3.msra.mxu1 %v5761_v39 }
 0xc38   :  { %4982 = vmatmul.mubr.msk.f32.gmra.mxu1 %vm168_vm1, %v5746_v36  ;;  %5017 = vmatprep.subr.mxu1 %v5777_v41 }
 0xc39   :  { %4984 = vmatprep.mubr.msk.f32.mxu1 %vm168_vm1, %v5751_v37  ;;  %5018 = vmatpush3.msra.mxu1 %v5777_v41 }
 0xc3a   :  { %5019 = vmatprep.subr.mxu1 %v5789_v43 }
 0xc3b   :  { %5020 = vmatpush3.msra.mxu1 %v5789_v43 }
 0xc3c   :  { %4985 = vmatmul.mubr.msk.f32.gmra.mxu1 %vm168_vm1, %v5771_v40  ;;  %5021 = vmatprep.subr.mxu1 %v5883_v59  ;;  %v7096_v40 = vld [vmem:[#allocation3_spill] sm:$0xff] }
 0xc3d   :  { %4987 = vmatprep.mubr.msk.f32.mxu1 %vm168_vm1, %v5782_v42  ;;  %5022 = vmatpush3.msra.mxu1 %v5883_v59  ;;  %v7097_v42 = vld [vmem:[#allocation4_spill] sm:$0xff] }
 0xc3e   :  { %5023 = vmatprep.subr.mxu1 %v5890_v60 }
 0xc3f   :  { %5024 = vmatpush3.msra.mxu1 %v5890_v60 }
 0xc40   :  { %4988 = vmatmul.mubr.msk.f32.gmra.mxu1 %vm168_vm1, %v5799_v44  ;;  %5025 = vmatprep.subr.mxu1 %v5897_v61 }
 0xc41   :  { %4990 = vmatprep.mubr.msk.f32.mxu1 %vm168_vm1, %v5805_v45  ;;  %5026 = vmatpush3.msra.mxu1 %v5897_v61 }
 0xc42   :  { %5027 = vmatprep.subr.mxu1 %v5904_v62 }
 0xc43   :  { %5028 = vmatpush3.msra.mxu1 %v5904_v62 }
 0xc44   :  { %4991 = vmatmul.mubr.msk.f32.gmra.mxu1 %vm168_vm1, %v5816_v46  ;;  %5029 = vmatprep.subr.mxu1 %v5911_v63 }
 0xc45   :  { %4993 = vmatprep.mubr.msk.f32.mxu1 %vm168_vm1, %v5821_v47  ;;  %5030 = vmatpush3.msra.mxu1 %v5911_v63  ;;  %v7099_v47 = vld [vmem:[#allocation5_spill] sm:$0xff] }
 0xc46   :  { %5031 = vmatprep.subr.mxu1 %v5917_v0 }
 0xc47   :  { %5032 = vmatpush3.msra.mxu1 %v5917_v0 }
 0xc48   :  { %4994 = vmatmul.mubr.msk.f32.gmra.mxu1 %vm168_vm1, %v5830_v48  ;;  %5033 = vmatprep.subr.mxu1 %v5923_v1 }
 0xc49   :  { %4996 = vmatprep.mubr.msk.f32.mxu1 %vm168_vm1, %v5835_v49  ;;  %5034 = vmatpush3.msra.mxu1 %v5923_v1 }
 0xc4a   :  { %5035 = vmatprep.subr.mxu1 %v5930_v3 }
 0xc4b   :  { %5036 = vmatpush3.msra.mxu1 %v5930_v3 }
 0xc4c   :  { %4997 = vmatmul.mubr.msk.f32.gmra.mxu1 %vm168_vm1, %v5844_v50  ;;  %5037 = vmatprep.subr.mxu1 %v5937_v4 }
 0xc4d   :  { %4999 = vmatprep.mubr.msk.f32.mxu1 %vm168_vm1, %v5849_v51  ;;  %5038 = vmatpush3.msra.mxu1 %v5937_v4 }
 0xc4e   :  { %5039 = vmatprep.subr.mxu1 %v5944_v6 }
 0xc4f   :  { %5040 = vmatpush3.msra.mxu1 %v5944_v6 }
 0xc50   :  { %5000 = vmatmul.mubr.msk.f32.gmra.mxu1 %vm168_vm1, %v5858_v52  ;;  %5041 = vmatprep.subr.mxu1 %v5951_v7 }
 0xc51   :  { %5042 = vmatpush3.msra.mxu1 %v5951_v7 }
 0xc52   :  { %5043 = vmatprep.subr.mxu1 %v5959_v8 }
 0xc53   :  { %5044 = vmatpush3.msra.mxu1 %v5959_v8 }
 0xce8   :  { %v4970_v33 = vpop.f32.mrf.mxu1 }
 0xce9   :  { %v1384_v41 = vmul.f32 %v4970_v33, %v7096_v40 }
 0xcea   :  { %v1364_v34 = vpop.f32.mrf.mxu1 }
 0xceb   :  { %v1383_v43 = vmul.f32 %v1364_v34, %v7097_v42  ;;  %v7106_v34 = vld [vmem:[#allocation13_spill] sm:$0xff] }
 0xcf0   :  { %v4973_v35 = vpop.f32.mrf.mxu1 }
 0xcf1   :  { %v1386_v36 = vmul.f32 %v4973_v35, %v5700_v23  ;;  %v7098_v23 = vld [vmem:[#allocation6_spill] sm:$0xff] }
 0xcf2   :  { %v1374_v37 = vpop.f32.mrf.mxu1 }
 0xcf3   :  { %v1385_v39 = vmul.f32 %v1374_v37, %v7095_v38  ;;  %5002 = vmatprep.subr.mxu0 %v1386_v36  ;;  %v4293_v38 = vld [vmem:[%s7062_s3 + $0x120] sm:$0xff] }
 0xcf4   :  { %5003 = vmatpush3.msra.mxu0 %v1386_v36  ;;  %v4980_v49 = vpop.f32.mrf.mxu1  ;;  %v7107_v36 = vld [vmem:[#allocation14_spill] sm:$0xff]  ;;  %5083 = vmatprep.subr.mxu1 %v4293_v38 }
 0xcf5   :  { %5004 = vmatprep.subr.mxu0 %v1385_v39 }
 0xcf6   :  { %5005 = vmatpush3.msra.mxu0 %v1385_v39  ;;  %v1459_v50 = vpop.f32.mrf.mxu1  ;;  %v4292_v39 = vld [vmem:[%s7062_s3 + $0x118] sm:$0xff] }
 0xcf7   :  { %5006 = vmatprep.subr.mxu0 %v1384_v41  ;;  %v1538_v11 = vmul.f32 %v1459_v50, %v7105_v16 }
 0xcf8   :  { %5007 = vmatpush3.msra.mxu0 %v1384_v41  ;;  %v4983_v51 = vpop.f32.mrf.mxu1 }
 0xcf9   :  { %5008 = vmatprep.subr.mxu0 %v1383_v43 }
 0xcfa   :  { %5009 = vmatpush3.msra.mxu0 %v1383_v43  ;;  %v1469_v52 = vpop.f32.mrf.mxu1 }
 0xcfb   :  { %5011 = vmatmul.mubr.msk.f32.vlgmr.msra.gmra.mxu0 %vm44_vm0, %v6225_v14  ;;  %v7103_v14 = vld [vmem:[#allocation10_spill] sm:$0xff] }
 0xcfc   :  { %v4986_v59 = vpop.f32.mrf.mxu1 }
 0xcfe   :  { %v1479_v60 = vpop.f32.mrf.mxu1 }
 0xd00   :  { %v4989_v61 = vpop.f32.mrf.mxu1 }
 0xd02   :  { %v1489_v62 = vpop.f32.mrf.mxu1 }
 0xd04   :  { %v4992_v63 = vpop.f32.mrf.mxu1 }
 0xd06   :  { %v1499_v0 = vpop.f32.mrf.mxu1 }
 0xd08   :  { %v4995_v1 = vpop.f32.mrf.mxu1 }
 0xd09   :  { %v1549_v10 = vmul.f32 %v4995_v1, %v5996_v27  ;;  %v1544_v27 = vmul.f32 %v1489_v62, %v6026_v22  ;;  %v1539_v22 = vmul.f32 %v4980_v49, %v7104_v15 }
 0xd0a   :  { %v1509_v3 = vpop.f32.mrf.mxu1 }
 0xd0b   :  { %v1548_v18 = vmul.f32 %v1509_v3, %v6002_v31 }
 0xd0c   :  { %v4998_v4 = vpop.f32.mrf.mxu1 }
 0xd0d   :  { %v1551_v25 = vmul.f32 %v4998_v4, %v5978_v29  ;;  %v1546_v29 = vmul.f32 %v1499_v0, %v6014_v26  ;;  %v1541_v26 = vmul.f32 %v4983_v51, %v7102_v5 }
 0xd0e   :  { %v1519_v6 = vpop.f32.mrf.mxu1 }
 0xd0f   :  { %v1550_v19 = vmul.f32 %v1519_v6, %v5989_v55  ;;  %v7100_v55 = vld [vmem:[#allocation7_spill] sm:$0xff] }
 0xd10   :  { %v5001_v7 = vpop.f32.mrf.mxu1  ;;  %v1543_v31 = vmul.f32 %v4986_v59, %v7100_v55 }
 0xd11   :  { %v1553_v8 = vmul.f32 %v5001_v7, %v5973_v28  ;;  %v1547_v28 = vmul.f32 %v4992_v63, %v6008_v54  ;;  %v1542_v54 = vmul.f32 %v1479_v60, %v7101_v17 }
 0xd12   :  { %v1529_v13 = vpop.f32.mrf.mxu1 }
 0xd13   :  { %v1552_v2 = vmul.f32 %v1529_v13, %v5983_v32  ;;  %5048 = vmatprep.subr.mxu0 %v1553_v8  ;;  %v1545_v32 = vmul.f32 %v4989_v61, %v6020_v21  ;;  %v1540_v21 = vmul.f32 %v1469_v52, %v7103_v14  ;;  %v4294_v52 = vld [vmem:[%s7062_s3 + $0x1c9] ss:$0 sm:$0xff] }
 0xd14   :  { %5049 = vmatpush3.msra.mxu0 %v1553_v8 }
 0xd15   :  { %5050 = vmatprep.subr.mxu0 %v1552_v2 }
 0xd16   :  { %5051 = vmatpush3.msra.mxu0 %v1552_v2 }
 0xd17   :  { %5052 = vmatprep.subr.mxu0 %v1551_v25 }
 0xd18   :  { %5053 = vmatpush3.msra.mxu0 %v1551_v25 }
 0xd19   :  { %5054 = vmatprep.subr.mxu0 %v1550_v19 }
 0xd1a   :  { %5055 = vmatpush3.msra.mxu0 %v1550_v19 }
 0xd1b   :  { %5056 = vmatprep.subr.mxu0 %v1549_v10 }
 0xd1c   :  { %5057 = vmatpush3.msra.mxu0 %v1549_v10  ;;  %v4301_v10 = vld [vmem:[%s7062_s3 + $0x138] sm:$0xff] }
 0xd1d   :  { %5058 = vmatprep.subr.mxu0 %v1548_v18 }
 0xd1e   :  { %5059 = vmatpush3.msra.mxu0 %v1548_v18  ;;  %v4300_v18 = vld [vmem:[%s7062_s3 + $0x130] sm:$0xff] }
 0xd1f   :  { %5060 = vmatprep.subr.mxu0 %v1547_v28 }
 0xd20   :  { %5061 = vmatpush3.msra.mxu0 %v1547_v28  ;;  %v4299_v28 = vld [vmem:[%s7062_s3 + $0x128] sm:$0xff] }
 0xd21   :  { %5062 = vmatprep.subr.mxu0 %v1546_v29 }
 0xd22   :  { %5063 = vmatpush3.msra.mxu0 %v1546_v29  ;;  %v4321_v29 = vld [vmem:[%s7062_s3 + $0x1c0] sm:$0xff] }
 0xd23   :  { %5064 = vmatprep.subr.mxu0 %v1545_v32 }
 0xd24   :  { %5065 = vmatpush3.msra.mxu0 %v1545_v32 }
 0xd25   :  { %5066 = vmatprep.subr.mxu0 %v1544_v27 }
 0xd26   :  { %5067 = vmatpush3.msra.mxu0 %v1544_v27 }
 0xd27   :  { %5068 = vmatprep.subr.mxu0 %v1543_v31 }
 0xd28   :  { %5069 = vmatpush3.msra.mxu0 %v1543_v31 }
 0xd29   :  { %5070 = vmatprep.subr.mxu0 %v1542_v54 }
 0xd2a   :  { %5071 = vmatpush3.msra.mxu0 %v1542_v54 }
 0xd2b   :  { %5072 = vmatprep.subr.mxu0 %v1541_v26 }
 0xd2c   :  { %5073 = vmatpush3.msra.mxu0 %v1541_v26  ;;  %v4297_v26 = vld [vmem:[%s7062_s3 + $0x1cc] ss:$0 sm:$0xff] }
 0xd2d   :  { %5074 = vmatprep.subr.mxu0 %v1540_v21 }
 0xd2e   :  { %5075 = vmatpush3.msra.mxu0 %v1540_v21  ;;  %v4298_v21 = vld [vmem:[%s7062_s3 + $0x1cd] ss:$0 sm:$0xff] }
 0xd2f   :  { %5076 = vmatprep.subr.mxu0 %v1539_v22 }
 0xd30   :  { %5077 = vmatpush3.msra.mxu0 %v1539_v22 }
 0xd31   :  { %5078 = vmatprep.subr.mxu0 %v1538_v11 }
 0xd32   :  { %5079 = vmatpush3.msra.mxu0 %v1538_v11 }
 0xdbb   :  { %v5012_v44 = vpop.f32.mrf.mxu0 }
 0xdbc   :  { %v6309_v45 = vadd.f32 %v5012_v44, %v7098_v23 }
 0xdbd   :  { %v1624_v46 = vpop.f32.mrf.mxu0 }
 0xdbe   :  { %v6312_v48 = vadd.f32 %v1624_v46, %v7099_v47  ;;  %1635 = vmax.xlane.f32.xlu0 %v6309_v45  ;;  %v4291_v47 = vld [vmem:[%s7062_s3 + $0x110] sm:$0xff] }
 0xdc0   :  { %1633 = vmax.xlane.f32.xlu1 %v6312_v48 }
 0xe47   :  { %v1636_v12 = vpop.xlane.xlu0 %1635 }
 0xe48   :  { %v1638_v57 = vsub.f32 %v6309_v45, %v1636_v12 }
 0xe49   :  { %v1634_v9 = vpop.xlane.xlu1 %1633 }
 0xe4a   :  { %v1641_v53 = vmul.f32 1.442695, %v1638_v57  ;;  %v1637_v56 = vsub.f32 %v6312_v48, %v1634_v9  ;;  %v4290_v48 = vld [vmem:[%s7062_s3 + $0x108] sm:$0xff]  ;;  %v4320_v9 = vld [vmem:[%s7062_s3 + $0x1b8] sm:$0xff] }
 0xe4c   :  { %v1639_v58 = vmul.f32 1.442695, %v1637_v56  ;;  %5448 = vpow2.f32 %v1641_v53  ;;  %v4319_v53 = vld [vmem:[%s7062_s3 + $0x1b0] sm:$0xff]  ;;  %v4318_v56 = vld [vmem:[%s7062_s3 + $0x1a8] sm:$0xff] }
 0xe4e   :  { %5450 = vpow2.f32 %v1639_v58  ;;  %v4317_v58 = vld [vmem:[%s7062_s3 + $0x1a0] sm:$0xff] }
 0xe59   :  { %v5449_v24 = vpop.eup %5448 }
 0xe5a   :  { %v1644_v37 = vmul.f32 %v5449_v24, %v7107_v36  ;;  %v4316_v24 = vld [vmem:[%s7062_s3 + $0x198] sm:$0xff] }
 0xe5b   :  { %v5451_v33 = vpop.eup %5450  ;;  %v4312_v36 = vld [vmem:[%s7062_s3 + $0x178] sm:$0xff] }
 0xe5c   :  { %v1643_v35 = vmul.f32 %v5451_v33, %v7106_v34  ;;  %v4315_v33 = vld [vmem:[%s7062_s3 + $0x190] sm:$0xff]  ;;  %v4314_v34 = vld [vmem:[%s7062_s3 + $0x188] sm:$0xff] }
 0xe5e   :  { %5045 = vmatprep.mubr.f32.mxu1 %v1643_v35 }
 0xe5f   :  { %5046 = vmatmul.mubr.f32.vlgmr.msra.gmra.mxu1 %v1644_v37 }
 0xe60   :  { %5084 = vmatpush3.msra.mxu1 %v4293_v38  ;;  %v4310_v38 = vld [vmem:[%s7062_s3 + $0x168] sm:$0xff] }
 0xe61   :  { %5085 = vmatprep.subr.mxu1 %v4292_v39 }
 0xe62   :  { %5086 = vmatpush3.msra.mxu1 %v4292_v39  ;;  %v4309_v39 = vld [vmem:[%s7062_s3 + $0x160] sm:$0xff] }
 0xe63   :  { %5087 = vmatprep.subr.mxu1 %v4291_v47 }
 0xe64   :  { %5088 = vmatpush3.msra.mxu1 %v4291_v47 }
 0xe65   :  { %5089 = vmatprep.subr.mxu1 %v4290_v48 }
 0xe66   :  { %5090 = vmatpush3.msra.mxu1 %v4290_v48 }
 0xf1f   :  { %v5047_v40 = vpop.f32.mrf.mxu1 }
 0xf20   :  { %v1721_v41 = vmax.f32 %v5047_v40, 1e-20  ;;  %v4308_v40 = vld [vmem:[%s7062_s3 + $0x158] sm:$0xff] }
 0xf21   :  { %v1711_v42 = vpop.f32.mrf.mxu1 }
 0xf22   :  { %v1720_v43 = vmax.f32 %v1711_v42, 1e-20  ;;  %5452 = vrcp.f32 %v1721_v41  ;;  %v4307_v41 = vld [vmem:[%s7062_s3 + $0x150] sm:$0xff]  ;;  %v4306_v42 = vld [vmem:[%s7062_s3 + $0x148] sm:$0xff] }
 0xf24   :  { %5454 = vrcp.f32 %v1720_v43  ;;  %v4303_v43 = vld [vmem:[%s7062_s3 + $0x1ca] ss:$0 sm:$0xff] }
 0xf2f   :  { %v5453_v44 = vpop.eup %5452 }
 0xf30   :  { %v1725_v46 = vmul.f32 %v5453_v44, %v1644_v37  ;;  %v4311_v37 = vld [vmem:[%s7062_s3 + $0x170] sm:$0xff] }
 0xf31   :  { %v5455_v23 = vpop.eup %5454 }
 0xf32   :  { %v1724_v45 = vmul.f32 %v5455_v23, %v1643_v35  ;;  %v4313_v35 = vld [vmem:[%s7062_s3 + $0x180] sm:$0xff] }
 0xf34   :  { %5080 = vmatprep.mubr.f32.mxu0 %v1724_v45 }
 0xf35   :  { %5081 = vmatmul.mubr.f32.vlgmr.msra.gmra.mxu0 %v1725_v46 }
 0xff5   :  { %v5082_v49 = vpop.f32.mrf.mxu0 }
 0xff7   :  { %v1792_v50 = vpop.f32.mrf.mxu0 }
 0xff8   :  { %5091 = vmatprep.mubr.msk.f32.mxu1 %vm44_vm0, %v1792_v50 }
 0xff9   :  { %5092 = vmatmul.mubr.msk.f32.vlgmr.msra.gmra.mxu1 %vm44_vm0, %v5082_v49 }
0x10b9   :  { %v5093_v51 = vpop.f32.mrf.mxu1 }
0x10ba   :  { %v1887_v60 = vadd.f32 %v5093_v51, %v4294_v52 }
0x10bb   :  { %v1881_v59 = vpop.f32.mrf.mxu1 }
0x10bc   :  { %v1882_v61 = vadd.f32 %v4294_v52, %v1881_v59  ;;  %v1891_v0 = vadd.f32 %v1887_v60, %v6215_v20  ;;  %v4302_v20 = vld [vmem:[%s7062_s3 + $0x140] sm:$0xff] }
0x10bd   :  { %5094 = vmatprep.subr.mxu1 %v4302_v20 }
0x10be   :  { %v1890_v62 = vadd.f32 %v1882_v61, %v6211_v30  ;;  %v1895_v1 = vsel %vm44_vm0, %v1891_v0, 0.0  ;;  %5095 = vmatpush3.msra.mxu1 %v4302_v20 }
0x10bf   :  { %5096 = vmatprep.subr.mxu1 %v4301_v10 }
0x10c0   :  { %v1892_v63 = vsel %vm44_vm0, %v1890_v62, 0.0  ;;  %5097 = vmatpush3.msra.mxu1 %v4301_v10 }
0x10c1   :  { %1893 = vadd.xlane.f32.xlu1 %v1892_v63  ;;  %5098 = vmatprep.subr.mxu1 %v4300_v18 }
0x10c2   :  { %5099 = vmatpush3.msra.mxu1 %v4300_v18 }
0x10c3   :  { %5100 = vmatprep.subr.mxu1 %v4299_v28 }
0x10c4   :  { %5101 = vmatpush3.msra.mxu1 %v4299_v28 }
0x10c5   :  { %1896 = vadd.xlane.f32.xlu1 %v1895_v1  ;;  %5105 = vmatprep.subr.mxu1 %v4321_v29 }
0x114a   :  { %v1894_v3 = vpop.xlane.xlu1 %1893 }
0x114b   :  { %v1898_v4 = vmul.f32 0.03125, %v1894_v3 }
0x114d   :  { %v1900_v6 = vsub.f32 %v1890_v62, %v1898_v4 }
0x114e   :  { %v1897_v7 = vpop.xlane.xlu1 %1896 }
0x114f   :  { %v1899_v8 = vmul.f32 0.03125, %v1897_v7  ;;  %v1902_v13 = vmul.f32 %v1900_v6, %v1900_v6 }
0x1151   :  { %v1901_v25 = vsub.f32 %v1891_v0, %v1899_v8  ;;  %v1904_v2 = vsel %vm44_vm0, %v1902_v13, 0.0  ;;  %v4322_v0 = vld [vmem:[%s7062_s3 + $0x1cb] ss:$0 sm:$0xff] }
0x1152   :  { %1905 = vadd.xlane.f32.xlu1 %v1904_v2 }
0x1153   :  { %v1903_v19 = vmul.f32 %v1901_v25, %v1901_v25 }
0x1155   :  { %v1907_v30 = vsel %vm44_vm0, %v1903_v19, 0.0 }
0x1156   :  { %1908 = vadd.xlane.f32.xlu1 %v1907_v30 }
0x11db   :  { %v1906_v32 = vpop.xlane.xlu1 %1905 }
0x11dc   :  { %v1910_v27 = vmul.f32 0.03125, %v1906_v32 }
0x11de   :  { %v1912_v55 = vadd.f32 1e-05, %v1910_v27  ;;  %v4336_v27 = vld [vmem:[%s7062_s3 + $0x1e8] sm:$0xff] }
0x11df   :  { %v1909_v31 = vpop.xlane.xlu1 %1908  ;;  %5140 = vmatprep.subr.mxu0 %v4336_v27 }
0x11e0   :  { %5456 = vrsqrt.f32 %v1912_v55  ;;  %v1911_v17 = vmul.f32 0.03125, %v1909_v31  ;;  %v4335_v55 = vld [vmem:[%s7062_s3 + $0x1e0] sm:$0xff]  ;;  %5141 = vmatpush3.msra.mxu0 %v4336_v27  ;;  %v4334_v31 = vld [vmem:[%s7062_s3 + $0x1d8] sm:$0xff]  ;;  %v5565_v27 = vld [vmem:[%s7064_s2 + $0x128] sm:$0xff] }
0x11e1   :  { %5142 = vmatprep.subr.mxu0 %v4335_v55 }
0x11e2   :  { %v1913_v54 = vadd.f32 1e-05, %v1911_v17  ;;  %5143 = vmatpush3.msra.mxu0 %v4335_v55  ;;  %v4333_v17 = vld [vmem:[%s7062_s3 + $0x1d0] sm:$0xff]  ;;  %v5566_v55 = vld [vmem:[%s7064_s2 + $0x38] sm:$0xff] }
0x11e3   :  { %5144 = vmatprep.subr.mxu0 %v4334_v31 }
0x11e4   :  { %5458 = vrsqrt.f32 %v1913_v54  ;;  %5145 = vmatpush3.msra.mxu0 %v4334_v31  ;;  %v5534_v54 = vld [vmem:[%s7064_s2 + $0x8] sm:$0xff]  ;;  %v5567_v31 = vld [vmem:[%s7064_s2 + $0x30] sm:$0xff] }
0x11e5   :  { %5146 = vmatprep.subr.mxu0 %v4333_v17 }
0x11e6   :  { %5147 = vmatpush3.msra.mxu0 %v4333_v17 }
0x11e7   :  { %5151 = vmatprep.subr.mxu0 %v5534_v54 }
0x11ed   :  { %v5457_v5 = vpop.eup %5456 }
0x11ee   :  { %v1916_v14 = vmul.f32 %v5457_v5, %v1900_v6 }
0x11f0   :  { %v1922_v15 = vmul.f32 %v4297_v26, %v1916_v14 }
0x11f1   :  { %v5459_v22 = vpop.eup %5458 }
0x11f2   :  { %v1917_v16 = vmul.f32 %v5459_v22, %v1901_v25  ;;  %v6380_v11 = vadd.f32 %v4298_v21, %v1922_v15 }
0x11f4   :  { %v1923_v12 = vmul.f32 %v4297_v26, %v1917_v16  ;;  %5102 = vmatprep.mubr.msk.f32.mxu1 %vm44_vm0, %v6380_v11 }
0x11f6   :  { %v6384_v57 = vadd.f32 %v4298_v21, %v1923_v12 }
0x11f8   :  { %5103 = vmatmul.mubr.msk.f32.vlgmr.msra.gmra.mxu1 %vm44_vm0, %v6384_v57 }
0x11f9   :  { %5106 = vmatpush3.msra.mxu1 %v4321_v29 }
0x11fa   :  { %5107 = vmatprep.subr.mxu1 %v4320_v9 }
0x11fb   :  { %5108 = vmatpush3.msra.mxu1 %v4320_v9 }
0x11fc   :  { %5109 = vmatprep.subr.mxu1 %v4319_v53 }
0x11fd   :  { %5110 = vmatpush3.msra.mxu1 %v4319_v53 }
0x11fe   :  { %5111 = vmatprep.subr.mxu1 %v4318_v56 }
0x11ff   :  { %5112 = vmatpush3.msra.mxu1 %v4318_v56 }
0x1200   :  { %5113 = vmatprep.subr.mxu1 %v4317_v58 }
0x1201   :  { %5114 = vmatpush3.msra.mxu1 %v4317_v58 }
0x1202   :  { %5115 = vmatprep.subr.mxu1 %v4316_v24 }
0x1203   :  { %5116 = vmatpush3.msra.mxu1 %v4316_v24 }
0x1204   :  { %5117 = vmatprep.subr.mxu1 %v4315_v33 }
0x1205   :  { %5118 = vmatpush3.msra.mxu1 %v4315_v33 }
0x1206   :  { %5119 = vmatprep.subr.mxu1 %v4314_v34 }
0x1207   :  { %5120 = vmatpush3.msra.mxu1 %v4314_v34  ;;  %v5535_v34 = vld [vmem:[%s7064_s2] sm:$0xff] }
0x1208   :  { %5121 = vmatprep.subr.mxu1 %v4313_v35 }
0x1209   :  { %5122 = vmatpush3.msra.mxu1 %v4313_v35  ;;  %v4337_v35 = vld [vmem:[%s7062_s3 + $0x2b0] ss:$0 sm:$0xff] }
0x120a   :  { %5123 = vmatprep.subr.mxu1 %v4312_v36 }
0x120b   :  { %5124 = vmatpush3.msra.mxu1 %v4312_v36 }
0x120c   :  { %5125 = vmatprep.subr.mxu1 %v4311_v37 }
0x120d   :  { %5126 = vmatpush3.msra.mxu1 %v4311_v37 }
0x120e   :  { %5127 = vmatprep.subr.mxu1 %v4310_v38 }
0x120f   :  { %5128 = vmatpush3.msra.mxu1 %v4310_v38 }
0x1210   :  { %5129 = vmatprep.subr.mxu1 %v4309_v39 }
0x1211   :  { %5130 = vmatpush3.msra.mxu1 %v4309_v39 }
0x1212   :  { %5131 = vmatprep.subr.mxu1 %v4308_v40 }
0x1213   :  { %5132 = vmatpush3.msra.mxu1 %v4308_v40 }
0x1214   :  { %5133 = vmatprep.subr.mxu1 %v4307_v41 }
0x1215   :  { %5134 = vmatpush3.msra.mxu1 %v4307_v41 }
0x1216   :  { %5135 = vmatprep.subr.mxu1 %v4306_v42 }
0x1217   :  { %5136 = vmatpush3.msra.mxu1 %v4306_v42 }
0x12b8   :  { %v5104_v44 = vpop.f32.mrf.mxu1 }
0x12b9   :  { %v2016_v23 = vadd.f32 %v5104_v44, %v4303_v43 }
0x12ba   :  { %v2010_v45 = vpop.f32.mrf.mxu1 }
0x12bb   :  { %v2022_v46 = vmul.f32 0.70710677, %v2016_v23  ;;  %v2011_v47 = vadd.f32 %v4303_v43, %v2010_v45  ;;  %v2020_v60 = vmul.f32 0.5, %v2016_v23 }
0x12bd   :  { %5460 = verf.f32 %v2022_v46  ;;  %v2021_v48 = vmul.f32 0.70710677, %v2011_v47  ;;  %v2019_v52 = vmul.f32 0.5, %v2011_v47  ;;  %v5536_v46 = vld [vmem:[%s7064_s2 + $0xa8] sm:$0xff] }
0x12bf   :  { %5462 = verf.f32 %v2021_v48  ;;  %v5537_v48 = vld [vmem:[%s7064_s2 + $0xb0] sm:$0xff] }
0x12ca   :  { %v5461_v49 = vpop.eup %5460 }
0x12cb   :  { %v2026_v51 = vadd.f32 1.0, %v5461_v49  ;;  %v5538_v49 = vld [vmem:[%s7064_s2 + $0xb8] sm:$0xff] }
0x12cc   :  { %v5463_v50 = vpop.eup %5462 }
0x12cd   :  { %v2025_v59 = vadd.f32 1.0, %v5463_v50  ;;  %v2028_v62 = vmul.f32 %v2026_v51, %v2020_v60  ;;  %v5539_v50 = vld [vmem:[%s7064_s2 + $0xc0] sm:$0xff]  ;;  %v5543_v60 = vld [vmem:[%s7064_s2 + $0xd0] sm:$0xff] }
0x12ce   :  { %v5540_v51 = vld [vmem:[%s7064_s2 + $0xa0] sm:$0xff] }
0x12cf   :  { %v2027_v61 = vmul.f32 %v2025_v59, %v2019_v52  ;;  %v5541_v52 = vld [vmem:[%s7064_s2 + $0xc8] sm:$0xff]  ;;  %v5542_v59 = vld [vmem:[%s7064_s2 + $0x98] sm:$0xff] }
0x12d1   :  { %5137 = vmatprep.mubr.f32.mxu1 %v2027_v61  ;;  %v5544_v61 = vld [vmem:[%s7064_s2 + $0x90] sm:$0xff] }
0x12d2   :  { %5138 = vmatmul.mubr.f32.vlgmr.msra.gmra.mxu1 %v2028_v62  ;;  %v5545_v62 = vld [vmem:[%s7064_s2 + $0xd8] sm:$0xff] }
0x1392   :  { %v5139_v63 = vpop.f32.mrf.mxu1 }
0x1393   :  { %v2121_v3 = vadd.f32 %v5139_v63, %v4322_v0  ;;  %v5546_v63 = vld [vmem:[%s7064_s2 + $0x88] sm:$0xff] }
0x1394   :  { %v2115_v1 = vpop.f32.mrf.mxu1 }
0x1395   :  { %v2116_v4 = vadd.f32 %v4322_v0, %v2115_v1  ;;  %v2125_v8 = vadd.f32 %v2121_v3, %v6384_v57  ;;  %v4324_v57 = vld [vmem:[%s7062_s3 + $0x1cf] ss:$0 sm:$0xff]  ;;  %v5547_v0 = vld [vmem:[%s7064_s2 + $0xe0] sm:$0xff] }
0x1396   :  { %v5548_v1 = vld [vmem:[%s7064_s2 + $0x80] sm:$0xff]  ;;  %v5549_v3 = vld [vmem:[%s7064_s2 + $0xe8] sm:$0xff] }
0x1397   :  { %v2124_v6 = vadd.f32 %v2116_v4, %v6380_v11  ;;  %v2129_v13 = vsel %vm44_vm0, %v2125_v8, 0.0  ;;  %v4323_v11 = vld [vmem:[%s7062_s3 + $0x1ce] ss:$0 sm:$0xff]  ;;  %v5550_v4 = vld [vmem:[%s7064_s2 + $0x78] sm:$0xff] }
0x1399   :  { %v2126_v7 = vsel %vm44_vm0, %v2124_v6, 0.0 }
0x139a   :  { %2127 = vadd.xlane.f32.xlu1 %v2126_v7  ;;  %v5552_v7 = vld [vmem:[%s7064_s2 + $0x70] sm:$0xff] }
0x139e   :  { %2130 = vadd.xlane.f32.xlu1 %v2129_v13  ;;  %v5554_v13 = vld [vmem:[%s7064_s2 + $0x68] sm:$0xff] }
0x1423   :  { %v2128_v25 = vpop.xlane.xlu1 %2127 }
0x1424   :  { %v2132_v2 = vmul.f32 0.03125, %v2128_v25  ;;  %v5555_v25 = vld [vmem:[%s7064_s2 + $0x100] sm:$0xff] }
0x1426   :  { %v2134_v19 = vsub.f32 %v2124_v6, %v2132_v2  ;;  %v5551_v6 = vld [vmem:[%s7064_s2 + $0xf0] sm:$0xff]  ;;  %v5556_v2 = vld [vmem:[%s7064_s2 + $0x60] sm:$0xff] }
0x1427   :  { %v2131_v30 = vpop.xlane.xlu1 %2130 }
0x1428   :  { %v2133_v20 = vmul.f32 0.03125, %v2131_v30  ;;  %v2136_v10 = vmul.f32 %v2134_v19, %v2134_v19  ;;  %v5558_v30 = vld [vmem:[%s7064_s2 + $0x58] sm:$0xff] }
0x142a   :  { %v2135_v18 = vsub.f32 %v2125_v8, %v2133_v20  ;;  %v2138_v28 = vsel %vm44_vm0, %v2136_v10, 0.0  ;;  %v5553_v8 = vld [vmem:[%s7064_s2 + $0xf8] sm:$0xff]  ;;  %v5559_v20 = vld [vmem:[%s7064_s2 + $0x110] sm:$0xff] }
0x142b   :  { %2139 = vadd.xlane.f32.xlu1 %v2138_v28  ;;  %v5560_v10 = vld [vmem:[%s7064_s2 + $0x50] sm:$0xff]  ;;  %v5562_v28 = vld [vmem:[%s7064_s2 + $0x48] sm:$0xff] }
0x142c   :  { %v2137_v29 = vmul.f32 %v2135_v18, %v2135_v18 }
0x142e   :  { %v2141_v32 = vsel %vm44_vm0, %v2137_v29, 0.0  ;;  %v5563_v29 = vld [vmem:[%s7064_s2 + $0x120] sm:$0xff] }
0x142f   :  { %2142 = vadd.xlane.f32.xlu1 %v2141_v32  ;;  %v5564_v32 = vld [vmem:[%s7064_s2 + $0x40] sm:$0xff] }
0x14b4   :  { %v2140_v5 = vpop.xlane.xlu1 %2139 }
0x14b5   :  { %v2144_v26 = vmul.f32 0.03125, %v2140_v5 }
0x14b7   :  { %v2146_v14 = vadd.f32 1e-05, %v2144_v26  ;;  %v5568_v26 = vld [vmem:[%s7064_s2 + $0x28] sm:$0xff] }
0x14b8   :  { %v2143_v21 = vpop.xlane.xlu1 %2142 }
0x14b9   :  { %5464 = vrsqrt.f32 %v2146_v14  ;;  %v2145_v15 = vmul.f32 0.03125, %v2143_v21 }
0x14bb   :  { %v2147_v22 = vadd.f32 1e-05, %v2145_v15  ;;  %v5569_v15 = vld [vmem:[%s7064_s2 + $0x20] sm:$0xff] }
0x14bd   :  { %5466 = vrsqrt.f32 %v2147_v22 }
0x14c6   :  { %v5465_v16 = vpop.eup %5464 }
0x14c7   :  { %v2150_v12 = vmul.f32 %v5465_v16, %v2134_v19  ;;  %v5557_v19 = vld [vmem:[%s7064_s2 + $0x108] sm:$0xff]  ;;  %v5570_v16 = vld [vmem:[%s7064_s2 + $0x18] sm:$0xff] }
0x14c9   :  { %v2156_v9 = vmul.f32 %v4323_v11, %v2150_v12  ;;  %v5571_v12 = vld [vmem:[%s7064_s2 + $0x10] sm:$0xff] }
0x14ca   :  { %v5467_v53 = vpop.eup %5466 }
0x14cb   :  { %v2151_v56 = vmul.f32 %v5467_v53, %v2135_v18  ;;  %v6466_v58 = vadd.f32 %v4324_v57, %v2156_v9  ;;  %v5561_v18 = vld [vmem:[%s7064_s2 + $0x118] sm:$0xff] }
0x14cc   :  { %v5572_v53 = vld [vmem:[%s7065_s1 + $0x18] sm:$0xff] }
0x14cd   :  { %v2157_v24 = vmul.f32 %v4323_v11, %v2151_v56  ;;  %5148 = vmatprep.mubr.msk.f32.mxu0 %vm44_vm0, %v6466_v58 }
0x14cf   :  { %v6470_v33 = vadd.f32 %v4324_v57, %v2157_v24 }
0x14d1   :  { %5149 = vmatmul.mubr.msk.f32.vlgmr.msra.gmra.mxu0 %vm44_vm0, %v6470_v33 }
0x14d2   :  { %5152 = vmatpush3.msra.mxu0 %v5534_v54 }
0x14d3   :  { %5153 = vmatprep.subr.mxu0 %v5535_v34 }
0x14d4   :  { %5154 = vmatpush3.msra.mxu0 %v5535_v34  ;;  %v5573_v34 = vld [vmem:[%s7065_s1 + $0x10] sm:$0xff] }
0x1591   :  { %v5150_v36 = vpop.f32.mrf.mxu0 }
0x1592   :  { %v6480_v37 = vadd.f32 %v5150_v36, %v4337_v35 }
0x1593   :  { %v2253_v38 = vpop.f32.mrf.mxu0 }
0x1594   :  { %v2254_v39 = vadd.f32 %v4337_v35, %v2253_v38  ;;  %2266 = vrot.lane.b32.xlu0 %v6480_v37, %s5592_s11 }
0x1596   :  { %2264 = vrot.lane.b32.xlu1 %v2254_v39, %s5592_s11  ;;  %5197 = vmatprep.mubr.msk.f32.mxu1 %vm44_vm0, %v2254_v39 }
0x1598   :  { %2405 = vrot.lane.b32.xlu0 %v6480_v37, %s5593_s0 }
0x159c   :  { %2403 = vrot.lane.b32.xlu0 %v2254_v39, %s5593_s0  ;;  %s5604_s0 = smov 6  }
0x1606   :  { %v2267_v40 = vpop.permute.xlu0 %2266 }
0x1608   :  { %v2265_v41 = vpop.permute.xlu1 %2264 }
0x1609   :  { %2270 = vxpose.xlu1.b32.start [1/2] (short) (narrow) %v2265_v41, 32 }
0x160a   :  { %v2406_v42 = vpop.permute.xlu0 %2405 }
0x160b   :  { %5161 = vmatprep.subr.mxu0 %v2406_v42 }
0x160d   :  { %2271 = vxpose.xlu1.b32.end [2/2] (short) (narrow) %v2267_v40, 32 }
0x160e   :  { %v2404_v23 = vpop.permute.xlu0 %2403 }
0x1685   :  { %v2286_v43 = vpop.trf.xlu1 }
0x1686   :  { %5155 = vmatprep.mubr.msk.f32.mxu0 %vm168_vm1, %v2286_v43 }
0x1689   :  { %v2287_v44 = vpop.trf.xlu1 }
0x168a   :  { %5156 = vmatmul.mubr.msk.f32.vlgmr.msra.gmra.mxu0 %vm168_vm1, %v2287_v44 }
0x168b   :  { %5162 = vmatpush3.msra.mxu0 %v2406_v42 }
0x168c   :  { %5163 = vmatprep.subr.mxu0 %v2404_v23 }
0x168d   :  { %5164 = vmatpush3.msra.mxu0 %v2404_v23  ;;  %v2288_v45 = vpop.trf.xlu1 }
0x168e   :  { %5158 = vmatprep.mubr.msk.f32.mxu0 %vm168_vm1, %v2288_v45  ;;  %5200 = vmatprep.subr.mxu0 %v5536_v46 }
0x1691   :  { %v2289_v47 = vpop.trf.xlu1 }
0x1692   :  { %5159 = vmatmul.mubr.msk.f32.gmra.mxu0 %vm168_vm1, %v2289_v47 }
0x1693   :  { %5165 = vmatprep.mubr.msk.f32.mxu0 %vm168_vm1, %v5537_v48 }
0x1696   :  { %5166 = vmatmul.mubr.msk.f32.vlgmr.msra.gmra.mxu0 %vm168_vm1, %v5538_v49 }
0x1697   :  { %5168 = vmatprep.mubr.msk.f32.mxu0 %vm168_vm1, %v5539_v50  ;;  %5201 = vmatpush3.msra.mxu0 %v5536_v46  ;;  %v5574_v50 = vld [vmem:[%s7064_s2 + $0x1a8] sm:$0xff] }
0x1698   :  { %5202 = vmatprep.subr.mxu0 %v5540_v51 }
0x1699   :  { %5203 = vmatpush3.msra.mxu0 %v5540_v51 }
0x169a   :  { %5169 = vmatmul.mubr.msk.f32.gmra.mxu0 %vm168_vm1, %v5541_v52  ;;  %5204 = vmatprep.subr.mxu0 %v5542_v59 }
0x169b   :  { %5171 = vmatprep.mubr.msk.f32.mxu0 %vm168_vm1, %v5543_v60  ;;  %5205 = vmatpush3.msra.mxu0 %v5542_v59  ;;  %v5575_v59 = vld [vmem:[%s7064_s2 + $0x198] sm:$0xff] }
0x169c   :  { %5206 = vmatprep.subr.mxu0 %v5544_v61 }
0x169d   :  { %5207 = vmatpush3.msra.mxu0 %v5544_v61  ;;  %v5576_v61 = vld [vmem:[%s7064_s2 + $0x1a0] sm:$0xff] }
0x169e   :  { %5172 = vmatmul.mubr.msk.f32.gmra.mxu0 %vm168_vm1, %v5545_v62  ;;  %5208 = vmatprep.subr.mxu0 %v5546_v63 }
0x169f   :  { %5174 = vmatprep.mubr.msk.f32.mxu0 %vm168_vm1, %v5547_v0  ;;  %5209 = vmatpush3.msra.mxu0 %v5546_v63  ;;  %v5577_v63 = vld [vmem:[%s7064_s2 + $0x190] sm:$0xff] }
0x16a0   :  { %5210 = vmatprep.subr.mxu0 %v5548_v1 }
0x16a1   :  { %5211 = vmatpush3.msra.mxu0 %v5548_v1  ;;  %v5578_v1 = vld [vmem:[%s7064_s2 + $0x188] sm:$0xff] }
0x16a2   :  { %5175 = vmatmul.mubr.msk.f32.gmra.mxu0 %vm168_vm1, %v5549_v3  ;;  %5212 = vmatprep.subr.mxu0 %v5550_v4 }
0x16a3   :  { %5177 = vmatprep.mubr.msk.f32.mxu0 %vm168_vm1, %v5551_v6  ;;  %5213 = vmatpush3.msra.mxu0 %v5550_v4  ;;  %v5579_v4 = vld [vmem:[%s7064_s2 + $0x180] sm:$0xff] }
0x16a4   :  { %5214 = vmatprep.subr.mxu0 %v5552_v7 }
0x16a5   :  { %5215 = vmatpush3.msra.mxu0 %v5552_v7  ;;  %v5580_v7 = vld [vmem:[%s7064_s2 + $0x178] sm:$0xff] }
0x16a6   :  { %5178 = vmatmul.mubr.msk.f32.gmra.mxu0 %vm168_vm1, %v5553_v8  ;;  %5216 = vmatprep.subr.mxu0 %v5554_v13 }
0x16a7   :  { %5180 = vmatprep.mubr.msk.f32.mxu0 %vm168_vm1, %v5555_v25  ;;  %5217 = vmatpush3.msra.mxu0 %v5554_v13  ;;  %v5581_v13 = vld [vmem:[%s7064_s2 + $0x170] sm:$0xff] }
0x16a8   :  { %5218 = vmatprep.subr.mxu0 %v5556_v2 }
0x16a9   :  { %5219 = vmatpush3.msra.mxu0 %v5556_v2  ;;  %v5582_v2 = vld [vmem:[%s7064_s2 + $0x168] sm:$0xff] }
0x16aa   :  { %5181 = vmatmul.mubr.msk.f32.gmra.mxu0 %vm168_vm1, %v5557_v19  ;;  %5220 = vmatprep.subr.mxu0 %v5558_v30 }
0x16ab   :  { %5183 = vmatprep.mubr.msk.f32.mxu0 %vm168_vm1, %v5559_v20  ;;  %5221 = vmatpush3.msra.mxu0 %v5558_v30  ;;  %v5583_v30 = vld [vmem:[%s7064_s2 + $0x160] sm:$0xff] }
0x16ac   :  { %5222 = vmatprep.subr.mxu0 %v5560_v10 }
0x16ad   :  { %5223 = vmatpush3.msra.mxu0 %v5560_v10  ;;  %v5584_v10 = vld [vmem:[%s7064_s2 + $0x158] sm:$0xff] }
0x16ae   :  { %5184 = vmatmul.mubr.msk.f32.gmra.mxu0 %vm168_vm1, %v5561_v18  ;;  %5224 = vmatprep.subr.mxu0 %v5562_v28 }
0x16af   :  { %5186 = vmatprep.mubr.msk.f32.mxu0 %vm168_vm1, %v5563_v29  ;;  %5225 = vmatpush3.msra.mxu0 %v5562_v28  ;;  %v5585_v28 = vld [vmem:[%s7064_s2 + $0x150] sm:$0xff] }
0x16b0   :  { %5226 = vmatprep.subr.mxu0 %v5564_v32 }
0x16b1   :  { %5227 = vmatpush3.msra.mxu0 %v5564_v32  ;;  %v5586_v32 = vld [vmem:[%s7064_s2 + $0x148] sm:$0xff] }
0x16b2   :  { %5187 = vmatmul.mubr.msk.f32.gmra.mxu0 %vm168_vm1, %v5565_v27  ;;  %5228 = vmatprep.subr.mxu0 %v5566_v55 }
0x16b3   :  { %5229 = vmatpush3.msra.mxu0 %v5566_v55  ;;  %v5587_v55 = vld [vmem:[%s7064_s2 + $0x140] sm:$0xff] }
0x16b4   :  { %5230 = vmatprep.subr.mxu0 %v5567_v31 }
0x16b5   :  { %5231 = vmatpush3.msra.mxu0 %v5567_v31 }
0x174a   :  { %v5157_v17 = vpop.f32.mrf.mxu0 }
0x174b   :  { %v2400_v11 = vmul.f32 %v5570_v16, %v5157_v17  ;;  %v5588_v17 = vld [vmem:[%s7064_s2 + $0x138] sm:$0xff] }
0x174c   :  { %v2380_v54 = vpop.f32.mrf.mxu0 }
0x174d   :  { %v2399_v57 = vmul.f32 %v5571_v12, %v2380_v54 }
0x1752   :  { %v5160_v5 = vpop.f32.mrf.mxu0 }
0x1753   :  { %v2402_v14 = vmul.f32 %v5568_v26, %v5160_v5  ;;  %v5589_v5 = vld [vmem:[%s7064_s2 + $0x130] sm:$0xff]  ;;  %s5609_s2 = smov 36  }
0x1754   :  { %v2390_v21 = vpop.f32.mrf.mxu0 }
0x1755   :  { %v2401_v22 = vmul.f32 %v5569_v15, %v2390_v21  ;;  %5189 = vmatprep.subr.mxu1 %v2402_v14 }
0x1756   :  { %5190 = vmatpush3.msra.mxu1 %v2402_v14  ;;  %v6631_v36 = vpop.f32.mrf.mxu0 }
0x1757   :  { %5191 = vmatprep.subr.mxu1 %v2401_v22  ;;  %v2555_v54 = vmul.f32 %v5588_v17, %v6631_v36 }
0x1758   :  { %5192 = vmatpush3.msra.mxu1 %v2401_v22 }
0x1759   :  { %5193 = vmatprep.subr.mxu1 %v2400_v11 }
0x175a   :  { %5194 = vmatpush3.msra.mxu1 %v2400_v11 }
0x175b   :  { %5195 = vmatprep.subr.mxu1 %v2399_v57 }
0x175c   :  { %5196 = vmatpush3.msra.mxu1 %v2399_v57 }
0x175d   :  { %5198 = vmatmul.mubr.msk.f32.vlgmr.msra.gmra.mxu1 %vm44_vm0, %v6480_v37  ;;  %v6633_v37 = vpop.f32.mrf.mxu0 }
0x175e   :  { %v2554_v26 = vmul.f32 %v5589_v5, %v6633_v37 }
0x175f   :  { %v5170_v38 = vpop.f32.mrf.mxu0 }
0x1760   :  { %v2557_v27 = vmul.f32 %v5586_v32, %v5170_v38 }
0x1761   :  { %v2485_v39 = vpop.f32.mrf.mxu0 }
0x1762   :  { %v2556_v31 = vmul.f32 %v5587_v55, %v2485_v39 }
0x1763   :  { %v5173_v40 = vpop.f32.mrf.mxu0 }
0x1764   :  { %v2559_v18 = vmul.f32 %v5584_v10, %v5173_v40 }
0x1765   :  { %v2495_v41 = vpop.f32.mrf.mxu0 }
0x1766   :  { %v2558_v29 = vmul.f32 %v5585_v28, %v2495_v41 }
0x1767   :  { %v5176_v42 = vpop.f32.mrf.mxu0 }
0x1768   :  { %v2561_v19 = vmul.f32 %v5582_v2, %v5176_v42  ;;  %v4371_v2 = vld [vmem:[%s7062_s3 + $0x210] sm:$0xff] }
0x1769   :  { %v2505_v43 = vpop.f32.mrf.mxu0 }
0x176a   :  { %v2560_v20 = vmul.f32 %v5583_v30, %v2505_v43 }
0x176b   :  { %v5179_v44 = vpop.f32.mrf.mxu0 }
0x176c   :  { %v2563_v8 = vmul.f32 %v5580_v7, %v5179_v44  ;;  %v4363_v44 = vld [vmem:[%s7062_s3 + $0x1f8] sm:$0xff] }
0x176d   :  { %v2515_v23 = vpop.f32.mrf.mxu0 }
0x176e   :  { %v2562_v25 = vmul.f32 %v5581_v13, %v2515_v23  ;;  %v4362_v23 = vld [vmem:[%s7062_s3 + $0x1f0] sm:$0xff]  ;;  %v4373_v13 = vld [vmem:[%s7062_s3 + $0x220] sm:$0xff] }
0x176f   :  { %v5182_v45 = vpop.f32.mrf.mxu0 }
0x1770   :  { %v2565_v3 = vmul.f32 %v5578_v1, %v5182_v45 }
0x1771   :  { %v2525_v46 = vpop.f32.mrf.mxu0 }
0x1772   :  { %v2564_v6 = vmul.f32 %v5579_v4, %v2525_v46 }
0x1773   :  { %v5185_v47 = vpop.f32.mrf.mxu0 }
0x1774   :  { %v2567_v60 = vmul.f32 %v5575_v59, %v5185_v47 }
0x1775   :  { %v2535_v48 = vpop.f32.mrf.mxu0 }
0x1776   :  { %v2566_v0 = vmul.f32 %v5577_v63, %v2535_v48  ;;  %v4366_v48 = vld [vmem:[%s7062_s3 + $0x2b1] ss:$0 sm:$0xff] }
0x1777   :  { %v5188_v49 = vpop.f32.mrf.mxu0 }
0x1778   :  { %v2569_v51 = vmul.f32 %v5574_v50, %v5188_v49 }
0x1779   :  { %v2545_v52 = vpop.f32.mrf.mxu0 }
0x177a   :  { %v2568_v62 = vmul.f32 %v5576_v61, %v2545_v52  ;;  %5235 = vmatprep.subr.mxu1 %v2569_v51 }
0x177b   :  { %5236 = vmatpush3.msra.mxu1 %v2569_v51 }
0x177c   :  { %5237 = vmatprep.subr.mxu1 %v2568_v62 }
0x177d   :  { %5238 = vmatpush3.msra.mxu1 %v2568_v62 }
0x177e   :  { %5239 = vmatprep.subr.mxu1 %v2567_v60 }
0x177f   :  { %5240 = vmatpush3.msra.mxu1 %v2567_v60 }
0x1780   :  { %5241 = vmatprep.subr.mxu1 %v2566_v0 }
0x1781   :  { %5242 = vmatpush3.msra.mxu1 %v2566_v0 }
0x1782   :  { %5243 = vmatprep.subr.mxu1 %v2565_v3 }
0x1783   :  { %5244 = vmatpush3.msra.mxu1 %v2565_v3 }
0x1784   :  { %5245 = vmatprep.subr.mxu1 %v2564_v6 }
0x1785   :  { %5246 = vmatpush3.msra.mxu1 %v2564_v6 }
0x1786   :  { %5247 = vmatprep.subr.mxu1 %v2563_v8 }
0x1787   :  { %5248 = vmatpush3.msra.mxu1 %v2563_v8 }
0x1788   :  { %5249 = vmatprep.subr.mxu1 %v2562_v25 }
0x1789   :  { %5250 = vmatpush3.msra.mxu1 %v2562_v25  ;;  %v4372_v25 = vld [vmem:[%s7062_s3 + $0x218] sm:$0xff] }
0x178a   :  { %5251 = vmatprep.subr.mxu1 %v2561_v19 }
0x178b   :  { %5252 = vmatpush3.msra.mxu1 %v2561_v19  ;;  %v4393_v19 = vld [vmem:[%s7062_s3 + $0x2a8] sm:$0xff] }
0x178c   :  { %5253 = vmatprep.subr.mxu1 %v2560_v20 }
0x178d   :  { %5254 = vmatpush3.msra.mxu1 %v2560_v20 }
0x178e   :  { %5255 = vmatprep.subr.mxu1 %v2559_v18 }
0x178f   :  { %5256 = vmatpush3.msra.mxu1 %v2559_v18 }
0x1790   :  { %5257 = vmatprep.subr.mxu1 %v2558_v29 }
0x1791   :  { %5258 = vmatpush3.msra.mxu1 %v2558_v29 }
0x1792   :  { %5259 = vmatprep.subr.mxu1 %v2557_v27 }
0x1793   :  { %5260 = vmatpush3.msra.mxu1 %v2557_v27  ;;  %v4369_v27 = vld [vmem:[%s7062_s3 + $0x2b4] ss:$0 sm:$0xff] }
0x1794   :  { %5261 = vmatprep.subr.mxu1 %v2556_v31 }
0x1795   :  { %5262 = vmatpush3.msra.mxu1 %v2556_v31  ;;  %v4370_v31 = vld [vmem:[%s7062_s3 + $0x2b5] ss:$0 sm:$0xff] }
0x1796   :  { %5263 = vmatprep.subr.mxu1 %v2555_v54 }
0x1797   :  { %5264 = vmatpush3.msra.mxu1 %v2555_v54 }
0x1798   :  { %5265 = vmatprep.subr.mxu1 %v2554_v26 }
0x1799   :  { %5266 = vmatpush3.msra.mxu1 %v2554_v26 }
0x181d   :  { %v5199_v9 = vpop.f32.mrf.mxu1 }
0x181e   :  { %v6622_v56 = vadd.f32 %v5572_v53, %v5199_v9  ;;  %v5590_v9 = vld [vmem:[%s7065_s1] sm:$0xff] }
0x181f   :  { %v2640_v24 = vpop.f32.mrf.mxu1 }
0x1820   :  { %v6627_v35 = vadd.f32 %v5573_v34, %v2640_v24  ;;  %2651 = vmax.xlane.f32.xlu1 %v6622_v56  ;;  %v5591_v24 = vld [vmem:[%s7065_s1 + $0x8] sm:$0xff] }
0x1822   :  { %2649 = vmax.xlane.f32.xlu0 %v6627_v35 }
0x18a9   :  { %v2652_v14 = vpop.xlane.xlu1 %2651 }
0x18aa   :  { %v2654_v21 = vsub.f32 %v6622_v56, %v2652_v14  ;;  %v4365_v56 = vld [vmem:[%s7062_s3 + $0x208] sm:$0xff] }
0x18ab   :  { %v2650_v15 = vpop.xlane.xlu0 %2649  ;;  %5270 = vmatprep.subr.mxu0 %v4365_v56 }
0x18ac   :  { %v2657_v22 = vmul.f32 1.442695, %v2654_v21  ;;  %v2653_v16 = vsub.f32 %v6627_v35, %v2650_v15  ;;  %v4364_v35 = vld [vmem:[%s7062_s3 + $0x200] sm:$0xff] }
0x18ad   :  { %v4392_v15 = vld [vmem:[%s7062_s3 + $0x2a0] sm:$0xff] }
0x18ae   :  { %v2655_v11 = vmul.f32 1.442695, %v2653_v16  ;;  %5468 = vpow2.f32 %v2657_v22  ;;  %v4391_v22 = vld [vmem:[%s7062_s3 + $0x298] sm:$0xff]  ;;  %v4390_v16 = vld [vmem:[%s7062_s3 + $0x290] sm:$0xff] }
0x18b0   :  { %5470 = vpow2.f32 %v2655_v11  ;;  %v4389_v11 = vld [vmem:[%s7062_s3 + $0x288] sm:$0xff] }
0x18bb   :  { %v5469_v12 = vpop.eup %5468 }
0x18bc   :  { %v2660_v34 = vmul.f32 %v5591_v24, %v5469_v12  ;;  %v4388_v12 = vld [vmem:[%s7062_s3 + $0x280] sm:$0xff] }
0x18bd   :  { %v5471_v57 = vpop.eup %5470  ;;  %v4384_v24 = vld [vmem:[%s7062_s3 + $0x260] sm:$0xff] }
0x18be   :  { %v2659_v53 = vmul.f32 %v5590_v9, %v5471_v57  ;;  %v4387_v57 = vld [vmem:[%s7062_s3 + $0x278] sm:$0xff]  ;;  %v4386_v9 = vld [vmem:[%s7062_s3 + $0x270] sm:$0xff] }
0x18c0   :  { %5232 = vmatprep.mubr.f32.mxu0 %v2659_v53 }
0x18c1   :  { %5233 = vmatmul.mubr.f32.vlgmr.msra.gmra.mxu0 %v2660_v34 }
0x18c2   :  { %5271 = vmatpush3.msra.mxu0 %v4365_v56  ;;  %v4382_v56 = vld [vmem:[%s7062_s3 + $0x250] sm:$0xff] }
0x18c3   :  { %5272 = vmatprep.subr.mxu0 %v4364_v35 }
0x18c4   :  { %5273 = vmatpush3.msra.mxu0 %v4364_v35  ;;  %v4381_v35 = vld [vmem:[%s7062_s3 + $0x248] sm:$0xff] }
0x18c5   :  { %5274 = vmatprep.subr.mxu0 %v4363_v44 }
0x18c6   :  { %5275 = vmatpush3.msra.mxu0 %v4363_v44 }
0x18c7   :  { %5276 = vmatprep.subr.mxu0 %v4362_v23 }
0x18c8   :  { %5277 = vmatpush3.msra.mxu0 %v4362_v23 }
0x1981   :  { %v5234_v36 = vpop.f32.mrf.mxu0 }
0x1982   :  { %v2737_v37 = vmax.f32 %v5234_v36, 1e-20  ;;  %v4380_v36 = vld [vmem:[%s7062_s3 + $0x240] sm:$0xff] }
0x1983   :  { %v2727_v38 = vpop.f32.mrf.mxu0 }
0x1984   :  { %v2736_v39 = vmax.f32 %v2727_v38, 1e-20  ;;  %5472 = vrcp.f32 %v2737_v37  ;;  %v4379_v37 = vld [vmem:[%s7062_s3 + $0x238] sm:$0xff]  ;;  %v4378_v38 = vld [vmem:[%s7062_s3 + $0x230] sm:$0xff] }
0x1986   :  { %5474 = vrcp.f32 %v2736_v39  ;;  %v4375_v39 = vld [vmem:[%s7062_s3 + $0x2b2] ss:$0 sm:$0xff] }
0x1991   :  { %v5473_v40 = vpop.eup %5472 }
0x1992   :  { %v2741_v43 = vmul.f32 %v5473_v40, %v2660_v34  ;;  %v4383_v34 = vld [vmem:[%s7062_s3 + $0x258] sm:$0xff] }
0x1993   :  { %v5475_v41 = vpop.eup %5474 }
0x1994   :  { %v2740_v42 = vmul.f32 %v5475_v41, %v2659_v53  ;;  %v4385_v53 = vld [vmem:[%s7062_s3 + $0x268] sm:$0xff] }
0x1996   :  { %5267 = vmatprep.mubr.f32.mxu1 %v2740_v42 }
0x1997   :  { %5268 = vmatmul.mubr.f32.vlgmr.msra.gmra.mxu1 %v2741_v43 }
0x1a57   :  { %v5269_v45 = vpop.f32.mrf.mxu1 }
0x1a59   :  { %v2808_v46 = vpop.f32.mrf.mxu1 }
0x1a5a   :  { %5278 = vmatprep.mubr.msk.f32.mxu0 %vm44_vm0, %v2808_v46 }
0x1a5b   :  { %5279 = vmatmul.mubr.msk.f32.vlgmr.msra.gmra.mxu0 %vm44_vm0, %v5269_v45 }
0x1b1b   :  { %v5280_v47 = vpop.f32.mrf.mxu0 }
0x1b1c   :  { %v2903_v50 = vadd.f32 %v5280_v47, %v4366_v48 }
0x1b1d   :  { %v2897_v49 = vpop.f32.mrf.mxu0 }
0x1b1e   :  { %v2898_v51 = vadd.f32 %v4366_v48, %v2897_v49  ;;  %v2907_v60 = vadd.f32 %v2903_v50, %v6470_v33  ;;  %v4374_v33 = vld [vmem:[%s7062_s3 + $0x228] sm:$0xff] }
0x1b1f   :  { %5281 = vmatprep.subr.mxu0 %v4374_v33 }
0x1b20   :  { %v2906_v52 = vadd.f32 %v2898_v51, %v6466_v58  ;;  %v2911_v61 = vsel %vm44_vm0, %v2907_v60, 0.0  ;;  %5282 = vmatpush3.msra.mxu0 %v4374_v33 }
0x1b21   :  { %5283 = vmatprep.subr.mxu0 %v4373_v13 }
0x1b22   :  { %v2908_v59 = vsel %vm44_vm0, %v2906_v52, 0.0  ;;  %5284 = vmatpush3.msra.mxu0 %v4373_v13 }
0x1b23   :  { %2909 = vadd.xlane.f32.xlu0 %v2908_v59  ;;  %5285 = vmatprep.subr.mxu0 %v4372_v25  ;;  %v4394_v59 = vld [vmem:[%s7062_s3 + $0x2b3] ss:$0 sm:$0xff] }
0x1b24   :  { %5286 = vmatpush3.msra.mxu0 %v4372_v25 }
0x1b25   :  { %5287 = vmatprep.subr.mxu0 %v4371_v2 }
0x1b26   :  { %5288 = vmatpush3.msra.mxu0 %v4371_v2 }
0x1b27   :  { %2912 = vadd.xlane.f32.xlu0 %v2911_v61  ;;  %5292 = vmatprep.subr.mxu0 %v4393_v19 }
0x1bac   :  { %v2910_v62 = vpop.xlane.xlu0 %2909 }
0x1bad   :  { %v2914_v63 = vmul.f32 0.03125, %v2910_v62 }
0x1baf   :  { %v2916_v0 = vsub.f32 %v2906_v52, %v2914_v63 }
0x1bb0   :  { %v2913_v1 = vpop.xlane.xlu0 %2912 }
0x1bb1   :  { %v2915_v3 = vmul.f32 0.03125, %v2913_v1  ;;  %v2918_v4 = vmul.f32 %v2916_v0, %v2916_v0 }
0x1bb3   :  { %v2917_v6 = vsub.f32 %v2907_v60, %v2915_v3  ;;  %v2920_v7 = vsel %vm44_vm0, %v2918_v4, 0.0 }
0x1bb4   :  { %2921 = vadd.xlane.f32.xlu0 %v2920_v7 }
0x1bb5   :  { %v2919_v8 = vmul.f32 %v2917_v6, %v2917_v6 }
0x1bb7   :  { %v2923_v58 = vsel %vm44_vm0, %v2919_v8, 0.0 }
0x1bb8   :  { %2924 = vadd.xlane.f32.xlu0 %v2923_v58 }
0x1c3d   :  { %v2922_v30 = vpop.xlane.xlu0 %2921 }
0x1c3e   :  { %v2926_v20 = vmul.f32 0.03125, %v2922_v30 }
0x1c40   :  { %v2928_v10 = vadd.f32 1e-05, %v2926_v20  ;;  %v5594_v20 = vmov 0.0  }
0x1c41   :  { %v2925_v18 = vpop.xlane.xlu0 %2924  ;;  %5327 = vmatprep.subr.mxu1 %v5594_v20  ;;  %5331 = vmatprep.mubr.msk.f32.mxu1 %vm5595_vm2, %v5594_v20 }
0x1c42   :  { %5476 = vrsqrt.f32 %v2928_v10  ;;  %v2927_v28 = vmul.f32 0.03125, %v2925_v18 }
0x1c44   :  { %v2929_v29 = vadd.f32 1e-05, %v2927_v28 }
0x1c46   :  { %5478 = vrsqrt.f32 %v2929_v29 }
0x1c4f   :  { %v5477_v32 = vpop.eup %5476 }
0x1c50   :  { %v2932_v55 = vmul.f32 %v5477_v32, %v2916_v0 }
0x1c52   :  { %v2938_v17 = vmul.f32 %v4369_v27, %v2932_v55 }
0x1c53   :  { %v5479_v54 = vpop.eup %5478 }
0x1c54   :  { %v2933_v5 = vmul.f32 %v5479_v54, %v2917_v6  ;;  %v6737_v26 = vadd.f32 %v4370_v31, %v2938_v17  ;;  %v4396_v54 = vld [vmem:[%s7062_s3 + $0x2b7] ss:$0 sm:$0xff] }
0x1c56   :  { %v2939_v14 = vmul.f32 %v4369_v27, %v2933_v5  ;;  %5289 = vmatprep.mubr.msk.f32.mxu0 %vm44_vm0, %v6737_v26 }
0x1c58   :  { %v6741_v21 = vadd.f32 %v4370_v31, %v2939_v14  ;;  %v4395_v31 = vld [vmem:[%s7062_s3 + $0x2b6] ss:$0 sm:$0xff] }
0x1c5a   :  { %5290 = vmatmul.mubr.msk.f32.vlgmr.msra.gmra.mxu0 %vm44_vm0, %v6741_v21 }
0x1c5b   :  { %5293 = vmatpush3.msra.mxu0 %v4393_v19 }
0x1c5c   :  { %5294 = vmatprep.subr.mxu0 %v4392_v15 }
0x1c5d   :  { %5295 = vmatpush3.msra.mxu0 %v4392_v15 }
0x1c5e   :  { %5296 = vmatprep.subr.mxu0 %v4391_v22 }
0x1c5f   :  { %5297 = vmatpush3.msra.mxu0 %v4391_v22 }
0x1c60   :  { %5298 = vmatprep.subr.mxu0 %v4390_v16 }
0x1c61   :  { %5299 = vmatpush3.msra.mxu0 %v4390_v16 }
0x1c62   :  { %5300 = vmatprep.subr.mxu0 %v4389_v11 }
0x1c63   :  { %5301 = vmatpush3.msra.mxu0 %v4389_v11 }
0x1c64   :  { %5302 = vmatprep.subr.mxu0 %v4388_v12 }
0x1c65   :  { %5303 = vmatpush3.msra.mxu0 %v4388_v12 }
0x1c66   :  { %5304 = vmatprep.subr.mxu0 %v4387_v57 }
0x1c67   :  { %5305 = vmatpush3.msra.mxu0 %v4387_v57  ;;  %v3181_v57 = vld [vmem:[%s7065_s1 + $0x28] sm:$0x3] }
0x1c68   :  { %5306 = vmatprep.subr.mxu0 %v4386_v9 }
0x1c69   :  { %5307 = vmatpush3.msra.mxu0 %v4386_v9 }
0x1c6a   :  { %5308 = vmatprep.subr.mxu0 %v4385_v53 }
0x1c6b   :  { %5309 = vmatpush3.msra.mxu0 %v4385_v53 }
0x1c6c   :  { %5310 = vmatprep.subr.mxu0 %v4384_v24 }
0x1c6d   :  { %5311 = vmatpush3.msra.mxu0 %v4384_v24 }
0x1c6e   :  { %5312 = vmatprep.subr.mxu0 %v4383_v34 }
0x1c6f   :  { %5313 = vmatpush3.msra.mxu0 %v4383_v34 }
0x1c70   :  { %5314 = vmatprep.subr.mxu0 %v4382_v56 }
0x1c71   :  { %5315 = vmatpush3.msra.mxu0 %v4382_v56 }
0x1c72   :  { %5316 = vmatprep.subr.mxu0 %v4381_v35 }
0x1c73   :  { %5317 = vmatpush3.msra.mxu0 %v4381_v35 }
0x1c74   :  { %5318 = vmatprep.subr.mxu0 %v4380_v36 }
0x1c75   :  { %5319 = vmatpush3.msra.mxu0 %v4380_v36 }
0x1c76   :  { %5320 = vmatprep.subr.mxu0 %v4379_v37 }
0x1c77   :  { %5321 = vmatpush3.msra.mxu0 %v4379_v37 }
0x1c78   :  { %5322 = vmatprep.subr.mxu0 %v4378_v38 }
0x1c79   :  { %5323 = vmatpush3.msra.mxu0 %v4378_v38 }
0x1d1a   :  { %v5291_v40 = vpop.f32.mrf.mxu0 }
0x1d1b   :  { %v3032_v41 = vadd.f32 %v5291_v40, %v4375_v39 }
0x1d1c   :  { %v3026_v42 = vpop.f32.mrf.mxu0 }
0x1d1d   :  { %v3038_v43 = vmul.f32 0.70710677, %v3032_v41  ;;  %v3027_v44 = vadd.f32 %v4375_v39, %v3026_v42  ;;  %v3036_v50 = vmul.f32 0.5, %v3032_v41  ;;  %v6840_v41 = vld [vmem:[%s7065_s1 + $0x20] sm:$0x3] }
0x1d1f   :  { %5480 = verf.f32 %v3038_v43  ;;  %v3037_v23 = vmul.f32 0.70710677, %v3027_v44  ;;  %v3035_v48 = vmul.f32 0.5, %v3027_v44 }
0x1d21   :  { %5482 = verf.f32 %v3037_v23 }
0x1d2c   :  { %v5481_v45 = vpop.eup %5480 }
0x1d2d   :  { %v3042_v47 = vadd.f32 1.0, %v5481_v45 }
0x1d2e   :  { %v5483_v46 = vpop.eup %5482 }
0x1d2f   :  { %v3041_v49 = vadd.f32 1.0, %v5483_v46  ;;  %v3044_v52 = vmul.f32 %v3042_v47, %v3036_v50  ;;  %v6867_v50 = vld [vmem:[%s7066_s4 + $0x8] sm:$0xff] }
0x1d31   :  { %v3043_v51 = vmul.f32 %v3041_v49, %v3035_v48  ;;  %v6849_v48 = vld [vmem:[%s7066_s4 + $0x18] sm:$0xff]  ;;  %v6860_v49 = vld [vmem:[%s7066_s4 + $0x10] sm:$0xff] }
0x1d33   :  { %5324 = vmatprep.mubr.f32.mxu0 %v3043_v51  ;;  %v6873_v51 = vld [vmem:[%s7066_s4] sm:$0xff] }
0x1d34   :  { %5325 = vmatmul.mubr.f32.vlgmr.msra.gmra.mxu0 %v3044_v52 }
0x1df4   :  { %v5326_v60 = vpop.f32.mrf.mxu0 }
0x1df5   :  { %v3137_v61 = vadd.f32 %v5326_v60, %v4394_v59 }
0x1df6   :  { %v3131_v62 = vpop.f32.mrf.mxu0 }
0x1df7   :  { %v3132_v63 = vadd.f32 %v4394_v59, %v3131_v62  ;;  %v3141_v0 = vadd.f32 %v3137_v61, %v6741_v21 }
0x1df9   :  { %v3145_v1 = vsel %vm44_vm0, %v3141_v0, 0.0  ;;  %v3140_v3 = vadd.f32 %v3132_v63, %v6737_v26 }
0x1dfa   :  { %3146 = vadd.xlane.f32.xlu0 %v3145_v1 }
0x1dfb   :  { %v3142_v4 = vsel %vm44_vm0, %v3140_v3, 0.0 }
0x1dfe   :  { %3143 = vadd.xlane.f32.xlu0 %v3142_v4 }
0x1e83   :  { %v3147_v6 = vpop.xlane.xlu0 %3146 }
0x1e84   :  { %v3149_v7 = vmul.f32 0.03125, %v3147_v6 }
0x1e86   :  { %v3151_v8 = vsub.f32 %v3141_v0, %v3149_v7  ;;  %v4401_v0 = vld [vmem:[%s7066_s4 + $0x70] ss:$0 sm:$0xff] }
0x1e87   :  { %v3144_v58 = vpop.xlane.xlu0 %3143 }
0x1e88   :  { %v3148_v33 = vmul.f32 0.03125, %v3144_v58  ;;  %v3153_v13 = vmul.f32 %v3151_v8, %v3151_v8 }
0x1e8a   :  { %v3150_v25 = vsub.f32 %v3140_v3, %v3148_v33  ;;  %v3157_v2 = vsel %vm44_vm0, %v3153_v13, 0.0 }
0x1e8b   :  { %3158 = vadd.xlane.f32.xlu0 %v3157_v2 }
0x1e8c   :  { %v3152_v19 = vmul.f32 %v3150_v25, %v3150_v25 }
0x1e8e   :  { %v3154_v30 = vsel %vm44_vm0, %v3152_v19, 0.0 }
0x1e8f   :  { %3155 = vadd.xlane.f32.xlu0 %v3154_v30 }
0x1f14   :  { %v3159_v10 = vpop.xlane.xlu0 %3158 }
0x1f15   :  { %v3161_v18 = vmul.f32 0.03125, %v3159_v10 }
0x1f17   :  { %v3163_v28 = vadd.f32 1e-05, %v3161_v18 }
0x1f18   :  { %v3156_v29 = vpop.xlane.xlu0 %3155 }
0x1f19   :  { %5484 = vrsqrt.f32 %v3163_v28  ;;  %v3160_v32 = vmul.f32 0.03125, %v3156_v29 }
0x1f1b   :  { %v3162_v27 = vadd.f32 1e-05, %v3160_v32  ;;  %v4406_v32 = vld [vmem:[%s7066_s4 + $0x74] ss:$0 sm:$0xff] }
0x1f1d   :  { %5486 = vrsqrt.f32 %v3162_v27 }
0x1f26   :  { %v5485_v55 = vpop.eup %5484 }
0x1f27   :  { %v3167_v17 = vmul.f32 %v5485_v55, %v3151_v8 }
0x1f29   :  { %v3173_v5 = vmul.f32 %v4395_v31, %v3167_v17 }
0x1f2a   :  { %v5487_v26 = vpop.eup %5486 }
0x1f2b   :  { %v3166_v14 = vmul.f32 %v5487_v26, %v3150_v25  ;;  %v6811_v21 = vadd.f32 %v4396_v54, %v3173_v5  ;;  %v3539_v5 = vld [vmem:[%s7066_s4 + $0x40] sm:$0xff]  ;;  %v3538_v26 = vld [vmem:[%s7066_s4 + $0x38] sm:$0xff] }
0x1f2d   :  { %5328 = vmatpush3.xpose.msk.msra.mxu1 %vm44_vm0, %v6811_v21  ;;  %v3172_v15 = vmul.f32 %v4395_v31, %v3166_v14  ;;  %v3185_v16 = vrot.slane %v6811_v21, 7  ;;  %v4405_v31 = vld [vmem:[%s7066_s4 + $0x73] ss:$0 sm:$0xff] }
0x1f2e   :  { %5329 = vmatprep.subr.mxu1 %v5594_v20  ;;  %v3537_v14 = vld [vmem:[%s7066_s4 + $0x30] sm:$0xff] }
0x1f2f   :  { %v6816_v22 = vadd.f32 %v4396_v54, %v3172_v15  ;;  %v3540_v54 = vld [vmem:[%s7066_s4 + $0x48] sm:$0xff] }
0x1f30   :  { %v3536_v15 = vld [vmem:[%s7066_s4 + $0x28] sm:$0xff] }
0x1f31   :  { %5330 = vmatpush3.xpose.msk.msra.mxu1 %vm44_vm0, %v6816_v22  ;;  %5375 = vmatprep.mubr.msk.f32.mxu0 %vm44_vm0, %v6816_v22  ;;  %v3188_v11 = vsel %vm3187_vm3, %v6816_v22, %v3185_v16  ;;  %v3535_v16 = vld [vmem:[%s7066_s4 + $0x20] sm:$0xff]  ;;  %vm4204_vm3 = vcmask 293888  }
0x1f32   :  { %5334 = vmatprep.subr.mxu1 %v5594_v20 }
0x1f34   :  { %5332 = vmatmul.mubr.msk.f32.vlgmr.msra.gmra.mxu1 %vm44_vm0, %v3188_v11 }
0x1f35   :  { %5335 = vmatpush3.msra.mxu1 %v6811_v21  ;;  %5338 = vmatprep.mubr.msk.f32.mxu1 %vm5595_vm2, %v5594_v20 }
0x1f36   :  { %5336 = vmatprep.subr.mxu1 %v5594_v20 }
0x1f37   :  { %5337 = vmatpush3.msra.mxu1 %v6816_v22 }
0x1f38   :  { %5341 = vmatprep.subr.mxu1 %v5594_v20 }
0x1ff4   :  { %v3263_v12 = vpop.f32.mrf.mxu1 }
0x1ff5   :  { %v3267_v9 = vmul.f32 0.17677669, %v3263_v12  ;;  %v3965_v12 = vsel %vm3269_vm4, %v6840_v41, 0.0 }
0x1ff6   :  { %v5333_v53 = vpop.f32.mrf.mxu1 }
0x1ff7   :  { %v3268_v24 = vadd.f32 %v3267_v9, %v3181_v57 }
0x1ff9   :  { %v3270_v34 = vsel %vm3269_vm4, %v3268_v24, -inf }
0x1ffa   :  { %3271 = vmax.xlane.f32.xlu0 %v3270_v34 }
0x2083   :  { %v3272_v56 = vpop.xlane.xlu0 %3271 }
0x2084   :  { %v3273_v35 = vsub.f32 %v3268_v24, %v3272_v56 }
0x2086   :  { %v3274_v36 = vmul.f32 1.442695, %v3273_v35 }
0x2088   :  { %5488 = vpow2.f32 %v3274_v36 }
0x2095   :  { %v5489_v37 = vpop.eup %5488 }
0x2096   :  { %v3276_v38 = vsel %vm3269_vm4, %v5489_v37, 0.0 }
0x2097   :  { %3277 = vadd.xlane.f32.xlu0 %v3276_v38  ;;  %v4403_v38 = vld [vmem:[%s7066_s4 + $0x71] ss:$0 sm:$0xff] }
0x2120   :  { %v3278_v39 = vpop.xlane.xlu0 %3277 }
0x2121   :  { %5490 = vrcp.f32 %v3278_v39 }
0x212e   :  { %v5491_v40 = vpop.eup %5490 }
0x212f   :  { %v3280_v42 = vmul.f32 %v5491_v40, %v5489_v37 }
0x2131   :  { %v3281_v43 = vmul.f32 %v3280_v42, %v6840_v41 }
0x2133   :  { %v3282_v44 = vsel %vm3269_vm4, %v3281_v43, 0.0 }
0x2134   :  { %3283 = vadd.xlane.f32.xlu1 %v3282_v44  ;;  %v4404_v44 = vld [vmem:[%s7066_s4 + $0x72] ss:$0 sm:$0xff] }
0x2145   :  { %3679 = vrot.lane.b32.xlu1 %v6849_v48, %s5596_s28 }
0x2149   :  { %3677 = vrot.lane.b32.xlu1 %v6860_v49, %s5596_s28 }
0x214d   :  { %3673 = vrot.lane.b32.xlu1 %v6873_v51, %s5596_s28 }
0x21bd   :  { %v3284_v23 = vpop.xlane.xlu1 %3283 }
0x21be   :  { %v3285_v45 = vmax.f32 %v3284_v23, 1e-09 }
0x21c0   :  { %5492 = vrcp.f32 %v3285_v45 }
0x21c1   :  { %v3680_v62 = vpop.permute.xlu1 %3679 }
0x21c2   :  { %5367 = vmatprep.subr.mxu0 %v3680_v62 }
0x21c3   :  { %5368 = vmatpush3.msra.mxu0 %v3680_v62 }
0x21c5   :  { %v3678_v63 = vpop.permute.xlu1 %3677 }
0x21c6   :  { %5369 = vmatprep.subr.mxu0 %v3678_v63 }
0x21c7   :  { %5370 = vmatpush3.msra.mxu0 %v3678_v63 }
0x21c9   :  { %v3674_v33 = vpop.permute.xlu1 %3673 }
0x21cd   :  { %v5493_v46 = vpop.eup %5492 }
0x21ce   :  { %v6844_v47 = vmul.f32 %v5493_v46, %v3281_v43 }
0x21d0   :  { %5339 = vmatmul.mubr.msk.f32.vlgmr.msra.gmra.mxu1 %vm168_vm1, %v6844_v47 }
0x21d1   :  { %5342 = vmatpush3.msra.mxu1 %v6849_v48  ;;  %5349 = vmatprep.mubr.msk.f32.mxu1 %vm5595_vm2, %v5594_v20 }
0x21d2   :  { %5343 = vmatprep.subr.mxu1 %v5594_v20 }
0x21d3   :  { %5344 = vmatpush3.msra.mxu1 %v6860_v49 }
0x21d4   :  { %5345 = vmatprep.subr.mxu1 %v5594_v20 }
0x21d5   :  { %5346 = vmatpush3.msra.mxu1 %v6867_v50 }
0x21d6   :  { %5347 = vmatprep.subr.mxu1 %v5594_v20 }
0x21d7   :  { %5348 = vmatpush3.msra.mxu1 %v6873_v51 }
0x21d8   :  { %5352 = vmatprep.subr.mxu1 %v5594_v20 }
0x2290   :  { %v3357_v52 = vpop.f32.mrf.mxu1 }
0x2291   :  { %v3361_v59 = vadd.f32 %v3357_v52, %v3188_v11  ;;  %v6946_v11 = vld [vmem:[%s7066_s4 + $0x68] sm:$0xff] }
0x2292   :  { %v5340_v60 = vpop.f32.mrf.mxu1 }
0x2293   :  { %v6881_v61 = vmul.f32 0.5, %v3361_v59 }
0x2295   :  { %5350 = vmatmul.mubr.msk.f32.vlgmr.msra.gmra.mxu1 %vm44_vm0, %v6881_v61 }
0x2296   :  { %5364 = vmatprep.mubr.msk.f32.mxu1 %vm5595_vm2, %v5594_v20  ;;  %5353 = vmatpush3.msra.mxu1 %v3540_v54 }
0x2297   :  { %5354 = vmatprep.subr.mxu1 %v5594_v20 }
0x2298   :  { %5355 = vmatpush3.msra.mxu1 %v3539_v5 }
0x2299   :  { %5356 = vmatprep.subr.mxu1 %v5594_v20 }
0x229a   :  { %5357 = vmatpush3.msra.mxu1 %v3538_v26 }
0x229b   :  { %5358 = vmatprep.subr.mxu1 %v5594_v20 }
0x229c   :  { %5359 = vmatpush3.msra.mxu1 %v3537_v14  ;;  %v3770_v14 = vld [vmem:[%s7066_s4 + $0x60] sm:$0xff] }
0x229d   :  { %5360 = vmatprep.subr.mxu1 %v5594_v20 }
0x229e   :  { %5361 = vmatpush3.msra.mxu1 %v3536_v15 }
0x229f   :  { %5362 = vmatprep.subr.mxu1 %v5594_v20 }
0x22a0   :  { %5363 = vmatpush3.msra.mxu1 %v3535_v16 }
0x22a1   :  { %5378 = vmatprep.subr.mxu1 %v6946_v11 }
0x2355   :  { %v3450_v1 = vpop.f32.mrf.mxu1 }
0x2356   :  { %v6890_v3 = vadd.f32 %v4401_v0, %v3450_v1 }
0x2357   :  { %v5351_v4 = vpop.f32.mrf.mxu1 }
0x2358   :  { %3484 = vrot.lane.b32.xlu0 %v6890_v3, %s5597_s30  ;;  %v3454_v6 = vsel %vm3269_vm4, %v6890_v3, 0.0  ;;  %v3532_v17 = vmax.f32 %v6890_v3, 0.0  ;;  %v3528_v62 = vmul.f32 0.70710677, %v6890_v3 }
0x2359   :  { %3455 = vadd.xlane.f32.xlu1 %v3454_v6 }
0x235c   :  { %3675 = vrot.lane.b32.xlu0 %v6867_v50, %s5596_s28 }
0x23ca   :  { %v3485_v7 = vpop.permute.xlu0 %3484 }
0x23cb   :  { %v3487_v8 = vsel %vm3269_vm4, %v3485_v7, 0.0 }
0x23cc   :  { %3488 = vadd.xlane.f32.xlu0 %v3487_v8 }
0x23ce   :  { %v3676_v58 = vpop.permute.xlu0 %3675 }
0x23cf   :  { %5371 = vmatprep.subr.mxu0 %v3676_v58 }
0x23d0   :  { %5372 = vmatpush3.msra.mxu0 %v3676_v58 }
0x23d1   :  { %5373 = vmatprep.subr.mxu0 %v3674_v33 }
0x23d2   :  { %5374 = vmatpush3.msra.mxu0 %v3674_v33 }
0x23d3   :  { %5376 = vmatmul.mubr.msk.f32.vlgmr.msra.gmra.mxu0 %vm44_vm0, %v6811_v21  ;;  %5392 = vmatprep.subr.mxu0 %v5594_v20 }
0x23d4   :  { %5400 = vmatprep.mubr.msk.f32.mxu0 %vm5595_vm2, %v5594_v20 }
0x23e2   :  { %v3456_v13 = vpop.xlane.xlu1 %3455 }
0x23e3   :  { %v3458_v25 = vmul.f32 0.0625, %v3456_v13 }
0x23e5   :  { %v3459_v2 = vsub.f32 %v6890_v3, %v3458_v25 }
0x23e7   :  { %v3460_v19 = vmul.f32 %v3459_v2, %v3459_v2 }
0x23e9   :  { %v3461_v30 = vsel %vm3269_vm4, %v3460_v19, 0.0 }
0x23ea   :  { %3462 = vadd.xlane.f32.xlu1 %v3461_v30 }
0x2455   :  { %v3489_v10 = vpop.xlane.xlu0 %3488 }
0x2456   :  { %v3490_v18 = vmul.f32 0.0625, %v3489_v10 }
0x2458   :  { %v6905_v28 = vsub.f32 %v6890_v3, %v3490_v18 }
0x245a   :  { %v3492_v29 = vmul.f32 %v6905_v28, %v6905_v28 }
0x245c   :  { %3494 = vrot.lane.b32.xlu0 %v3492_v29, %s5597_s30  ;;  %v3527_v29 = vmul.f32 0.5, %v6890_v3 }
0x2460   :  { %3518 = vrot.lane.b32.xlu0 %v4406_v32, %s5598_s9 }
0x2473   :  { %v3463_v57 = vpop.xlane.xlu1 %3462 }
0x2474   :  { %v3464_v9 = vmul.f32 0.0625, %v3463_v57 }
0x2476   :  { %v3465_v53 = vadd.f32 1e-05, %v3464_v9 }
0x2478   :  { %5494 = vrsqrt.f32 %v3465_v53 }
0x247f   :  { %3966 = vadd.xlane.f32.xlu0 %v3965_v12 }
0x2485   :  { %v5495_v35 = vpop.eup %5494 }
0x2486   :  { %v3467_v37 = vmul.f32 %v5495_v35, %v3459_v2 }
0x2488   :  { %v3472_v40 = vmul.f32 %v4403_v38, %v3467_v37 }
0x248a   :  { %v3477_v45 = vadd.f32 %v4404_v44, %v3472_v40  ;;  %v4071_v44 = vld [vmem:[%s7066_s4 + $0x50] sm:$0xff] }
0x248c   :  { %v3479_v52 = vmul.f32 0.70710677, %v3477_v45  ;;  %v3478_v10 = vmul.f32 0.5, %v3477_v45 }
0x2493   :  { %v5377_v42 = vpop.f32.mrf.mxu0 }
0x2495   :  { %v3751_v23 = vpop.f32.mrf.mxu0 }
0x24ce   :  { %v3495_v27 = vpop.permute.xlu0 %3494 }
0x24cf   :  { %v3497_v55 = vsel %vm3269_vm4, %v3495_v27, 0.0  ;;  %vm4206_vm4 = vcmask 556032  }
0x24d0   :  { %3498 = vadd.xlane.f32.xlu1 %v3497_v55 }
0x24d2   :  { %v3519_v60 = vpop.permute.xlu0 %3518 }
0x24e1   :  { %3509 = vrot.lane.b32.xlu1 %v4405_v31, %s5598_s9 }
0x24e5   :  { %3981 = vrot.lane.b32.xlu1 %v6849_v48, %s5599_s13  ;;  %v4409_v48 = vld [vmem:[%s7066_s4 + $0x77] ss:$0 sm:$0xff] }
0x24e6   :  { %v3757_v63 = vadd.f32 %v5377_v42, %v4409_v48 }
0x24e8   :  { %v3763_v6 = vmul.f32 0.70710677, %v3757_v63  ;;  %v3761_v15 = vmul.f32 0.5, %v3757_v63 }
0x24e9   :  { %3979 = vrot.lane.b32.xlu1 %v6860_v49, %s5599_s13 }
0x24ed   :  { %3977 = vrot.lane.b32.xlu1 %v6867_v50, %s5599_s13  ;;  %v3752_v50 = vadd.f32 %v4409_v48, %v3751_v23  ;;  %v4416_v23 = vld [vmem:[%s7066_s4 + $0x79] ss:$0 sm:$0xff] }
0x24ef   :  { %v3762_v1 = vmul.f32 0.70710677, %v3752_v50  ;;  %v3760_v55 = vmul.f32 0.5, %v3752_v50 }
0x24f1   :  { %3975 = vrot.lane.b32.xlu1 %v6873_v51, %s5599_s13 }
0x24f5   :  { %4062 = vrot.lane.b32.xlu1 %v3532_v17, %s5600_s14 }
0x2508   :  { %v3967_v16 = vpop.xlane.xlu0 %3966 }
0x2559   :  { %v3499_v24 = vpop.xlane.xlu1 %3498 }
0x255a   :  { %v3500_v34 = vmul.f32 0.0625, %v3499_v24  ;;  %v4412_v24 = vld [vmem:[%s7066_s4 + $0x78] ss:$0 sm:$0xff] }
0x255c   :  { %v3501_v56 = vadd.f32 1e-05, %v3500_v34 }
0x255d   :  { %v3510_v36 = vpop.permute.xlu1 %3509 }
0x255e   :  { %5496 = vrsqrt.f32 %v3501_v56 }
0x255f   :  { %5498 = verf.f32 %v3479_v52 }
0x2560   :  { %5500 = verf.f32 %v3528_v62 }
0x2561   :  { %v3982_v39 = vpop.permute.xlu1 %3981  ;;  %5502 = verf.f32 %v3762_v1 }
0x2562   :  { %5393 = vmatpush3.msra.mxu0 %v3982_v39 }
0x2563   :  { %5394 = vmatprep.subr.mxu0 %v5594_v20 }
0x2565   :  { %v3980_v43 = vpop.permute.xlu1 %3979 }
0x2566   :  { %5395 = vmatpush3.msra.mxu0 %v3980_v43  ;;  %v4072_v43 = vld [vmem:[%s7066_s4 + $0x58] sm:$0xff] }
0x2567   :  { %5396 = vmatprep.subr.mxu0 %v5594_v20 }
0x2569   :  { %v3978_v46 = vpop.permute.xlu1 %3977 }
0x256a   :  { %5397 = vmatpush3.msra.mxu0 %v3978_v46 }
0x256b   :  { %v5497_v49 = vpop.eup %5496  ;;  %5398 = vmatprep.subr.mxu0 %v5594_v20 }
0x256c   :  { %v3503_v51 = vmul.f32 %v5497_v49, %v6905_v28  ;;  %v5499_v8 = vpop.eup %5498 }
0x256d   :  { %v3976_v59 = vpop.permute.xlu1 %3975  ;;  %v5501_v58 = vpop.eup %5500  ;;  %v3481_v13 = vadd.f32 1.0, %v5499_v8 }
0x256e   :  { %v3512_v0 = vmul.f32 %v3510_v36, %v3503_v51  ;;  %5399 = vmatpush3.msra.mxu0 %v3976_v59  ;;  %v5503_v33 = vpop.eup %5502  ;;  %v3530_v2 = vadd.f32 1.0, %v5501_v58 }
0x256f   :  { %v3766_v28 = vadd.f32 1.0, %v5503_v33  ;;  %v3482_v27 = vmul.f32 %v3481_v13, %v3478_v10 }
0x2570   :  { %v3521_v4 = vadd.f32 %v3519_v60, %v3512_v0  ;;  %v3531_v31 = vmul.f32 %v3530_v2, %v3527_v29 }
0x2571   :  { %v3768_v5 = vmul.f32 %v3766_v28, %v3760_v55  ;;  %v4063_v60 = vpop.permute.xlu1 %4062 }
0x2572   :  { %v3523_v7 = vmul.f32 0.70710677, %v3521_v4  ;;  %v3522_v19 = vmul.f32 0.5, %v3521_v4 }
0x2574   :  { %5504 = verf.f32 %v3523_v7 }
0x2575   :  { %5506 = verf.f32 %v3763_v6 }
0x2581   :  { %v5505_v25 = vpop.eup %5504 }
0x2582   :  { %v3525_v30 = vadd.f32 1.0, %v5505_v25  ;;  %v5507_v18 = vpop.eup %5506 }
0x2583   :  { %v3767_v17 = vadd.f32 1.0, %v5507_v18 }
0x2584   :  { %v3526_v32 = vmul.f32 %v3525_v30, %v3522_v19 }
0x2585   :  { %v3769_v3 = vmul.f32 %v3767_v17, %v3761_v15  ;;  %v3182_v17 = vld [vmem:[%s7065_s1 + $0x30] sm:$0xff]  ;;  %v3183_v15 = vld [vmem:[%s7065_s1 + $0x38] sm:$0xff] }
0x2586   :  { %v3533_v54 = vsel %vm168_vm1, %v3482_v27, %v3526_v32 }
0x2587   :  { %v3534_v26 = vsel %vm44_vm0, %v3533_v54, %v3531_v31 }
0x2588   :  { %5365 = vmatmul.mubr.msk.f32.vlgmr.msra.gmra.mxu1 %vm3545_vm5, %v3534_v26 }
0x2589   :  { %5379 = vmatpush3.msra.mxu1 %v6946_v11  ;;  %5382 = vmatprep.mubr.msk.f32.mxu1 %vm168_vm1, %v3768_v5  ;;  %v3968_v11 = vmax.f32 %v3967_v16, 1.0 }
0x258a   :  { %5380 = vmatprep.subr.mxu1 %v3770_v14 }
0x258b   :  { %5381 = vmatpush3.msra.mxu1 %v3770_v14  ;;  %5508 = vrcp.f32 %v3968_v11 }
0x258c   :  { %5385 = vmatprep.subr.mxu1 %v5594_v20  ;;  %5383 = vmatmul.mubr.msk.f32.vlgmr.msra.gmra.mxu1 %vm168_vm1, %v3769_v3 }
0x258d   :  { %5386 = vmatpush3.msra.mxu1 %v6811_v21  ;;  %5389 = vmatprep.mubr.msk.f32.mxu1 %vm5595_vm2, %v5594_v20  ;;  %v4407_v21 = vld [vmem:[%s7066_s4 + $0x75] ss:$0 sm:$0xff] }
0x258e   :  { %5387 = vmatprep.subr.mxu1 %v5594_v20 }
0x258f   :  { %5388 = vmatpush3.msra.mxu1 %v6816_v22 }
0x2590   :  { %5390 = vmatmul.mubr.msk.f32.vlgmr.msra.gmra.mxu1 %vm168_vm1, %v6840_v41  ;;  %5403 = vmatprep.subr.mxu1 %v5594_v20 }
0x2591   :  { %5407 = vmatprep.mubr.msk.f32.mxu1 %vm5595_vm2, %v5594_v20  ;;  %5404 = vmatpush3.msra.mxu1 %v4072_v43  ;;  %vm4202_vm2 = vcmask 162816  }
0x2592   :  { %5405 = vmatprep.subr.mxu1 %v5594_v20 }
0x2593   :  { %5406 = vmatpush3.msra.mxu1 %v4071_v44 }
0x2598   :  { %v5509_v53 = vpop.eup %5508 }
0x2648   :  { %v3615_v12 = vpop.f32.mrf.mxu1 }
0x2649   :  { %v6989_v57 = vadd.f32 %v4407_v21, %v3615_v12 }
0x264a   :  { %v5366_v22 = vpop.f32.mrf.mxu1 }
0x264b   :  { %v3649_v9 = vsel %vm3648_vm6, %v6989_v57, -inf  ;;  %v3620_v35 = vsel %vm3619_vm7, %v6989_v57, -inf  ;;  %v3632_v52 = vsel %vm3631_vm9, %v6989_v57, -inf }
0x264c   :  { %3650 = vmax.xlane.f32.xlu0 %v3649_v9  ;;  %v5384_v41 = vpop.f32.mrf.mxu1 }
0x264d   :  { %v6999_v39 = vadd.f32 %v5384_v41, %v4412_v24 }
0x264e   :  { %v3848_v34 = vpop.f32.mrf.mxu1 }
0x264f   :  { %v6995_v56 = vadd.f32 %v4412_v24, %v3848_v34  ;;  %v3861_v42 = vsel %vm3857_vm8, %v6999_v39, -inf }
0x2650   :  { %3621 = vmax.xlane.f32.xlu0 %v3620_v35  ;;  %v3961_v36 = vpop.f32.mrf.mxu1 }
0x2651   :  { %v3970_v37 = vmul.f32 %v5509_v53, %v3961_v36  ;;  %v3858_v40 = vsel %vm3857_vm8, %v6995_v56, -inf  ;;  %v4418_v36 = vld [vmem:[%s7066_s4 + $0x76] ss:$0 sm:$0xff]  ;;  %s5608_s4 = smov 18  }
0x2652   :  { %v5391_v38 = vpop.f32.mrf.mxu1 }
0x2653   :  { %5401 = vmatmul.mubr.msk.f32.vlgmr.msra.gmra.mxu0 %vm44_vm0, %v3970_v37  ;;  %vm4198_vm0 = vcmask 146432  }
0x2654   :  { %3859 = vmax.xlane.f32.xlu0 %v3858_v40 }
0x2658   :  { %3862 = vmax.xlane.f32.xlu0 %v3861_v42 }
0x26d5   :  { %v3651_v50 = vpop.xlane.xlu0 %3650 }
0x26d6   :  { %v3652_v51 = vsub.f32 %v6989_v57, %v3651_v50 }
0x26d8   :  { %v3653_v20 = vmul.f32 1.442695, %v3652_v51 }
0x26d9   :  { %v3622_v7 = vpop.xlane.xlu0 %3621 }
0x26da   :  { %5510 = vpow2.f32 %v3653_v20  ;;  %v3623_v58 = vsub.f32 %v6989_v57, %v3622_v7 }
0x26dc   :  { %v3624_v33 = vmul.f32 1.442695, %v3623_v58 }
0x26dd   :  { %v3860_v8 = vpop.xlane.xlu0 %3859 }
0x26de   :  { %v3864_v13 = vsub.f32 %v6995_v56, %v3860_v8 }
0x26e0   :  { %v3866_v2 = vmul.f32 1.442695, %v3864_v13 }
0x26e1   :  { %v3863_v25 = vpop.xlane.xlu0 %3862 }
0x26e2   :  { %v3865_v19 = vsub.f32 %v6999_v39, %v3863_v25 }
0x26e4   :  { %v3868_v30 = vmul.f32 1.442695, %v3865_v19 }
0x26e7   :  { %v7018_v59 = vpop.eup %5510 }
0x2713   :  { %v4056_v45 = vpop.f32.mrf.mxu0 }
0x2714   :  { %v4057_v46 = vadd.f32 %v4416_v23, %v4056_v45 }
0x2715   :  { %v5402_v48 = vpop.f32.mrf.mxu0 }
0x2716   :  { %v4060_v49 = vmax.f32 %v4057_v46, 0.0 }
0x2718   :  { %4066 = vrot.lane.b32.xlu1 %v4060_v49, %s5601_s19 }
0x273c   :  { %3633 = vmax.xlane.f32.xlu1 %v3632_v52 }
0x274d   :  { %3656 = vrot.lane.b32.xlu1 %v7018_v59, %s5602_s20 }
0x278a   :  { %v4067_v62 = vpop.permute.xlu1 %4066 }
0x278b   :  { %v4070_v63 = vsel %vm4069_vm10, %v4063_v60, %v4067_v62 }
0x278c   :  { %5408 = vmatmul.mubr.msk.f32.vlgmr.msra.gmra.mxu1 %vm168_vm1, %v4070_v63  ;;  %vm4200_vm1 = vcmask 154624  }
0x27c5   :  { %v3634_v0 = vpop.xlane.xlu1 %3633 }
0x27c6   :  { %v3635_v1 = vsub.f32 %v6989_v57, %v3634_v0 }
0x27c8   :  { %v3636_v4 = vmul.f32 1.442695, %v3635_v1 }
0x27c9   :  { %v3657_v55 = vpop.permute.xlu1 %3656 }
0x27ca   :  { %5512 = vpow2.f32 %v3636_v4  ;;  %v3660_v31 = vsel %vm3659_vm11, %v3657_v55, 0.0 }
0x27cb   :  { %5514 = vpow2.f32 %v3624_v33 }
0x27cc   :  { %5516 = vpow2.f32 %v3866_v2 }
0x27cd   :  { %5518 = vpow2.f32 %v3868_v30 }
0x27d7   :  { %v7024_v6 = vpop.eup %5512 }
0x27d8   :  { %3639 = vrot.lane.b32.xlu0 %v7024_v6, %s5603_s21  ;;  %v5515_v10 = vpop.eup %5514 }
0x27d9   :  { %v3626_v18 = vsel %vm3619_vm7, %v5515_v10, 0.0  ;;  %v5517_v28 = vpop.eup %5516 }
0x27da   :  { %v3870_v29 = vsel %vm3857_vm8, %v5517_v28, 0.0  ;;  %v5519_v32 = vpop.eup %5518 }
0x27db   :  { %v3873_v27 = vsel %vm3857_vm8, %v5519_v32, 0.0 }
0x27f7   :  { %3627 = vadd.xlane.f32.xlu0 %v3626_v18 }
0x27fb   :  { %3871 = vadd.xlane.f32.xlu0 %v3870_v29 }
0x27ff   :  { %3874 = vadd.xlane.f32.xlu0 %v3873_v27 }
0x2803   :  { %3661 = vadd.xlane.f32.xlu0 %v3660_v31 }
0x2819   :  { %3884 = vrot.lane.b32.xlu0 %v3182_v17, %s5604_s0 }
0x281d   :  { %4186 = vrot.lane.b32.xlu0 %v6844_v47, %s5605_s23 }
0x284a   :  { %v3640_v54 = vpop.permute.xlu0 %3639 }
0x284b   :  { %v3643_v5 = vsel %vm3642_vm12, %v3640_v54, 0.0 }
0x284c   :  { %v4146_v26 = vpop.f32.mrf.mxu1  ;;  %3644 = vadd.xlane.f32.xlu1 %v3643_v5 }
0x284d   :  { %v4147_v37 = vadd.f32 %v4418_v36, %v4146_v26 }
0x284e   :  { %v5409_v14 = vpop.f32.mrf.mxu1 }
0x284f   :  { %v4420_v38 = vmul.f32 -1.442695, %v4147_v37 }
0x285d   :  { %3886 = vrot.lane.b32.xlu1 %v3183_v15, %s5604_s0 }
0x2880   :  { %v3628_v3 = vpop.xlane.xlu0 %3627 }
0x2881   :  { %5520 = vrcp.f32 %v3628_v3 }
0x2884   :  { %v3872_v16 = vpop.xlane.xlu0 %3871 }
0x2885   :  { %5522 = vrcp.f32 %v3872_v16 }
0x2888   :  { %v3875_v11 = vpop.xlane.xlu0 %3874 }
0x288c   :  { %v3662_v21 = vpop.xlane.xlu0 %3661 }
0x288d   :  { %5524 = vrcp.f32 %v3662_v21 }
0x288e   :  { %v5521_v12 = vpop.eup %5520  ;;  %5526 = vrcp.f32 %v3875_v11 }
0x288f   :  { %v3630_v47 = vmul.f32 %v5521_v12, %v5515_v10  ;;  %5528 = vpow2.f32 %v4420_v38 }
0x2890   :  { %v3885_v53 = vpop.permute.xlu0 %3884 }
0x2891   :  { %4171 = vrot.lane.b32.xlu0 %v3630_v47, %s5606_s26 }
0x2892   :  { %v5523_v22 = vpop.eup %5522 }
0x2893   :  { %v3877_v9 = vmul.f32 %v5523_v22, %v5517_v28 }
0x2894   :  { %v4187_v60 = vpop.permute.xlu0 %4186 }
0x2895   :  { %v3880_v41 = vsub.f32 1.0, %v3877_v9 }
0x2897   :  { %v3890_v24 = vmul.f32 %v3885_v53, %v3880_v41 }
0x2899   :  { %4158 = vrot.lane.b32.xlu1 %v3890_v24, %s5607_s27 }
0x289a   :  { %v5525_v34 = vpop.eup %5524 }
0x289b   :  { %v3664_v35 = vmul.f32 %v5525_v34, %v7018_v59  ;;  %v5527_v40 = vpop.eup %5526 }
0x289c   :  { %v3879_v42 = vmul.f32 %v5527_v40, %v5519_v32  ;;  %v5529_v43 = vpop.eup %5528 }
0x289d   :  { %4179 = vrot.lane.b32.xlu0 %v3664_v35, %s5606_s26  ;;  %v4153_v23 = vadd.f32 1.0, %v5529_v43 }
0x289e   :  { %v3881_v45 = vsub.f32 1.0, %v3879_v42 }
0x28d5   :  { %v3645_v44 = vpop.xlane.xlu1 %3644 }
0x28d6   :  { %5530 = vrcp.f32 %v3645_v44 }
0x28d7   :  { %5532 = vrcp.f32 %v4153_v23 }
0x28d9   :  { %v3887_v46 = vpop.permute.xlu1 %3886 }
0x28da   :  { %v3891_v48 = vmul.f32 %v3887_v46, %v3881_v45 }
0x28dc   :  { %4160 = vrot.lane.b32.xlu0 %v3891_v48, %s5607_s27 }
0x28e3   :  { %v5531_v49 = vpop.eup %5530 }
0x28e4   :  { %v3647_v50 = vmul.f32 %v5531_v49, %v7024_v6  ;;  %v5533_v51 = vpop.eup %5532 }
0x28e6   :  { %4175 = vrot.lane.b32.xlu1 %v3647_v50, %s5606_s26 }
0x28ea   :  { %4183 = vrot.lane.b32.xlu1 %v5533_v51, %s5608_s4 }
0x28ee   :  { %4189 = vrot.lane.b32.xlu1 %v6881_v61, %s5609_s2 }
0x2903   :  { %v4172_v62 = vpop.permute.xlu0 %4171 }
0x2904   :  { %v4193_v61 = vsel %vm4192_vm13, %v6989_v57, %v4172_v62 }
0x290b   :  { %v4159_v20 = vpop.permute.xlu1 %4158 }
0x290c   :  { %v4164_v52 = vsel %vm3857_vm8, %v6995_v56, %v4159_v20 }
0x290d   :  { %v4166_v59 = vsel %vm4069_vm10, %v4164_v52, 0.0 }
0x290e   :  { %4168 = vst [vmem:[%s7067_s5] sm:$0xff] %v4166_v59 }
0x290f   :  { %v4180_v63 = vpop.permute.xlu0 %4179 }
0x294e   :  { %v4161_v0 = vpop.permute.xlu0 %4160 }
0x294f   :  { %v4165_v1 = vsel %vm3857_vm8, %v6999_v39, %v4161_v0 }
0x2950   :  { %v4167_v4 = vsel %vm4069_vm10, %v4165_v1, 0.0 }
0x2951   :  { %4169 = vst [vmem:[%s7067_s5 + $0x8] sm:$0xff] %v4167_v4 }
0x2958   :  { %v4176_v56 = vpop.permute.xlu1 %4175 }
0x2959   :  { %v4195_v6 = vsel %vm4194_vm14, %v4193_v61, %v4176_v56 }
0x295a   :  { %v4197_v8 = vsel %vm4196_vm15, %v4195_v6, %v4180_v63 }
0x295c   :  { %v4184_v7 = vpop.permute.xlu1 %4183 }
0x295d   :  { %v4199_v58 = vsel %vm4198_vm0, %v4197_v8, %v4184_v7 }
0x295e   :  { %v4201_v39 = vsel %vm4200_vm1, %v4199_v58, %v4184_v7 }
0x295f   :  { %v4203_v33 = vsel %vm4202_vm2, %v4201_v39, %v4187_v60 }
0x2960   :  { %v4190_v13 = vpop.permute.xlu1 %4189 }
0x2961   :  { %v4205_v25 = vsel %vm4204_vm3, %v4203_v33, %v4190_v13 }
0x2962   :  { %v4207_v2 = vsel %vm4206_vm4, %v4205_v25, 0.0 }
0x2963   :  { %4208 = vst [vmem:[%s7068_s6] sm:$0x3] %v4207_v2 }

</bundles_post_ra>
